<compile_context>
chip_gen: v7x
topology: tpu7x:2x2x1
jax: 0.10.0
libtpu: 0.0.40
codegen_flags: <defaults>
</compile_context>

<pallas_src>
import functools

import jax
import jax.numpy as jnp
from jax.experimental import pallas as pl
from jax.experimental.pallas import tpu as pltpu

LANE = 128
_VMEM_LIMIT = 32 * 1024 * 1024  # above v5e's 16MiB default scope, safe on v6e/v7x


def _round_up(x, m):
    return ((x + m - 1) // m) * m


def _row_tile(m):
    """Row-tile size: large tiles toward HBM roofline, >=2 grid blocks when possible."""
    if m >= 4096:
        return 1024
    if m >= 1024:
        return 512
    if m >= 512:
        return 256
    return max(8, _round_up(m, 8))


# ----------------------------- Pallas kernels ------------------------------ #

def _mm_bn_relu_kernel(x_ref, w_ref, s_ref, b_ref, o_ref):
    """relu((x @ w) * scale + shift); bf16 in, f32 accumulate, bf16 out."""
    acc = jnp.dot(x_ref[...], w_ref[...], preferred_element_type=jnp.float32)
    y = acc * s_ref[...] + b_ref[...]
    o_ref[...] = jnp.maximum(y, 0.0).astype(o_ref.dtype)


def _dual_mm_bn_add_relu_kernel(a_ref, wa_ref, sa_ref,
                                b_ref, wb_ref, sb_ref, bias_ref, o_ref):
    """relu((a@wa)*sa + (b@wb)*sb + bias) — conv3+bn3 fused with shortcut conv+bn.

    bias = shift3 + shift_sc is pre-combined in the prepare step.
    """
    ya = jnp.dot(a_ref[...], wa_ref[...], preferred_element_type=jnp.float32)
    yb = jnp.dot(b_ref[...], wb_ref[...], preferred_element_type=jnp.float32)
    y = ya * sa_ref[...] + yb * sb_ref[...] + bias_ref[...]
    o_ref[...] = jnp.maximum(y, 0.0).astype(o_ref.dtype)


def _mm_bn_res_relu_kernel(a_ref, wa_ref, sa_ref, ba_ref, res_ref, o_ref):
    """relu((a@wa)*sa + ba + res) — conv3+bn3 fused with identity shortcut."""
    ya = jnp.dot(a_ref[...], wa_ref[...], preferred_element_type=jnp.float32)
    y = ya * sa_ref[...] + ba_ref[...] + res_ref[...].astype(jnp.float32)
    o_ref[...] = jnp.maximum(y, 0.0).astype(o_ref.dtype)


def _conv3x3_bn_relu_kernel(x_ref, w_ref, s_ref, b_ref, o_ref):
    """3x3 (pad=1) conv as 9 accumulated matmul taps + BN + ReLU, per image.

    x_ref: (1, H+2, W+2, C)  bf16  spatially padded input (halo resident in VMEM)
    w_ref: (9, C, Co)        bf16  taps ordered dh*3+dw
    o_ref: (1, H, W, Co)     bf16  stride-1 output (caller subsamples for stride>1)
    """
    _, _, _, C = x_ref.shape
    _, Ho, Wo, Co = o_ref.shape
    acc = jnp.zeros((Ho * Wo, Co), jnp.float32)
    for dh in range(3):
        for dw in range(3):
            xs = x_ref[:, dh:dh + Ho, dw:dw + Wo, :]        # (1, Ho, Wo, C), static slice
            acc = acc + jnp.dot(xs.reshape(Ho * Wo, C), w_ref[dh * 3 + dw],
                                preferred_element_type=jnp.float32)
    y = jnp.maximum(acc * s_ref[...] + b_ref[...], 0.0)
    o_ref[...] = y.reshape(1, Ho, Wo, Co).astype(o_ref.dtype)


# ------------------------------ kernel wrappers ----------------------------- #

def _pad_rows(x, mp):
    m = x.shape[0]
    return jnp.pad(x, ((0, mp - m), (0, 0))) if mp != m else x


def fused_conv1x1_bn_relu(x2d, w, scale, shift):
    """(M,K)bf16 @ (K,Nc)bf16 -> *scale +shift -> relu -> (M,Nc)bf16."""
    M, K = x2d.shape
    Nc = w.shape[1]
    TM = _row_tile(M)
    Mp = _round_up(M, TM)
    x2d = _pad_rows(x2d, Mp)
    out = pl.pallas_call(
        _mm_bn_relu_kernel,
        out_shape=jax.ShapeDtypeStruct((Mp, Nc), jnp.bfloat16),
        grid=(Mp // TM,),
        in_specs=[
            pl.BlockSpec((TM, K), lambda i: (i, 0)),
            pl.BlockSpec((K, Nc), lambda i: (0, 0)),   # grid-invariant -> fetched once
            pl.BlockSpec((1, Nc), lambda i: (0, 0)),
            pl.BlockSpec((1, Nc), lambda i: (0, 0)),
        ],
        out_specs=pl.BlockSpec((TM, Nc), lambda i: (i, 0)),
        compiler_params=pltpu.CompilerParams(
            dimension_semantics=("parallel",), vmem_limit_bytes=_VMEM_LIMIT),
    )(x2d, w, scale, shift)
    return out[:M] if Mp != M else out


def fused_dual_conv1x1_bn_add_relu(a, wa, sa, b, wb, sb, bias):
    """relu((a@wa)*sa + (b@wb)*sb + bias); both matmuls + BNs + add in one kernel."""
    M, Ka = a.shape
    Kb = b.shape[1]
    Nc = wa.shape[1]
    TM = _row_tile(M)
    Mp = _round_up(M, TM)
    a = _pad_rows(a, Mp)
    b = _pad_rows(b, Mp)
    out = pl.pallas_call(
        _dual_mm_bn_add_relu_kernel,
        out_shape=jax.ShapeDtypeStruct((Mp, Nc), jnp.bfloat16),
        grid=(Mp // TM,),
        in_specs=[
            pl.BlockSpec((TM, Ka), lambda i: (i, 0)),
            pl.BlockSpec((Ka, Nc), lambda i: (0, 0)),
            pl.BlockSpec((1, Nc), lambda i: (0, 0)),
            pl.BlockSpec((TM, Kb), lambda i: (i, 0)),
            pl.BlockSpec((Kb, Nc), lambda i: (0, 0)),
            pl.BlockSpec((1, Nc), lambda i: (0, 0)),
            pl.BlockSpec((1, Nc), lambda i: (0, 0)),
        ],
        out_specs=pl.BlockSpec((TM, Nc), lambda i: (i, 0)),
        compiler_params=pltpu.CompilerParams(
            dimension_semantics=("parallel",), vmem_limit_bytes=_VMEM_LIMIT),
    )(a, wa, sa, b, wb, sb, bias)
    return out[:M] if Mp != M else out


def fused_conv1x1_bn_identity_add_relu(a, wa, sa, ba, res):
    """relu((a@wa)*sa + ba + res) for identity-shortcut configs."""
    M, Ka = a.shape
    Nc = wa.shape[1]
    TM = _row_tile(M)
    Mp = _round_up(M, TM)
    a = _pad_rows(a, Mp)
    res = _pad_rows(res, Mp)
    out = pl.pallas_call(
        _mm_bn_res_relu_kernel,
        out_shape=jax.ShapeDtypeStruct((Mp, Nc), jnp.bfloat16),
        grid=(Mp // TM,),
        in_specs=[
            pl.BlockSpec((TM, Ka), lambda i: (i, 0)),
            pl.BlockSpec((Ka, Nc), lambda i: (0, 0)),
            pl.BlockSpec((1, Nc), lambda i: (0, 0)),
            pl.BlockSpec((1, Nc), lambda i: (0, 0)),
            pl.BlockSpec((TM, Nc), lambda i: (i, 0)),
        ],
        out_specs=pl.BlockSpec((TM, Nc), lambda i: (i, 0)),
        compiler_params=pltpu.CompilerParams(
            dimension_semantics=("parallel",), vmem_limit_bytes=_VMEM_LIMIT),
    )(a, wa, sa, ba, res)
    return out[:M] if Mp != M else out


def fused_conv3x3_bn_relu(h_nhwc, w_taps, scale, shift, stride):
    """3x3/pad=1 conv + BN + ReLU fused; grid over batch images (parallel)."""
    N, H, W, C = h_nhwc.shape
    Co = w_taps.shape[-1]
    hp = jnp.pad(h_nhwc, ((0, 0), (1, 1), (1, 1), (0, 0)))
    out = pl.pallas_call(
        _conv3x3_bn_relu_kernel,
        out_shape=jax.ShapeDtypeStruct((N, H, W, Co), jnp.bfloat16),
        grid=(N,),
        in_specs=[
            pl.BlockSpec((1, H + 2, W + 2, C), lambda n: (n, 0, 0, 0)),
            pl.BlockSpec((9, C, Co), lambda n: (0, 0, 0)),  # grid-invariant
            pl.BlockSpec((1, Co), lambda n: (0, 0)),
            pl.BlockSpec((1, Co), lambda n: (0, 0)),
        ],
        out_specs=pl.BlockSpec((1, H, W, Co), lambda n: (n, 0, 0, 0)),
        compiler_params=pltpu.CompilerParams(
            dimension_semantics=("parallel",), vmem_limit_bytes=_VMEM_LIMIT),
    )(hp, w_taps, scale, shift)
    if stride != 1:
        # TODO(synk): fold the stride into the in-kernel tap slices instead of
        # computing the stride-1 output and subsampling (extra compute for s>1).
        out = out[:, ::stride, ::stride, :]
    return out


# ----------------------- one-time parameter preparation --------------------- #

def _bn_fold(gamma, beta, mean, var, conv_bias=None, eps=1e-5):
    scale = gamma / jnp.sqrt(var + eps)
    shift = beta - scale * mean
    if conv_bias is not None:
        shift = shift + scale * conv_bias
    return scale, shift


def _pad_mat(a, rows, cols):
    return jnp.pad(a, ((0, rows - a.shape[0]), (0, cols - a.shape[1])))


def prepare_bottleneck(p):
    """Hoisted out of the per-forward hot path: fold BN into scale/shift, reshape
    convs to matmul form, zero-pad channel axes to 128 lanes, cast weights to bf16."""
    cin = p["w1"].shape[1]
    planes = p["w1"].shape[0]
    cexp = p["w3"].shape[0]
    cin_p, pln_p, cexp_p = (_round_up(c, LANE) for c in (cin, planes, cexp))
    stride = int(p["stride"])
    has_shortcut_conv = (stride != 1) or (cin != cexp)

    def mat(w_oihw):                                   # (O, I, 1, 1) -> (I, O)
        return jnp.transpose(w_oihw[:, :, 0, 0], (1, 0))

    def pad_sv(scale, shift, n):                       # -> (1, n) f32 rows
        s = jnp.pad(scale, (0, n - scale.shape[0])).reshape(1, n).astype(jnp.float32)
        b = jnp.pad(shift, (0, n - shift.shape[0])).reshape(1, n).astype(jnp.float32)
        return s, b

    s1, b1 = _bn_fold(*p["bn1"])
    s2, b2 = _bn_fold(*p["bn2"])
    s3, b3 = _bn_fold(*p["bn3"])

    # conv2 taps: (O, I, 3, 3) -> (9, I_pad, O_pad), tap index = dh*3 + dw.
    w2_taps = jnp.transpose(p["w2"], (2, 3, 1, 0)).reshape(9, planes, planes)
    w2_taps = jnp.pad(w2_taps, ((0, 0), (0, pln_p - planes), (0, pln_p - planes)))

    prep = {
        "stride": stride,
        "has_shortcut_conv": has_shortcut_conv,
        "cin": cin, "planes": planes, "cexp": cexp,
        "cin_p": cin_p, "planes_p": pln_p, "cexp_p": cexp_p,
        "w1": _pad_mat(mat(p["w1"]), cin_p, pln_p).astype(jnp.bfloat16),
        "w2": w2_taps.astype(jnp.bfloat16),
        "w3": _pad_mat(mat(p["w3"]), pln_p, cexp_p).astype(jnp.bfloat16),
    }
    prep["s1"], prep["b1"] = pad_sv(s1, b1, pln_p)
    prep["s2"], prep["b2"] = pad_sv(s2, b2, pln_p)
    prep["s3"], prep["b3"] = pad_sv(s3, b3, cexp_p)

    if has_shortcut_conv:
        ssc, bsc = _bn_fold(*p["bnsc"], conv_bias=p["bsc"])   # conv bias absorbed
        prep["wsc"] = _pad_mat(mat(p["wsc"]), cin_p, cexp_p).astype(jnp.bfloat16)
        prep["ssc"], prep["bsc"] = pad_sv(ssc, bsc, cexp_p)
        prep["b3sc"] = prep["b3"] + prep["bsc"]                # combined bias (one add)
    return prep


# ------------------------------- forward pass ------------------------------- #

def bottleneck_pallas(x_nchw, prep):
    """Bottleneck forward (inference). NCHW in / NCHW out like the PyTorch module."""
    stride = prep["stride"]
    cin_p, pln_p, cexp_p = prep["cin_p"], prep["planes_p"], prep["cexp_p"]

    x = jnp.transpose(x_nchw, (0, 2, 3, 1))                       # NCHW -> NHWC
    N, H, W, _ = x.shape
    x = jnp.pad(x.astype(jnp.bfloat16),
                ((0, 0), (0, 0), (0, 0), (0, cin_p - prep["cin"])))

    # conv1 (1x1) + bn1 + relu — fused matmul kernel
    h1 = fused_conv1x1_bn_relu(x.reshape(-1, cin_p), prep["w1"], prep["s1"], prep["b1"])
    h1 = h1.reshape(N, H, W, pln_p)

    # conv2 (3x3, stride, pad=1) + bn2 + relu — 9 taps accumulated in-kernel (no im2col)
    h2 = fused_conv3x3_bn_relu(h1, prep["w2"], prep["s2"], prep["b2"], stride)
    _, Ho, Wo, _ = h2.shape

    # conv3 (1x1) + bn3  +  shortcut (+ add + relu) — one kernel, no f32 HBM round-trip
    if prep["has_shortcut_conv"]:
        xs = x[:, ::stride, ::stride, :]
        out = fused_dual_conv1x1_bn_add_relu(
            h2.reshape(-1, pln_p), prep["w3"], prep["s3"],
            xs.reshape(-1, cin_p), prep["wsc"], prep["ssc"], prep["b3sc"])
    else:
        out = fused_conv1x1_bn_identity_add_relu(
            h2.reshape(-1, pln_p), prep["w3"], prep["s3"], prep["b3"],
            x.reshape(-1, cexp_p))

    out = out.reshape(N, Ho, Wo, cexp_p)[:, :, :, :prep["cexp"]]
    return jnp.transpose(out, (0, 3, 1, 2)).astype(jnp.float32)   # -> NCHW


def make_bottleneck_fn(prep):
    """Jitted forward closing over prepared params (stride stays a Python constant)."""
    return jax.jit(functools.partial(bottleneck_pallas, prep=prep))


# --------------------------- pure-JAX reference ----------------------------- #

def bottleneck_ref(x_nchw, p):
    x = jnp.transpose(x_nchw, (0, 2, 3, 1)).astype(jnp.float32)

    def conv(inp, w_oihw, stride=1, pad=0):
        return jax.lax.conv_general_dilated(
            inp, jnp.transpose(w_oihw, (2, 3, 1, 0)),
            window_strides=(stride, stride),
            padding=[(pad, pad), (pad, pad)],
            dimension_numbers=("NHWC", "HWIO", "NHWC"))

    def bn(inp, gamma, beta, mean, var, eps=1e-5):
        return (inp - mean) / jnp.sqrt(var + eps) * gamma + beta

    out = jax.nn.relu(bn(conv(x, p["w1"]), *p["bn1"]))
    out = jax.nn.relu(bn(conv(out, p["w2"], stride=p["stride"], pad=1), *p["bn2"]))
    out = bn(conv(out, p["w3"]), *p["bn3"])
    sc = conv(x, p["wsc"], stride=p["stride"]) + p["bsc"]
    sc = bn(sc, *p["bnsc"])
    out = jax.nn.relu(out + sc)
    return jnp.transpose(out, (0, 3, 1, 2))


# --------------------------------- main ------------------------------------ #

def make_params(key, in_planes, planes, stride):
    exp = 4
    cexp = exp * planes
    ks = jax.random.split(key, 16)

    def w(k, shape):
        return jax.random.normal(k, shape, jnp.float32) * 0.1

    def bn_params(k, c):
        k1, k2, k3, k4 = jax.random.split(k, 4)
        gamma = jax.random.uniform(k1, (c,), jnp.float32, 0.5, 1.5)
        beta = jax.random.normal(k2, (c,), jnp.float32) * 0.1
        mean = jax.random.normal(k3, (c,), jnp.float32) * 0.1
        var = jax.random.uniform(k4, (c,), jnp.float32, 0.5, 1.5)
        return (gamma, beta, mean, var)

    return {
        "stride": stride,
        "w1": w(ks[0], (planes, in_planes, 1, 1)),
        "bn1": bn_params(ks[1], planes),
        "w2": w(ks[2], (planes, planes, 3, 3)),
        "bn2": bn_params(ks[3], planes),
        "w3": w(ks[4], (cexp, planes, 1, 1)),
        "bn3": bn_params(ks[5], cexp),
        "wsc": w(ks[6], (cexp, in_planes, 1, 1)),
        "bsc": w(ks[7], (cexp,)),
        "bnsc": bn_params(ks[8], cexp),
    }


if __name__ == "__main__":
    key = jax.random.PRNGKey(0)
    kx, kp = jax.random.split(key)

    in_planes, planes, stride = 4, 4, 1          # expansion*planes = 16 -> shortcut conv active
    x = jax.random.normal(kx, (2, in_planes, 16, 16), jnp.float32)  # NCHW like PyTorch
    params = make_params(kp, in_planes, planes, stride)

    prep = prepare_bottleneck(params)            # one-time weight/BN prep (hoisted)
    fwd = make_bottleneck_fn(prep)               # whole forward compiled once
    out = jax.block_until_ready(fwd(x))
    ref = jax.block_until_ready(bottleneck_ref(x, params))

    assert out.shape == (2, 4 * planes, 16, 16), out.shape
    max_err = float(jnp.max(jnp.abs(out - ref)))
    assert jnp.allclose(out, ref, rtol=5e-2, atol=5e-2), max_err  # bf16 hot path tolerance
    print("KERNEL_OK")
</pallas_src>

<mosaic_0001>
module attributes {stable_mosaic.version = 11 : i64} {
  func.func @_mm_bn_relu_kernel(%arg0: i32, %arg1: memref<256x128xbf16, #tpu.memory_space<vmem>>, %arg2: memref<128x128xbf16, #tpu.memory_space<vmem>>, %arg3: memref<1x128xf32, #tpu.memory_space<vmem>>, %arg4: memref<1x128xf32, #tpu.memory_space<vmem>>, %arg5: memref<256x128xbf16, #tpu.memory_space<vmem>>) attributes {dimension_semantics = [#tpu.dimension_semantics<parallel>], iteration_bounds = array<i64: 2>, scalar_prefetch = 0 : i64, scratch_operands = 0 : i64, tpu.core_type = #tpu.core_type<tc>, window_params = [{transform_indices = @transform_0, window_bounds = array<i64: 256, 128>}, {pipeline_mode = #tpu.pipeline_mode<synchronous>, transform_indices = @transform_1, window_bounds = array<i64: 128, 128>}, {pipeline_mode = #tpu.pipeline_mode<synchronous>, transform_indices = @transform_2, window_bounds = array<i64: 1, 128>}, {pipeline_mode = #tpu.pipeline_mode<synchronous>, transform_indices = @transform_3, window_bounds = array<i64: 1, 128>}, {transform_indices = @transform_4, window_bounds = array<i64: 256, 128>}]} {
    %c0 = arith.constant 0 : index
    %c0_0 = arith.constant 0 : index
    %0 = vector.load %arg1[%c0, %c0_0] : memref<256x128xbf16, #tpu.memory_space<vmem>>, vector<256x128xbf16>
    %c0_1 = arith.constant 0 : index
    %c0_2 = arith.constant 0 : index
    %1 = vector.load %arg2[%c0_1, %c0_2] : memref<128x128xbf16, #tpu.memory_space<vmem>>, vector<128x128xbf16>
    %cst = arith.constant dense<0.000000e+00> : vector<256x128xf32>
    %2 = tpu.matmul %0, %1, %cst {dimension_numbers = #tpu.dot_dimension_numbers<[1], [0], [0], [1], [0, 0, 1, 1], [], []>} : vector<256x128xbf16>, vector<128x128xbf16>, vector<256x128xf32> -> vector<256x128xf32>
    %c0_3 = arith.constant 0 : index
    %c0_4 = arith.constant 0 : index
    %3 = vector.load %arg3[%c0_3, %c0_4] : memref<1x128xf32, #tpu.memory_space<vmem>>, vector<1x128xf32>
    %4 = vector.broadcast %3 : vector<1x128xf32> to vector<256x128xf32>
    %5 = arith.mulf %2, %4 : vector<256x128xf32>
    %c0_5 = arith.constant 0 : index
    %c0_6 = arith.constant 0 : index
    %6 = vector.load %arg4[%c0_5, %c0_6] : memref<1x128xf32, #tpu.memory_space<vmem>>, vector<1x128xf32>
    %7 = vector.broadcast %6 : vector<1x128xf32> to vector<256x128xf32>
    %8 = arith.addf %5, %7 : vector<256x128xf32>
    %cst_7 = arith.constant 0.000000e+00 : f32
    %9 = vector.broadcast %cst_7 : f32 to vector<256x128xf32>
    %10 = arith.maximumf %8, %9 : vector<256x128xf32>
    %11 = arith.truncf %10 : vector<256x128xf32> to vector<256x128xbf16>
    %c0_8 = arith.constant 0 : index
    %c0_9 = arith.constant 0 : index
    %12 = vector.load %arg5[%c0_8, %c0_9] : memref<256x128xbf16, #tpu.memory_space<vmem>>, vector<256x128xbf16>
    tpu.vector_store %arg5[%c0_8, %c0_9], %11 {strides = array<i32>} : memref<256x128xbf16, #tpu.memory_space<vmem>>, vector<256x128xbf16>,
    return
  }
  func.func @transform_0(%arg0: i32) -> (i32, i32) {
    %c0_i32 = arith.constant 0 : i32
    %c0_i32_0 = arith.constant 0 : i32
    return %arg0, %c0_i32 : i32, i32
  }
  func.func @transform_1(%arg0: i32) -> (i32, i32) {
    %c0_i32 = arith.constant 0 : i32
    %c0_i32_0 = arith.constant 0 : i32
    %c0_i32_1 = arith.constant 0 : i32
    return %c0_i32, %c0_i32_0 : i32, i32
  }
  func.func @transform_2(%arg0: i32) -> (i32, i32) {
    %c0_i32 = arith.constant 0 : i32
    %c0_i32_0 = arith.constant 0 : i32
    %c0_i32_1 = arith.constant 0 : i32
    return %c0_i32, %c0_i32_0 : i32, i32
  }
  func.func @transform_3(%arg0: i32) -> (i32, i32) {
    %c0_i32 = arith.constant 0 : i32
    %c0_i32_0 = arith.constant 0 : i32
    %c0_i32_1 = arith.constant 0 : i32
    return %c0_i32, %c0_i32_0 : i32, i32
  }
  func.func @transform_4(%arg0: i32) -> (i32, i32) {
    %c0_i32 = arith.constant 0 : i32
    %c0_i32_0 = arith.constant 0 : i32
    return %arg0, %c0_i32 : i32, i32
  }
}

module attributes {stable_mosaic.version = 11 : i64} {
  func.func @_dual_mm_bn_add_relu_kernel(%arg0: i32, %arg1: memref<256x128xbf16, #tpu.memory_space<vmem>>, %arg2: memref<128x128xbf16, #tpu.memory_space<vmem>>, %arg3: memref<1x128xf32, #tpu.memory_space<vmem>>, %arg4: memref<256x128xbf16, #tpu.memory_space<vmem>>, %arg5: memref<128x128xbf16, #tpu.memory_space<vmem>>, %arg6: memref<1x128xf32, #tpu.memory_space<vmem>>, %arg7: memref<1x128xf32, #tpu.memory_space<vmem>>, %arg8: memref<256x128xbf16, #tpu.memory_space<vmem>>) attributes {dimension_semantics = [#tpu.dimension_semantics<parallel>], iteration_bounds = array<i64: 2>, scalar_prefetch = 0 : i64, scratch_operands = 0 : i64, tpu.core_type = #tpu.core_type<tc>, window_params = [{transform_indices = @transform_0, window_bounds = array<i64: 256, 128>}, {pipeline_mode = #tpu.pipeline_mode<synchronous>, transform_indices = @transform_1, window_bounds = array<i64: 128, 128>}, {pipeline_mode = #tpu.pipeline_mode<synchronous>, transform_indices = @transform_2, window_bounds = array<i64: 1, 128>}, {transform_indices = @transform_3, window_bounds = array<i64: 256, 128>}, {pipeline_mode = #tpu.pipeline_mode<synchronous>, transform_indices = @transform_4, window_bounds = array<i64: 128, 128>}, {pipeline_mode = #tpu.pipeline_mode<synchronous>, transform_indices = @transform_5, window_bounds = array<i64: 1, 128>}, {pipeline_mode = #tpu.pipeline_mode<synchronous>, transform_indices = @transform_6, window_bounds = array<i64: 1, 128>}, {transform_indices = @transform_7, window_bounds = array<i64: 256, 128>}]} {
    %c0 = arith.constant 0 : index
    %c0_0 = arith.constant 0 : index
    %0 = vector.load %arg1[%c0, %c0_0] : memref<256x128xbf16, #tpu.memory_space<vmem>>, vector<256x128xbf16>
    %c0_1 = arith.constant 0 : index
    %c0_2 = arith.constant 0 : index
    %1 = vector.load %arg2[%c0_1, %c0_2] : memref<128x128xbf16, #tpu.memory_space<vmem>>, vector<128x128xbf16>
    %cst = arith.constant dense<0.000000e+00> : vector<256x128xf32>
    %2 = tpu.matmul %0, %1, %cst {dimension_numbers = #tpu.dot_dimension_numbers<[1], [0], [0], [1], [0, 0, 1, 1], [], []>} : vector<256x128xbf16>, vector<128x128xbf16>, vector<256x128xf32> -> vector<256x128xf32>
    %c0_3 = arith.constant 0 : index
    %c0_4 = arith.constant 0 : index
    %3 = vector.load %arg4[%c0_3, %c0_4] : memref<256x128xbf16, #tpu.memory_space<vmem>>, vector<256x128xbf16>
    %c0_5 = arith.constant 0 : index
    %c0_6 = arith.constant 0 : index
    %4 = vector.load %arg5[%c0_5, %c0_6] : memref<128x128xbf16, #tpu.memory_space<vmem>>, vector<128x128xbf16>
    %cst_7 = arith.constant dense<0.000000e+00> : vector<256x128xf32>
    %5 = tpu.matmul %3, %4, %cst_7 {dimension_numbers = #tpu.dot_dimension_numbers<[1], [0], [0], [1], [0, 0, 1, 1], [], []>} : vector<256x128xbf16>, vector<128x128xbf16>, vector<256x128xf32> -> vector<256x128xf32>
    %c0_8 = arith.constant 0 : index
    %c0_9 = arith.constant 0 : index
    %6 = vector.load %arg3[%c0_8, %c0_9] : memref<1x128xf32, #tpu.memory_space<vmem>>, vector<1x128xf32>
    %7 = vector.broadcast %6 : vector<1x128xf32> to vector<256x128xf32>
    %8 = arith.mulf %2, %7 : vector<256x128xf32>
    %c0_10 = arith.constant 0 : index
    %c0_11 = arith.constant 0 : index
    %9 = vector.load %arg6[%c0_10, %c0_11] : memref<1x128xf32, #tpu.memory_space<vmem>>, vector<1x128xf32>
    %10 = vector.broadcast %9 : vector<1x128xf32> to vector<256x128xf32>
    %11 = arith.mulf %5, %10 : vector<256x128xf32>
    %12 = arith.addf %8, %11 : vector<256x128xf32>
    %c0_12 = arith.constant 0 : index
    %c0_13 = arith.constant 0 : index
    %13 = vector.load %arg7[%c0_12, %c0_13] : memref<1x128xf32, #tpu.memory_space<vmem>>, vector<1x128xf32>
    %14 = vector.broadcast %13 : vector<1x128xf32> to vector<256x128xf32>
    %15 = arith.addf %12, %14 : vector<256x128xf32>
    %cst_14 = arith.constant 0.000000e+00 : f32
    %16 = vector.broadcast %cst_14 : f32 to vector<256x128xf32>
    %17 = arith.maximumf %15, %16 : vector<256x128xf32>
    %18 = arith.truncf %17 : vector<256x128xf32> to vector<256x128xbf16>
    %c0_15 = arith.constant 0 : index
    %c0_16 = arith.constant 0 : index
    %19 = vector.load %arg8[%c0_15, %c0_16] : memref<256x128xbf16, #tpu.memory_space<vmem>>, vector<256x128xbf16>
    tpu.vector_store %arg8[%c0_15, %c0_16], %18 {strides = array<i32>} : memref<256x128xbf16, #tpu.memory_space<vmem>>, vector<256x128xbf16>,
    return
  }
  func.func @transform_0(%arg0: i32) -> (i32, i32) {
    %c0_i32 = arith.constant 0 : i32
    %c0_i32_0 = arith.constant 0 : i32
    return %arg0, %c0_i32 : i32, i32
  }
  func.func @transform_1(%arg0: i32) -> (i32, i32) {
    %c0_i32 = arith.constant 0 : i32
    %c0_i32_0 = arith.constant 0 : i32
    %c0_i32_1 = arith.constant 0 : i32
    return %c0_i32, %c0_i32_0 : i32, i32
  }
  func.func @transform_2(%arg0: i32) -> (i32, i32) {
    %c0_i32 = arith.constant 0 : i32
    %c0_i32_0 = arith.constant 0 : i32
    %c0_i32_1 = arith.constant 0 : i32
    return %c0_i32, %c0_i32_0 : i32, i32
  }
  func.func @transform_3(%arg0: i32) -> (i32, i32) {
    %c0_i32 = arith.constant 0 : i32
    %c0_i32_0 = arith.constant 0 : i32
    return %arg0, %c0_i32 : i32, i32
  }
  func.func @transform_4(%arg0: i32) -> (i32, i32) {
    %c0_i32 = arith.constant 0 : i32
    %c0_i32_0 = arith.constant 0 : i32
    %c0_i32_1 = arith.constant 0 : i32
    return %c0_i32, %c0_i32_0 : i32, i32
  }
  func.func @transform_5(%arg0: i32) -> (i32, i32) {
    %c0_i32 = arith.constant 0 : i32
    %c0_i32_0 = arith.constant 0 : i32
    %c0_i32_1 = arith.constant 0 : i32
    return %c0_i32, %c0_i32_0 : i32, i32
  }
  func.func @transform_6(%arg0: i32) -> (i32, i32) {
    %c0_i32 = arith.constant 0 : i32
    %c0_i32_0 = arith.constant 0 : i32
    %c0_i32_1 = arith.constant 0 : i32
    return %c0_i32, %c0_i32_0 : i32, i32
  }
  func.func @transform_7(%arg0: i32) -> (i32, i32) {
    %c0_i32 = arith.constant 0 : i32
    %c0_i32_0 = arith.constant 0 : i32
    return %arg0, %c0_i32 : i32, i32
  }
}

module attributes {stable_mosaic.version = 11 : i64} {
  func.func @_conv3x3_bn_relu_kernel(%arg0: i32, %arg1: memref<1x18x18x128xbf16, #tpu.memory_space<vmem>>, %arg2: memref<9x128x128xbf16, #tpu.memory_space<vmem>>, %arg3: memref<1x128xf32, #tpu.memory_space<vmem>>, %arg4: memref<1x128xf32, #tpu.memory_space<vmem>>, %arg5: memref<1x16x16x128xbf16, #tpu.memory_space<vmem>>) attributes {dimension_semantics = [#tpu.dimension_semantics<parallel>], iteration_bounds = array<i64: 2>, scalar_prefetch = 0 : i64, scratch_operands = 0 : i64, tpu.core_type = #tpu.core_type<tc>, window_params = [{transform_indices = @transform_0, window_bounds = array<i64: 1, 18, 18, 128>}, {pipeline_mode = #tpu.pipeline_mode<synchronous>, transform_indices = @transform_1, window_bounds = array<i64: 9, 128, 128>}, {pipeline_mode = #tpu.pipeline_mode<synchronous>, transform_indices = @transform_2, window_bounds = array<i64: 1, 128>}, {pipeline_mode = #tpu.pipeline_mode<synchronous>, transform_indices = @transform_3, window_bounds = array<i64: 1, 128>}, {transform_indices = @transform_4, window_bounds = array<i64: 1, 16, 16, 128>}]} {
    %cst = arith.constant 0.000000e+00 : f32
    %0 = vector.broadcast %cst : f32 to vector<256x128xf32>
    %c0 = arith.constant 0 : index
    %c0_0 = arith.constant 0 : index
    %c0_1 = arith.constant 0 : index
    %c0_2 = arith.constant 0 : index
    %1 = vector.load %arg1[%c0, %c0_0, %c0_1, %c0_2] : memref<1x18x18x128xbf16, #tpu.memory_space<vmem>>, vector<1x16x16x128xbf16>
    %2 = vector.shape_cast %1 : vector<1x16x16x128xbf16> to vector<256x128xbf16>
    %c0_3 = arith.constant 0 : index
    %c0_4 = arith.constant 0 : index
    %c0_5 = arith.constant 0 : index
    %3 = vector.load %arg2[%c0_3, %c0_4, %c0_5] : memref<9x128x128xbf16, #tpu.memory_space<vmem>>, vector<1x128x128xbf16>
    %4 = vector.shape_cast %3 : vector<1x128x128xbf16> to vector<128x128xbf16>
    %cst_6 = arith.constant dense<0.000000e+00> : vector<256x128xf32>
    %5 = tpu.matmul %2, %4, %cst_6 {dimension_numbers = #tpu.dot_dimension_numbers<[1], [0], [0], [1], [0, 0, 1, 1], [], []>} : vector<256x128xbf16>, vector<128x128xbf16>, vector<256x128xf32> -> vector<256x128xf32>
    %6 = arith.addf %0, %5 : vector<256x128xf32>
    %c0_7 = arith.constant 0 : index
    %c0_8 = arith.constant 0 : index
    %c1 = arith.constant 1 : index
    %c0_9 = arith.constant 0 : index
    %7 = vector.load %arg1[%c0_7, %c0_8, %c1, %c0_9] : memref<1x18x18x128xbf16, #tpu.memory_space<vmem>>, vector<1x16x16x128xbf16>
    %8 = vector.shape_cast %7 : vector<1x16x16x128xbf16> to vector<256x128xbf16>
    %c1_10 = arith.constant 1 : index
    %c0_11 = arith.constant 0 : index
    %c0_12 = arith.constant 0 : index
    %9 = vector.load %arg2[%c1_10, %c0_11, %c0_12] : memref<9x128x128xbf16, #tpu.memory_space<vmem>>, vector<1x128x128xbf16>
    %10 = vector.shape_cast %9 : vector<1x128x128xbf16> to vector<128x128xbf16>
    %cst_13 = arith.constant dense<0.000000e+00> : vector<256x128xf32>
    %11 = tpu.matmul %8, %10, %cst_13 {dimension_numbers = #tpu.dot_dimension_numbers<[1], [0], [0], [1], [0, 0, 1, 1], [], []>} : vector<256x128xbf16>, vector<128x128xbf16>, vector<256x128xf32> -> vector<256x128xf32>
    %12 = arith.addf %6, %11 : vector<256x128xf32>
    %c0_14 = arith.constant 0 : index
    %c0_15 = arith.constant 0 : index
    %c2 = arith.constant 2 : index
    %c0_16 = arith.constant 0 : index
    %13 = vector.load %arg1[%c0_14, %c0_15, %c2, %c0_16] : memref<1x18x18x128xbf16, #tpu.memory_space<vmem>>, vector<1x16x16x128xbf16>
    %14 = vector.shape_cast %13 : vector<1x16x16x128xbf16> to vector<256x128xbf16>
    %c2_17 = arith.constant 2 : index
    %c0_18 = arith.constant 0 : index
    %c0_19 = arith.constant 0 : index
    %15 = vector.load %arg2[%c2_17, %c0_18, %c0_19] : memref<9x128x128xbf16, #tpu.memory_space<vmem>>, vector<1x128x128xbf16>
    %16 = vector.shape_cast %15 : vector<1x128x128xbf16> to vector<128x128xbf16>
    %cst_20 = arith.constant dense<0.000000e+00> : vector<256x128xf32>
    %17 = tpu.matmul %14, %16, %cst_20 {dimension_numbers = #tpu.dot_dimension_numbers<[1], [0], [0], [1], [0, 0, 1, 1], [], []>} : vector<256x128xbf16>, vector<128x128xbf16>, vector<256x128xf32> -> vector<256x128xf32>
    %18 = arith.addf %12, %17 : vector<256x128xf32>
    %c0_21 = arith.constant 0 : index
    %c1_22 = arith.constant 1 : index
    %c0_23 = arith.constant 0 : index
    %c0_24 = arith.constant 0 : index
    %19 = vector.load %arg1[%c0_21, %c1_22, %c0_23, %c0_24] : memref<1x18x18x128xbf16, #tpu.memory_space<vmem>>, vector<1x16x16x128xbf16>
    %20 = vector.shape_cast %19 : vector<1x16x16x128xbf16> to vector<256x128xbf16>
    %c3 = arith.constant 3 : index
    %c0_25 = arith.constant 0 : index
    %c0_26 = arith.constant 0 : index
    %21 = vector.load %arg2[%c3, %c0_25, %c0_26] : memref<9x128x128xbf16, #tpu.memory_space<vmem>>, vector<1x128x128xbf16>
    %22 = vector.shape_cast %21 : vector<1x128x128xbf16> to vector<128x128xbf16>
    %cst_27 = arith.constant dense<0.000000e+00> : vector<256x128xf32>
    %23 = tpu.matmul %20, %22, %cst_27 {dimension_numbers = #tpu.dot_dimension_numbers<[1], [0], [0], [1], [0, 0, 1, 1], [], []>} : vector<256x128xbf16>, vector<128x128xbf16>, vector<256x128xf32> -> vector<256x128xf32>
    %24 = arith.addf %18, %23 : vector<256x128xf32>
    %c0_28 = arith.constant 0 : index
    %c1_29 = arith.constant 1 : index
    %c1_30 = arith.constant 1 : index
    %c0_31 = arith.constant 0 : index
    %25 = vector.load %arg1[%c0_28, %c1_29, %c1_30, %c0_31] : memref<1x18x18x128xbf16, #tpu.memory_space<vmem>>, vector<1x16x16x128xbf16>
    %26 = vector.shape_cast %25 : vector<1x16x16x128xbf16> to vector<256x128xbf16>
    %c4 = arith.constant 4 : index
    %c0_32 = arith.constant 0 : index
    %c0_33 = arith.constant 0 : index
    %27 = vector.load %arg2[%c4, %c0_32, %c0_33] : memref<9x128x128xbf16, #tpu.memory_space<vmem>>, vector<1x128x128xbf16>
    %28 = vector.shape_cast %27 : vector<1x128x128xbf16> to vector<128x128xbf16>
    %cst_34 = arith.constant dense<0.000000e+00> : vector<256x128xf32>
    %29 = tpu.matmul %26, %28, %cst_34 {dimension_numbers = #tpu.dot_dimension_numbers<[1], [0], [0], [1], [0, 0, 1, 1], [], []>} : vector<256x128xbf16>, vector<128x128xbf16>, vector<256x128xf32> -> vector<256x128xf32>
    %30 = arith.addf %24, %29 : vector<256x128xf32>
    %c0_35 = arith.constant 0 : index
    %c1_36 = arith.constant 1 : index
    %c2_37 = arith.constant 2 : index
    %c0_38 = arith.constant 0 : index
    %31 = vector.load %arg1[%c0_35, %c1_36, %c2_37, %c0_38] : memref<1x18x18x128xbf16, #tpu.memory_space<vmem>>, vector<1x16x16x128xbf16>
    %32 = vector.shape_cast %31 : vector<1x16x16x128xbf16> to vector<256x128xbf16>
    %c5 = arith.constant 5 : index
    %c0_39 = arith.constant 0 : index
    %c0_40 = arith.constant 0 : index
    %33 = vector.load %arg2[%c5, %c0_39, %c0_40] : memref<9x128x128xbf16, #tpu.memory_space<vmem>>, vector<1x128x128xbf16>
    %34 = vector.shape_cast %33 : vector<1x128x128xbf16> to vector<128x128xbf16>
    %cst_41 = arith.constant dense<0.000000e+00> : vector<256x128xf32>
    %35 = tpu.matmul %32, %34, %cst_41 {dimension_numbers = #tpu.dot_dimension_numbers<[1], [0], [0], [1], [0, 0, 1, 1], [], []>} : vector<256x128xbf16>, vector<128x128xbf16>, vector<256x128xf32> -> vector<256x128xf32>
    %36 = arith.addf %30, %35 : vector<256x128xf32>
    %c0_42 = arith.constant 0 : index
    %c2_43 = arith.constant 2 : index
    %c0_44 = arith.constant 0 : index
    %c0_45 = arith.constant 0 : index
    %37 = vector.load %arg1[%c0_42, %c2_43, %c0_44, %c0_45] : memref<1x18x18x128xbf16, #tpu.memory_space<vmem>>, vector<1x16x16x128xbf16>
    %38 = vector.shape_cast %37 : vector<1x16x16x128xbf16> to vector<256x128xbf16>
    %c6 = arith.constant 6 : index
    %c0_46 = arith.constant 0 : index
    %c0_47 = arith.constant 0 : index
    %39 = vector.load %arg2[%c6, %c0_46, %c0_47] : memref<9x128x128xbf16, #tpu.memory_space<vmem>>, vector<1x128x128xbf16>
    %40 = vector.shape_cast %39 : vector<1x128x128xbf16> to vector<128x128xbf16>
    %cst_48 = arith.constant dense<0.000000e+00> : vector<256x128xf32>
    %41 = tpu.matmul %38, %40, %cst_48 {dimension_numbers = #tpu.dot_dimension_numbers<[1], [0], [0], [1], [0, 0, 1, 1], [], []>} : vector<256x128xbf16>, vector<128x128xbf16>, vector<256x128xf32> -> vector<256x128xf32>
    %42 = arith.addf %36, %41 : vector<256x128xf32>
    %c0_49 = arith.constant 0 : index
    %c2_50 = arith.constant 2 : index
    %c1_51 = arith.constant 1 : index
    %c0_52 = arith.constant 0 : index
    %43 = vector.load %arg1[%c0_49, %c2_50, %c1_51, %c0_52] : memref<1x18x18x128xbf16, #tpu.memory_space<vmem>>, vector<1x16x16x128xbf16>
    %44 = vector.shape_cast %43 : vector<1x16x16x128xbf16> to vector<256x128xbf16>
    %c7 = arith.constant 7 : index
    %c0_53 = arith.constant 0 : index
    %c0_54 = arith.constant 0 : index
    %45 = vector.load %arg2[%c7, %c0_53, %c0_54] : memref<9x128x128xbf16, #tpu.memory_space<vmem>>, vector<1x128x128xbf16>
    %46 = vector.shape_cast %45 : vector<1x128x128xbf16> to vector<128x128xbf16>
    %cst_55 = arith.constant dense<0.000000e+00> : vector<256x128xf32>
    %47 = tpu.matmul %44, %46, %cst_55 {dimension_numbers = #tpu.dot_dimension_numbers<[1], [0], [0], [1], [0, 0, 1, 1], [], []>} : vector<256x128xbf16>, vector<128x128xbf16>, vector<256x128xf32> -> vector<256x128xf32>
    %48 = arith.addf %42, %47 : vector<256x128xf32>
    %c0_56 = arith.constant 0 : index
    %c2_57 = arith.constant 2 : index
    %c2_58 = arith.constant 2 : index
    %c0_59 = arith.constant 0 : index
    %49 = vector.load %arg1[%c0_56, %c2_57, %c2_58, %c0_59] : memref<1x18x18x128xbf16, #tpu.memory_space<vmem>>, vector<1x16x16x128xbf16>
    %50 = vector.shape_cast %49 : vector<1x16x16x128xbf16> to vector<256x128xbf16>
    %c8 = arith.constant 8 : index
    %c0_60 = arith.constant 0 : index
    %c0_61 = arith.constant 0 : index
    %51 = vector.load %arg2[%c8, %c0_60, %c0_61] : memref<9x128x128xbf16, #tpu.memory_space<vmem>>, vector<1x128x128xbf16>
    %52 = vector.shape_cast %51 : vector<1x128x128xbf16> to vector<128x128xbf16>
    %cst_62 = arith.constant dense<0.000000e+00> : vector<256x128xf32>
    %53 = tpu.matmul %50, %52, %cst_62 {dimension_numbers = #tpu.dot_dimension_numbers<[1], [0], [0], [1], [0, 0, 1, 1], [], []>} : vector<256x128xbf16>, vector<128x128xbf16>, vector<256x128xf32> -> vector<256x128xf32>
    %54 = arith.addf %48, %53 : vector<256x128xf32>
    %c0_63 = arith.constant 0 : index
    %c0_64 = arith.constant 0 : index
    %55 = vector.load %arg3[%c0_63, %c0_64] : memref<1x128xf32, #tpu.memory_space<vmem>>, vector<1x128xf32>
    %56 = vector.broadcast %55 : vector<1x128xf32> to vector<256x128xf32>
    %57 = arith.mulf %54, %56 : vector<256x128xf32>
    %c0_65 = arith.constant 0 : index
    %c0_66 = arith.constant 0 : index
    %58 = vector.load %arg4[%c0_65, %c0_66] : memref<1x128xf32, #tpu.memory_space<vmem>>, vector<1x128xf32>
    %59 = vector.broadcast %58 : vector<1x128xf32> to vector<256x128xf32>
    %60 = arith.addf %57, %59 : vector<256x128xf32>
    %cst_67 = arith.constant 0.000000e+00 : f32
    %61 = vector.broadcast %cst_67 : f32 to vector<256x128xf32>
    %62 = arith.maximumf %60, %61 : vector<256x128xf32>
    %63 = vector.shape_cast %62 : vector<256x128xf32> to vector<1x16x16x128xf32>
    %64 = arith.truncf %63 : vector<1x16x16x128xf32> to vector<1x16x16x128xbf16>
    %c0_68 = arith.constant 0 : index
    %c0_69 = arith.constant 0 : index
    %c0_70 = arith.constant 0 : index
    %c0_71 = arith.constant 0 : index
    %65 = vector.load %arg5[%c0_68, %c0_69, %c0_70, %c0_71] : memref<1x16x16x128xbf16, #tpu.memory_space<vmem>>, vector<1x16x16x128xbf16>
    tpu.vector_store %arg5[%c0_68, %c0_69, %c0_70, %c0_71], %64 {strides = array<i32>} : memref<1x16x16x128xbf16, #tpu.memory_space<vmem>>, vector<1x16x16x128xbf16>,
    return
  }
  func.func @transform_0(%arg0: i32) -> (i32, i32, i32, i32) {
    %c0_i32 = arith.constant 0 : i32
    %c0_i32_0 = arith.constant 0 : i32
    %c0_i32_1 = arith.constant 0 : i32
    %c0_i32_2 = arith.constant 0 : i32
    return %arg0, %c0_i32, %c0_i32_0, %c0_i32_1 : i32, i32, i32, i32
  }
  func.func @transform_1(%arg0: i32) -> (i32, i32, i32) {
    %c0_i32 = arith.constant 0 : i32
    %c0_i32_0 = arith.constant 0 : i32
    %c0_i32_1 = arith.constant 0 : i32
    %c0_i32_2 = arith.constant 0 : i32
    return %c0_i32, %c0_i32_0, %c0_i32_1 : i32, i32, i32
  }
  func.func @transform_2(%arg0: i32) -> (i32, i32) {
    %c0_i32 = arith.constant 0 : i32
    %c0_i32_0 = arith.constant 0 : i32
    %c0_i32_1 = arith.constant 0 : i32
    return %c0_i32, %c0_i32_0 : i32, i32
  }
  func.func @transform_3(%arg0: i32) -> (i32, i32) {
    %c0_i32 = arith.constant 0 : i32
    %c0_i32_0 = arith.constant 0 : i32
    %c0_i32_1 = arith.constant 0 : i32
    return %c0_i32, %c0_i32_0 : i32, i32
  }
  func.func @transform_4(%arg0: i32) -> (i32, i32, i32, i32) {
    %c0_i32 = arith.constant 0 : i32
    %c0_i32_0 = arith.constant 0 : i32
    %c0_i32_1 = arith.constant 0 : i32
    %c0_i32_2 = arith.constant 0 : i32
    return %arg0, %c0_i32, %c0_i32_0, %c0_i32_1 : i32, i32, i32, i32
  }
}

</mosaic_0001>

<bundles_post_ra>
// kernel: bottleneck_pallas.3
= control target key start
LH: loop header
LB: loop body
LE: loop exit
PB: predicated region body
PF: predicated region fallthrough
CT: control target
= control target key end

     0   :  { %s1230_s15 = smov 0   ;;  %s1388_s0 = inlined_call_operand.vmem [shape: bf16[512,128], index: 0, kind: input, shape index: {}]   ;;  %s1389_s1 = inlined_call_operand.vmem [shape: bf16[128,128], index: 1, kind: input, shape index: {}]   ;;  %s1390_s2 = inlined_call_operand.vmem [shape: f32[1,128], index: 2, kind: input, shape index: {}]   ;;  %s1391_s3 = inlined_call_operand.vmem [shape: f32[1,128], index: 3, kind: input, shape index: {}]   ;;  %s1392_s4 = inlined_call_operand.vmem [shape: bf16[512,128], index: 4, kind: output, shape index: {}]  }
   0x1 LB: > { %s881_s16 = sadd.s32 4294967295, %s1203_s15   ;;  %p885_p0 = scmp.ge.s32.totalorder %s1203_s15, 1  ;;  %s1203_s15 = sphi %s1230_s15, %s14_s15  }
   0x2   : > { %p163_p1 = scmp.lt.s32.totalorder %s1203_s15, 3 }
   0x4   : > { %p164_p2 = pnand %p885_p0, %p163_p1 }
   0x5   : > { %v1173_v0 = vld [vmem:[%s1389_s1] sm:$0xff] (!%p164_p2)   ;;  %s886_s19 = sshll.u32 (!%p164_p2), %s881_s16, 5  ;;  %v1174_v1 = vld [vmem:[%s1389_s1 + $0x8] sm:$0xff] (!%p164_p2)   ;;  %v1175_v2 = vld [vmem:[%s1389_s1 + $0x10] sm:$0xff] (!%p164_p2)  }
   0x6   : > { %167 = sbr.rel (%p164_p2) target bundleno = 287 (0x11f), region = 36  ;;  %p190_p3 = scmp.lt.s32.totalorder (!%p164_p2), %s886_s19, 63  ;;  %1101 = vmatprep.subr.bf16.mxu0 (!%p164_p2), %v1173_v0  ;;  %1149 = vmatprep.subr.bf16.mxu1 (!%p164_p2), %v1173_v0  ;;  %v1176_v3 = vld [vmem:[%s1389_s1 + $0x18] sm:$0xff] (!%p164_p2)   ;;  %v1177_v6 = vld [vmem:[%s1389_s1 + $0x20] sm:$0xff] (!%p164_p2)   ;;  %v1178_v7 = vld [vmem:[%s1389_s1 + $0x28] sm:$0xff] (!%p164_p2)  }
   0x7   : > { %1102 = vmatpush3.bf16.msra.mxu0 (!%p164_p2), %v1173_v0  ;;  %1157 = vmatpush3.bf16.msra.mxu1 (!%p164_p2), %v1173_v0  ;;  %v1179_v8 = vld [vmem:[%s1389_s1 + $0x30] sm:$0xff] (!%p164_p2)   ;;  %v1180_v9 = vld [vmem:[%s1389_s1 + $0x38] sm:$0xff] (!%p164_p2)   ;;  %v1291_v24 = vld [vmem:[%s1390_s2] ss:$0 sm:$0xff] (!%p164_p2) }
   0x8   : > { %1103 = vmatprep.subr.bf16.mxu0 (!%p164_p2), %v1174_v1  ;;  %1150 = vmatprep.subr.bf16.mxu1 (!%p164_p2), %v1174_v1  ;;  %v1296_v26 = vld [vmem:[%s1391_s3] ss:$0 sm:$0xff] (!%p164_p2) }
   0xb   : > { %1104 = vmatpush3.bf16.msra.mxu0 (!%p164_p2), %v1174_v1  ;;  %1158 = vmatpush3.bf16.msra.mxu1 (!%p164_p2), %v1174_v1 }
   0xc   : > { %1105 = vmatprep.subr.bf16.mxu0 (!%p164_p2), %v1175_v2  ;;  %1151 = vmatprep.subr.bf16.mxu1 (!%p164_p2), %v1175_v2 }
   0xd   : > { %s1394_s19 = smov (!%p190_p3, %s886_s19), 63 }
   0xe   : > { %s887_s24 = sshll.u32 %s1394_s19, 2 }
   0xf   : > { %s1255_s27 = scalar_lea.vmem %s1388_s0, %s887_s24  ;;  %1106 = vmatpush3.bf16.msra.mxu0 %v1175_v2  ;;  %1159 = vmatpush3.bf16.msra.mxu1 %v1175_v2  ;;  %s1319_s20 = scalar_lea.vmem %s1392_s4, %s887_s24 }
  0x10   : > { %v1181_v4 = vld [vmem:[%s1255_s27] sm:$0xff]   ;;  %1107 = vmatprep.subr.bf16.mxu0 %v1176_v3  ;;  %1152 = vmatprep.subr.bf16.mxu1 %v1176_v3  ;;  %v1183_v10 = vld [vmem:[%s1255_s27 + $0x8] sm:$0xff]   ;;  %v1185_v12 = vld [vmem:[%s1255_s27 + $0x10] sm:$0xff]  }
  0x11   : > { %v1182_v5 = vld [vmem:[%s1255_s27 + $0x40] sm:$0xff]   ;;  %1117 = vmatprep.mubr.bf16.mxu0 %v1181_v4  ;;  %v1184_v11 = vld [vmem:[%s1255_s27 + $0x48] sm:$0xff]   ;;  %v1186_v13 = vld [vmem:[%s1255_s27 + $0x50] sm:$0xff]  }
  0x12   : > { %1133 = vmatprep.mubr.bf16.mxu1 %v1182_v5  ;;  %v1187_v14 = vld [vmem:[%s1255_s27 + $0x18] sm:$0xff]   ;;  %v1189_v16 = vld [vmem:[%s1255_s27 + $0x20] sm:$0xff]   ;;  %v1191_v18 = vld [vmem:[%s1255_s27 + $0x28] sm:$0xff]  }
  0x13   : > { %1108 = vmatpush3.bf16.msra.mxu0 %v1176_v3  ;;  %1160 = vmatpush3.bf16.msra.mxu1 %v1176_v3  ;;  %v1188_v15 = vld [vmem:[%s1255_s27 + $0x58] sm:$0xff]   ;;  %v1190_v17 = vld [vmem:[%s1255_s27 + $0x60] sm:$0xff]   ;;  %v1192_v19 = vld [vmem:[%s1255_s27 + $0x68] sm:$0xff]  }
  0x14   : > { %1109 = vmatprep.subr.bf16.mxu0 %v1177_v6  ;;  %1153 = vmatprep.subr.bf16.mxu1 %v1177_v6  ;;  %v1193_v20 = vld [vmem:[%s1255_s27 + $0x30] sm:$0xff]   ;;  %v1195_v22 = vld [vmem:[%s1255_s27 + $0x38] sm:$0xff]  }
  0x15   : > { %v1194_v21 = vld [vmem:[%s1255_s27 + $0x70] sm:$0xff]   ;;  %v1196_v23 = vld [vmem:[%s1255_s27 + $0x78] sm:$0xff]  }
  0x17   : > { %1110 = vmatpush3.bf16.msra.mxu0 %v1177_v6  ;;  %1161 = vmatpush3.bf16.msra.mxu1 %v1177_v6 }
  0x18   : > { %1111 = vmatprep.subr.bf16.mxu0 %v1178_v7  ;;  %1154 = vmatprep.subr.bf16.mxu1 %v1178_v7 }
  0x1b   : > { %1112 = vmatpush3.bf16.msra.mxu0 %v1178_v7  ;;  %1162 = vmatpush3.bf16.msra.mxu1 %v1178_v7 }
  0x1c   : > { %1113 = vmatprep.subr.bf16.mxu0 %v1179_v8  ;;  %1155 = vmatprep.subr.bf16.mxu1 %v1179_v8 }
  0x1f   : > { %1114 = vmatpush3.bf16.msra.mxu0 %v1179_v8  ;;  %1163 = vmatpush3.bf16.msra.mxu1 %v1179_v8 }
  0x20   : > { %1115 = vmatprep.subr.bf16.mxu0 %v1180_v9  ;;  %1156 = vmatprep.subr.bf16.mxu1 %v1180_v9 }
  0x23   : > { %1116 = vmatpush3.bf16.msra.mxu0 %v1180_v9  ;;  %1164 = vmatpush3.bf16.msra.mxu1 %v1180_v9 }
  0x26   : > { %1118 = vmatmul.mubr.bf16.vlgmr.msra.gmra.mrb[0].mxu0 %v1183_v10  ;;  %1134 = vmatmul.mubr.bf16.vlgmr.msra.gmra.mrb[0].mxu1 %v1184_v11 }
  0x27   : > { %1121 = vmatprep.mubr.bf16.mxu0 %v1185_v12  ;;  %1137 = vmatprep.mubr.bf16.mxu1 %v1186_v13 }
  0x2e   : > { %1122 = vmatmul.mubr.bf16.gmra.mrb[4].mxu0 %v1187_v14  ;;  %1138 = vmatmul.mubr.bf16.gmra.mrb[4].mxu1 %v1188_v15 }
  0x2f   : > { %1125 = vmatprep.mubr.bf16.mxu0 %v1189_v16  ;;  %1141 = vmatprep.mubr.bf16.mxu1 %v1190_v17 }
  0x36   : > { %1126 = vmatmul.mubr.bf16.gmra.mrb[8].mxu0 %v1191_v18  ;;  %1142 = vmatmul.mubr.bf16.gmra.mrb[8].mxu1 %v1192_v19 }
  0x37   : > { %1129 = vmatprep.mubr.bf16.mxu0 %v1193_v20  ;;  %1145 = vmatprep.mubr.bf16.mxu1 %v1194_v21 }
  0x3e   : > { %1130 = vmatmul.mubr.bf16.gmra.mrb[12].mxu0 %v1195_v22  ;;  %1146 = vmatmul.mubr.bf16.gmra.mrb[12].mxu1 %v1196_v23 }
  0xf9   : > { %v1119_v25 = vpop.f32.mrb[0].mxu0  ;;  %v1135_v27 = vpop.f32.mrb[0].mxu1 }
  0xfa   : > { %v564_v28 = vmul.f32 %v1119_v25, %v1291_v24  ;;  %v580_v29 = vmul.f32 %v1135_v27, %v1291_v24  ;;  %v428_v30 = vpop.f32.mrb[1].mxu0  ;;  %v492_v31 = vpop.f32.mrb[1].mxu1 }
  0xfb   : > { %v562_v32 = vmul.f32 %v1291_v24, %v428_v30  ;;  %v578_v33 = vmul.f32 %v1291_v24, %v492_v31  ;;  %v1120_v34 = vpop.f32.mrb[2].mxu0  ;;  %v1136_v35 = vpop.f32.mrb[2].mxu1 }
  0xfc   : > { %v603_v36 = vadd.f32 %v1296_v26, %v564_v28  ;;  %v619_v37 = vadd.f32 %v1296_v26, %v580_v29  ;;  %v565_v38 = vmul.f32 %v1120_v34, %v1291_v24  ;;  %v581_v39 = vmul.f32 %v1136_v35, %v1291_v24  ;;  %v431_v40 = vpop.f32.mrb[3].mxu0  ;;  %v495_v41 = vpop.f32.mrb[3].mxu1 }
  0xfd   : > { %v601_v42 = vadd.f32 %v1296_v26, %v562_v32  ;;  %v617_v43 = vadd.f32 %v1296_v26, %v578_v33  ;;  %v563_v44 = vmul.f32 %v1291_v24, %v431_v40  ;;  %v579_v45 = vmul.f32 %v1291_v24, %v495_v41 }
  0xfe   : > { %v604_v46 = vadd.f32 %v1296_v26, %v565_v38  ;;  %v620_v47 = vadd.f32 %v1296_v26, %v581_v39  ;;  %v635_v50 = vmax.f32 %v603_v36, 0.0  ;;  %v651_v51 = vmax.f32 %v619_v37, 0.0 }
  0xff   : > { %v602_v48 = vadd.f32 %v1296_v26, %v563_v44  ;;  %v618_v49 = vadd.f32 %v1296_v26, %v579_v45  ;;  %v633_v54 = vmax.f32 %v601_v42, 0.0  ;;  %v649_v55 = vmax.f32 %v617_v43, 0.0 }
 0x100   : > { %v636_v52 = vmax.f32 %v604_v46, 0.0  ;;  %v652_v53 = vmax.f32 %v620_v47, 0.0 }
 0x101   : > { %v634_v56 = vmax.f32 %v602_v48, 0.0  ;;  %v650_v57 = vmax.f32 %v618_v49, 0.0  ;;  %v1123_v58 = vpop.f32.mrb[4].mxu0  ;;  %v1139_v59 = vpop.f32.mrb[4].mxu1 }
 0x102   : > { %v990_v60 = vpack.c.bf16 %v636_v52, %v635_v50  ;;  %v1030_v61 = vpack.c.bf16 %v652_v53, %v651_v51  ;;  %v568_v62 = vmul.f32 %v1123_v58, %v1291_v24  ;;  %v584_v63 = vmul.f32 %v1139_v59, %v1291_v24  ;;  %v444_v0 = vpop.f32.mrb[5].mxu0  ;;  %v508_v1 = vpop.f32.mrb[5].mxu1 }
 0x103   : > { %v985_v2 = vpack.c.bf16 %v634_v56, %v633_v54  ;;  %v1025_v3 = vpack.c.bf16 %v650_v57, %v649_v55  ;;  %v566_v4 = vmul.f32 %v1291_v24, %v444_v0  ;;  %v582_v5 = vmul.f32 %v1291_v24, %v508_v1  ;;  %v1124_v6 = vpop.f32.mrb[6].mxu0  ;;  %v1140_v7 = vpop.f32.mrb[6].mxu1 }
 0x104   : > { %1062 = vst [vmem:[%s1319_s20 + $0x8] sm:$0xff] %v990_v60   ;;  %1070 = vst [vmem:[%s1319_s20 + $0x48] sm:$0xff] %v1030_v61   ;;  %v607_v8 = vadd.f32 %v1296_v26, %v568_v62  ;;  %v623_v9 = vadd.f32 %v1296_v26, %v584_v63  ;;  %v569_v10 = vmul.f32 %v1124_v6, %v1291_v24  ;;  %v447_v12 = vpop.f32.mrb[7].mxu0  ;;  %v511_v13 = vpop.f32.mrb[7].mxu1 }
 0x105   : > { %v585_v11 = vmul.f32 %v1140_v7, %v1291_v24  ;;  %986 = vst [vmem:[%s1319_s20] sm:$0xff] %v985_v2   ;;  %1069 = vst [vmem:[%s1319_s20 + $0x40] sm:$0xff] %v1025_v3   ;;  %v605_v14 = vadd.f32 %v1296_v26, %v566_v4  ;;  %v621_v15 = vadd.f32 %v1296_v26, %v582_v5 }
 0x106   : > { %v567_v16 = vmul.f32 %v1291_v24, %v447_v12  ;;  %v583_v17 = vmul.f32 %v1291_v24, %v511_v13  ;;  %v608_v18 = vadd.f32 %v1296_v26, %v569_v10  ;;  %v639_v22 = vmax.f32 %v607_v8, 0.0 }
 0x107   : > { %v624_v19 = vadd.f32 %v1296_v26, %v585_v11  ;;  %v655_v23 = vmax.f32 %v623_v9, 0.0  ;;  %v637_v28 = vmax.f32 %v605_v14, 0.0  ;;  %v653_v29 = vmax.f32 %v621_v15, 0.0 }
 0x108   : > { %v606_v20 = vadd.f32 %v1296_v26, %v567_v16  ;;  %v622_v21 = vadd.f32 %v1296_v26, %v583_v17  ;;  %v640_v25 = vmax.f32 %v608_v18, 0.0 }
 0x109   : > { %v656_v27 = vmax.f32 %v624_v19, 0.0  ;;  %v1127_v32 = vpop.f32.mrb[8].mxu0  ;;  %v1143_v33 = vpop.f32.mrb[8].mxu1 }
 0x10a   : > { %v638_v30 = vmax.f32 %v606_v20, 0.0  ;;  %v654_v31 = vmax.f32 %v622_v21, 0.0  ;;  %v1000_v34 = vpack.c.bf16 %v640_v25, %v639_v22  ;;  %v572_v36 = vmul.f32 %v1127_v32, %v1291_v24  ;;  %v460_v38 = vpop.f32.mrb[9].mxu0  ;;  %v524_v39 = vpop.f32.mrb[9].mxu1 }
 0x10b   : > { %v1040_v35 = vpack.c.bf16 %v656_v27, %v655_v23  ;;  %v588_v37 = vmul.f32 %v1143_v33, %v1291_v24  ;;  %v570_v42 = vmul.f32 %v1291_v24, %v460_v38  ;;  %v586_v43 = vmul.f32 %v1291_v24, %v524_v39  ;;  %v1128_v44 = vpop.f32.mrb[10].mxu0  ;;  %v1144_v45 = vpop.f32.mrb[10].mxu1 }
 0x10c   : > { %v995_v40 = vpack.c.bf16 %v638_v30, %v637_v28  ;;  %v1035_v41 = vpack.c.bf16 %v654_v31, %v653_v29  ;;  %1064 = vst [vmem:[%s1319_s20 + $0x18] sm:$0xff] %v1000_v34   ;;  %v611_v46 = vadd.f32 %v1296_v26, %v572_v36  ;;  %v573_v48 = vmul.f32 %v1128_v44, %v1291_v24  ;;  %v463_v50 = vpop.f32.mrb[11].mxu0  ;;  %v527_v51 = vpop.f32.mrb[11].mxu1 }
 0x10d   : > { %1072 = vst [vmem:[%s1319_s20 + $0x58] sm:$0xff] %v1040_v35   ;;  %v627_v47 = vadd.f32 %v1296_v26, %v588_v37  ;;  %v589_v49 = vmul.f32 %v1144_v45, %v1291_v24  ;;  %v609_v52 = vadd.f32 %v1296_v26, %v570_v42  ;;  %v625_v53 = vadd.f32 %v1296_v26, %v586_v43 }
 0x10e   : > { %1063 = vst [vmem:[%s1319_s20 + $0x10] sm:$0xff] %v995_v40   ;;  %1071 = vst [vmem:[%s1319_s20 + $0x50] sm:$0xff] %v1035_v41   ;;  %v571_v54 = vmul.f32 %v1291_v24, %v463_v50  ;;  %v587_v55 = vmul.f32 %v1291_v24, %v527_v51  ;;  %v612_v56 = vadd.f32 %v1296_v26, %v573_v48  ;;  %v643_v60 = vmax.f32 %v611_v46, 0.0 }
 0x10f   : > { %v628_v57 = vadd.f32 %v1296_v26, %v589_v49  ;;  %v659_v61 = vmax.f32 %v627_v47, 0.0  ;;  %v641_v0 = vmax.f32 %v609_v52, 0.0  ;;  %v657_v1 = vmax.f32 %v625_v53, 0.0 }
 0x110   : > { %v610_v58 = vadd.f32 %v1296_v26, %v571_v54  ;;  %v626_v59 = vadd.f32 %v1296_v26, %v587_v55  ;;  %v644_v62 = vmax.f32 %v612_v56, 0.0 }
 0x111   : > { %v660_v63 = vmax.f32 %v628_v57, 0.0  ;;  %v1131_v4 = vpop.f32.mrb[12].mxu0  ;;  %v1147_v5 = vpop.f32.mrb[12].mxu1 }
 0x112   : > { %v642_v2 = vmax.f32 %v610_v58, 0.0  ;;  %v658_v3 = vmax.f32 %v626_v59, 0.0  ;;  %v1010_v6 = vpack.c.bf16 %v644_v62, %v643_v60  ;;  %v576_v8 = vmul.f32 %v1131_v4, %v1291_v24  ;;  %v476_v10 = vpop.f32.mrb[13].mxu0  ;;  %v540_v11 = vpop.f32.mrb[13].mxu1 }
 0x113   : > { %v1050_v7 = vpack.c.bf16 %v660_v63, %v659_v61  ;;  %v592_v9 = vmul.f32 %v1147_v5, %v1291_v24  ;;  %v574_v14 = vmul.f32 %v1291_v24, %v476_v10  ;;  %v590_v15 = vmul.f32 %v1291_v24, %v540_v11  ;;  %v1132_v16 = vpop.f32.mrb[14].mxu0  ;;  %v1148_v17 = vpop.f32.mrb[14].mxu1 }
 0x114   : > { %v1005_v12 = vpack.c.bf16 %v642_v2, %v641_v0  ;;  %v1045_v13 = vpack.c.bf16 %v658_v3, %v657_v1  ;;  %1066 = vst [vmem:[%s1319_s20 + $0x28] sm:$0xff] %v1010_v6   ;;  %v615_v18 = vadd.f32 %v1296_v26, %v576_v8  ;;  %v577_v20 = vmul.f32 %v1132_v16, %v1291_v24  ;;  %v479_v22 = vpop.f32.mrb[15].mxu0  ;;  %v543_v23 = vpop.f32.mrb[15].mxu1 }
 0x115   : > { %1074 = vst [vmem:[%s1319_s20 + $0x68] sm:$0xff] %v1050_v7   ;;  %v631_v19 = vadd.f32 %v1296_v26, %v592_v9  ;;  %v593_v21 = vmul.f32 %v1148_v17, %v1291_v24  ;;  %v613_v25 = vadd.f32 %v1296_v26, %v574_v14  ;;  %v629_v27 = vadd.f32 %v1296_v26, %v590_v15 }
 0x116   : > { %1065 = vst [vmem:[%s1319_s20 + $0x20] sm:$0xff] %v1005_v12   ;;  %1073 = vst [vmem:[%s1319_s20 + $0x60] sm:$0xff] %v1045_v13   ;;  %v575_v28 = vmul.f32 %v1291_v24, %v479_v22  ;;  %v591_v29 = vmul.f32 %v1291_v24, %v543_v23  ;;  %v616_v30 = vadd.f32 %v1296_v26, %v577_v20  ;;  %v647_v34 = vmax.f32 %v615_v18, 0.0 }
 0x117   : > { %v632_v31 = vadd.f32 %v1296_v26, %v593_v21  ;;  %v663_v35 = vmax.f32 %v631_v19, 0.0  ;;  %v645_v38 = vmax.f32 %v613_v25, 0.0  ;;  %v661_v39 = vmax.f32 %v629_v27, 0.0 }
 0x118   : > { %v614_v32 = vadd.f32 %v1296_v26, %v575_v28  ;;  %v630_v33 = vadd.f32 %v1296_v26, %v591_v29  ;;  %v648_v36 = vmax.f32 %v616_v30, 0.0 }
 0x119   : > { %v664_v37 = vmax.f32 %v632_v31, 0.0 }
 0x11a   : > { %v646_v40 = vmax.f32 %v614_v32, 0.0  ;;  %v662_v24 = vmax.f32 %v630_v33, 0.0  ;;  %v1020_v41 = vpack.c.bf16 %v648_v36, %v647_v34 }
 0x11b   : > { %v1060_v42 = vpack.c.bf16 %v664_v37, %v663_v35 }
 0x11c   : > { %v1015_v43 = vpack.c.bf16 %v646_v40, %v645_v38  ;;  %v1055_v44 = vpack.c.bf16 %v662_v24, %v661_v39  ;;  %1068 = vst [vmem:[%s1319_s20 + $0x38] sm:$0xff] %v1020_v41  }
 0x11d   : > { %1076 = vst [vmem:[%s1319_s20 + $0x78] sm:$0xff] %v1060_v42  }
 0x11e   : > { %1067 = vst [vmem:[%s1319_s20 + $0x30] sm:$0xff] %v1015_v43   ;;  %1075 = vst [vmem:[%s1319_s20 + $0x70] sm:$0xff] %v1055_v44  }
 0x11f PF: > { %s14_s15 = sadd.s32 1, %s1203_s15  }
 0x120   : > { %p11_p4 = scmp.ge.s32.totalorder %s14_s15, 4  }
 0x122   :  { %13 = sbr.rel (!%p11_p4) target bundleno = 1 (0x1), region = 66 }

// kernel: bottleneck_pallas.5
= control target key start
LH: loop header
LB: loop body
LE: loop exit
PB: predicated region body
PF: predicated region fallthrough
CT: control target
= control target key end

     0   :  { %s1891_s24 = smov 0   ;;  %s2129_s0 = inlined_call_operand.vmem [shape: bf16[512,128], index: 0, kind: input, shape index: {}]   ;;  %s2130_s1 = inlined_call_operand.vmem [shape: bf16[128,128], index: 1, kind: input, shape index: {}]   ;;  %s2131_s2 = inlined_call_operand.vmem [shape: f32[1,128], index: 2, kind: input, shape index: {}]   ;;  %s2132_s3 = inlined_call_operand.vmem [shape: bf16[512,128], index: 3, kind: input, shape index: {}]   ;;  %s2133_s4 = inlined_call_operand.vmem [shape: bf16[128,128], index: 4, kind: input, shape index: {}]   ;;  %s2134_s5 = inlined_call_operand.vmem [shape: f32[1,128], index: 5, kind: input, shape index: {}]   ;;  %s2135_s6 = inlined_call_operand.vmem [shape: f32[1,128], index: 6, kind: input, shape index: {}]   ;;  %s2136_s7 = inlined_call_operand.vmem [shape: bf16[512,128], index: 7, kind: output, shape index: {}]  }
   0x1 LB: > { %s1420_s25 = sadd.s32 4294967295, %s1849_s24   ;;  %p1424_p0 = scmp.ge.s32.totalorder %s1849_s24, 1  ;;  %s1849_s24 = sphi %s1891_s24, %s17_s24  }
   0x2   : > { %p249_p1 = scmp.lt.s32.totalorder %s1849_s24, 3 }
   0x4   : > { %p250_p2 = pnand %p1424_p0, %p249_p1 }
   0x5   : > { %v1795_v0 = vld [vmem:[%s2130_s1] sm:$0xff] (!%p250_p2)   ;;  %s1425_s28 = sshll.u32 (!%p250_p2), %s1420_s25, 5  ;;  %v1797_v2 = vld [vmem:[%s2130_s1 + $0x8] sm:$0xff] (!%p250_p2)   ;;  %v1799_v4 = vld [vmem:[%s2130_s1 + $0x10] sm:$0xff] (!%p250_p2)  }
   0x6   : > { %253 = sbr.rel (%p250_p2) target bundleno = 321 (0x141), region = 48  ;;  %v1796_v1 = vld [vmem:[%s2133_s4] sm:$0xff] (!%p250_p2)   ;;  %1691 = vmatprep.subr.bf16.mxu0 (!%p250_p2), %v1795_v0  ;;  %p287_p3 = scmp.lt.s32.totalorder (!%p250_p2), %s1425_s28, 63  ;;  %v1798_v3 = vld [vmem:[%s2133_s4 + $0x8] sm:$0xff] (!%p250_p2)   ;;  %v1800_v5 = vld [vmem:[%s2133_s4 + $0x10] sm:$0xff] (!%p250_p2)  }
   0x7   : > { %1739 = vmatprep.subr.bf16.mxu1 (!%p250_p2), %v1796_v1  ;;  %1692 = vmatpush3.bf16.msra.mxu0 (!%p250_p2), %v1795_v0  ;;  %v1801_v6 = vld [vmem:[%s2130_s1 + $0x18] sm:$0xff] (!%p250_p2)   ;;  %v1803_v8 = vld [vmem:[%s2130_s1 + $0x20] sm:$0xff] (!%p250_p2)   ;;  %v1805_v10 = vld [vmem:[%s2130_s1 + $0x28] sm:$0xff] (!%p250_p2)  }
   0x8   : > { %1740 = vmatpush3.bf16.msra.mxu1 (!%p250_p2), %v1796_v1  ;;  %1693 = vmatprep.subr.bf16.mxu0 (!%p250_p2), %v1797_v2  ;;  %v1802_v7 = vld [vmem:[%s2133_s4 + $0x18] sm:$0xff] (!%p250_p2)   ;;  %v1804_v9 = vld [vmem:[%s2133_s4 + $0x20] sm:$0xff] (!%p250_p2)   ;;  %v1806_v11 = vld [vmem:[%s2133_s4 + $0x28] sm:$0xff] (!%p250_p2)  }
   0x9   : > { %1741 = vmatprep.subr.bf16.mxu1 (!%p250_p2), %v1798_v3  ;;  %v1807_v14 = vld [vmem:[%s2130_s1 + $0x30] sm:$0xff] (!%p250_p2)   ;;  %v1809_v16 = vld [vmem:[%s2130_s1 + $0x38] sm:$0xff] (!%p250_p2)   ;;  %v1996_v48 = vld [vmem:[%s2131_s2] ss:$0 sm:$0xff] (!%p250_p2) }
   0xa   : > { %v1808_v15 = vld [vmem:[%s2133_s4 + $0x30] sm:$0xff] (!%p250_p2)   ;;  %v1810_v17 = vld [vmem:[%s2133_s4 + $0x38] sm:$0xff] (!%p250_p2)   ;;  %v2001_v49 = vld [vmem:[%s2134_s5] ss:$0 sm:$0xff] (!%p250_p2) }
   0xb   : > { %1694 = vmatpush3.bf16.msra.mxu0 (!%p250_p2), %v1797_v2  ;;  %v2009_v58 = vld [vmem:[%s2135_s6] ss:$0 sm:$0xff] (!%p250_p2) }
   0xc   : > { %1742 = vmatpush3.bf16.msra.mxu1 (!%p250_p2), %v1798_v3  ;;  %1695 = vmatprep.subr.bf16.mxu0 (!%p250_p2), %v1799_v4 }
   0xd   : > { %s2138_s28 = smov (!%p287_p3, %s1425_s28), 63  ;;  %1743 = vmatprep.subr.bf16.mxu1 %v1800_v5 }
   0xe   : > { %s1923_s20 = sshll.u32 %s2138_s28, 2 }
   0xf   : > { %1696 = vmatpush3.bf16.msra.mxu0 %v1799_v4  ;;  %s1935_s29 = scalar_lea.vmem %s2129_s0, %s1923_s20  ;;  %s1944_s10 = scalar_lea.vmem %s2132_s3, %s1923_s20 }
  0x10   : > { %1744 = vmatpush3.bf16.msra.mxu1 %v1800_v5  ;;  %1697 = vmatprep.subr.bf16.mxu0 %v1801_v6  ;;  %v1811_v12 = vld [vmem:[%s1935_s29] sm:$0xff]   ;;  %v1813_v18 = vld [vmem:[%s1935_s29 + $0x8] sm:$0xff]   ;;  %v1815_v20 = vld [vmem:[%s1935_s29 + $0x10] sm:$0xff]   ;;  %s2027_s8 = scalar_lea.vmem %s2136_s7, %s1923_s20 }
  0x11   : > { %1745 = vmatprep.subr.bf16.mxu1 %v1802_v7  ;;  %v1812_v13 = vld [vmem:[%s1944_s10] sm:$0xff]   ;;  %1707 = vmatprep.mubr.bf16.mxu0 %v1811_v12  ;;  %v1814_v19 = vld [vmem:[%s1944_s10 + $0x8] sm:$0xff]   ;;  %v1816_v21 = vld [vmem:[%s1944_s10 + $0x10] sm:$0xff]  }
  0x12   : > { %1755 = vmatprep.mubr.bf16.mxu1 %v1812_v13  ;;  %v1817_v22 = vld [vmem:[%s1935_s29 + $0x18] sm:$0xff]   ;;  %v1819_v24 = vld [vmem:[%s1935_s29 + $0x20] sm:$0xff]   ;;  %v1821_v26 = vld [vmem:[%s1935_s29 + $0x28] sm:$0xff]  }
  0x13   : > { %1698 = vmatpush3.bf16.msra.mxu0 %v1801_v6  ;;  %v1818_v23 = vld [vmem:[%s1944_s10 + $0x18] sm:$0xff]   ;;  %v1820_v25 = vld [vmem:[%s1944_s10 + $0x20] sm:$0xff]   ;;  %v1822_v27 = vld [vmem:[%s1944_s10 + $0x28] sm:$0xff]  }
  0x14   : > { %1746 = vmatpush3.bf16.msra.mxu1 %v1802_v7  ;;  %1699 = vmatprep.subr.bf16.mxu0 %v1803_v8  ;;  %v1823_v28 = vld [vmem:[%s1935_s29 + $0x30] sm:$0xff]   ;;  %v1825_v30 = vld [vmem:[%s1935_s29 + $0x38] sm:$0xff]   ;;  %v1827_v32 = vld [vmem:[%s1935_s29 + $0x40] sm:$0xff]  }
  0x15   : > { %1747 = vmatprep.subr.bf16.mxu1 %v1804_v9  ;;  %v1824_v29 = vld [vmem:[%s1944_s10 + $0x30] sm:$0xff]   ;;  %v1826_v31 = vld [vmem:[%s1944_s10 + $0x38] sm:$0xff]   ;;  %v1828_v33 = vld [vmem:[%s1944_s10 + $0x40] sm:$0xff]  }
  0x16   : > { %v1829_v34 = vld [vmem:[%s1935_s29 + $0x48] sm:$0xff]   ;;  %v1831_v36 = vld [vmem:[%s1935_s29 + $0x50] sm:$0xff]   ;;  %v1833_v38 = vld [vmem:[%s1935_s29 + $0x58] sm:$0xff]  }
  0x17   : > { %1700 = vmatpush3.bf16.msra.mxu0 %v1803_v8  ;;  %v1830_v35 = vld [vmem:[%s1944_s10 + $0x48] sm:$0xff]   ;;  %v1832_v37 = vld [vmem:[%s1944_s10 + $0x50] sm:$0xff]   ;;  %v1834_v39 = vld [vmem:[%s1944_s10 + $0x58] sm:$0xff]  }
  0x18   : > { %1748 = vmatpush3.bf16.msra.mxu1 %v1804_v9  ;;  %1701 = vmatprep.subr.bf16.mxu0 %v1805_v10  ;;  %v1835_v40 = vld [vmem:[%s1935_s29 + $0x60] sm:$0xff]   ;;  %v1837_v42 = vld [vmem:[%s1935_s29 + $0x68] sm:$0xff]   ;;  %v1839_v44 = vld [vmem:[%s1935_s29 + $0x70] sm:$0xff]  }
  0x19   : > { %1749 = vmatprep.subr.bf16.mxu1 %v1806_v11  ;;  %v1836_v41 = vld [vmem:[%s1944_s10 + $0x60] sm:$0xff]   ;;  %v1838_v43 = vld [vmem:[%s1944_s10 + $0x68] sm:$0xff]   ;;  %v1840_v45 = vld [vmem:[%s1944_s10 + $0x70] sm:$0xff]  }
  0x1a   : > { %v1841_v46 = vld [vmem:[%s1935_s29 + $0x78] sm:$0xff]  }
  0x1b   : > { %1702 = vmatpush3.bf16.msra.mxu0 %v1805_v10  ;;  %v1842_v47 = vld [vmem:[%s1944_s10 + $0x78] sm:$0xff]  }
  0x1c   : > { %1750 = vmatpush3.bf16.msra.mxu1 %v1806_v11  ;;  %1703 = vmatprep.subr.bf16.mxu0 %v1807_v14 }
  0x1d   : > { %1751 = vmatprep.subr.bf16.mxu1 %v1808_v15 }
  0x1f   : > { %1704 = vmatpush3.bf16.msra.mxu0 %v1807_v14 }
  0x20   : > { %1752 = vmatpush3.bf16.msra.mxu1 %v1808_v15  ;;  %1705 = vmatprep.subr.bf16.mxu0 %v1809_v16 }
  0x21   : > { %1753 = vmatprep.subr.bf16.mxu1 %v1810_v17 }
  0x23   : > { %1706 = vmatpush3.bf16.msra.mxu0 %v1809_v16 }
  0x24   : > { %1754 = vmatpush3.bf16.msra.mxu1 %v1810_v17 }
  0x26   : > { %1708 = vmatmul.mubr.bf16.vlgmr.msra.gmra.mrb[0].mxu0 %v1813_v18 }
  0x27   : > { %1756 = vmatmul.mubr.bf16.vlgmr.msra.gmra.mrb[0].mxu1 %v1814_v19  ;;  %1711 = vmatprep.mubr.bf16.mxu0 %v1815_v20 }
  0x28   : > { %1759 = vmatprep.mubr.bf16.mxu1 %v1816_v21 }
  0x2e   : > { %1712 = vmatmul.mubr.bf16.gmra.mrb[4].mxu0 %v1817_v22 }
  0x2f   : > { %1760 = vmatmul.mubr.bf16.gmra.mrb[4].mxu1 %v1818_v23  ;;  %1715 = vmatprep.mubr.bf16.mxu0 %v1819_v24 }
  0x30   : > { %1763 = vmatprep.mubr.bf16.mxu1 %v1820_v25 }
  0x36   : > { %1716 = vmatmul.mubr.bf16.gmra.mrb[8].mxu0 %v1821_v26 }
  0x37   : > { %1764 = vmatmul.mubr.bf16.gmra.mrb[8].mxu1 %v1822_v27  ;;  %1719 = vmatprep.mubr.bf16.mxu0 %v1823_v28 }
  0x38   : > { %1767 = vmatprep.mubr.bf16.mxu1 %v1824_v29 }
  0x3e   : > { %1720 = vmatmul.mubr.bf16.gmra.mrb[12].mxu0 %v1825_v30 }
  0x3f   : > { %1768 = vmatmul.mubr.bf16.gmra.mrb[12].mxu1 %v1826_v31  ;;  %1723 = vmatprep.mubr.bf16.mxu0 %v1827_v32 }
  0x40   : > { %1771 = vmatprep.mubr.bf16.mxu1 %v1828_v33 }
  0x46   : > { %1724 = vmatmul.mubr.bf16.gmra.mrb[16].mxu0 %v1829_v34 }
  0x47   : > { %1772 = vmatmul.mubr.bf16.gmra.mrb[16].mxu1 %v1830_v35  ;;  %1727 = vmatprep.mubr.bf16.mxu0 %v1831_v36 }
  0x48   : > { %1775 = vmatprep.mubr.bf16.mxu1 %v1832_v37 }
  0x4e   : > { %1728 = vmatmul.mubr.bf16.gmra.mrb[20].mxu0 %v1833_v38 }
  0x4f   : > { %1776 = vmatmul.mubr.bf16.gmra.mrb[20].mxu1 %v1834_v39  ;;  %1731 = vmatprep.mubr.bf16.mxu0 %v1835_v40 }
  0x50   : > { %1779 = vmatprep.mubr.bf16.mxu1 %v1836_v41 }
  0x56   : > { %1732 = vmatmul.mubr.bf16.gmra.mrb[24].mxu0 %v1837_v42 }
  0x57   : > { %1780 = vmatmul.mubr.bf16.gmra.mrb[24].mxu1 %v1838_v43  ;;  %1735 = vmatprep.mubr.bf16.mxu0 %v1839_v44 }
  0x58   : > { %1783 = vmatprep.mubr.bf16.mxu1 %v1840_v45 }
  0x5e   : > { %1736 = vmatmul.mubr.bf16.gmra.mrb[28].mxu0 %v1841_v46 }
  0x5f   : > { %1784 = vmatmul.mubr.bf16.gmra.mrb[28].mxu1 %v1842_v47 }
  0xf9   : > { %v1709_v50 = vpop.f32.mrb[0].mxu0 }
  0xfa   : > { %v1020_v51 = vmul.f32 %v1709_v50, %v1996_v48  ;;  %v1757_v52 = vpop.f32.mrb[0].mxu1  ;;  %v531_v53 = vpop.f32.mrb[1].mxu0 }
  0xfb   : > { %v1059_v54 = vmul.f32 %v1757_v52, %v2001_v49  ;;  %v1018_v55 = vmul.f32 %v1996_v48, %v531_v53  ;;  %v884_v56 = vpop.f32.mrb[1].mxu1  ;;  %v1710_v57 = vpop.f32.mrb[2].mxu0 }
  0xfc   : > { %v1057_v59 = vmul.f32 %v2001_v49, %v884_v56  ;;  %v1021_v60 = vmul.f32 %v1710_v57, %v1996_v48  ;;  %v1758_v61 = vpop.f32.mrb[2].mxu1  ;;  %v534_v62 = vpop.f32.mrb[3].mxu0 }
  0xfd   : > { %v1091_v63 = vadd.f32 %v1059_v54, %v1020_v51  ;;  %v1060_v0 = vmul.f32 %v1758_v61, %v2001_v49  ;;  %v1019_v1 = vmul.f32 %v1996_v48, %v534_v62  ;;  %v887_v2 = vpop.f32.mrb[3].mxu1 }
  0xfe   : > { %v1089_v3 = vadd.f32 %v1057_v59, %v1018_v55  ;;  %v1058_v4 = vmul.f32 %v2001_v49, %v887_v2 }
  0xff   : > { %v1130_v5 = vadd.f32 %v2009_v58, %v1091_v63  ;;  %v1092_v6 = vadd.f32 %v1060_v0, %v1021_v60 }
 0x100   : > { %v1128_v7 = vadd.f32 %v2009_v58, %v1089_v3  ;;  %v1090_v8 = vadd.f32 %v1058_v4, %v1019_v1 }
 0x101   : > { %v1131_v9 = vadd.f32 %v2009_v58, %v1092_v6  ;;  %v1713_v10 = vpop.f32.mrb[4].mxu0  ;;  %v1162_v15 = vmax.f32 %v1130_v5, 0.0 }
 0x102   : > { %v1129_v11 = vadd.f32 %v2009_v58, %v1090_v8  ;;  %v1024_v12 = vmul.f32 %v1713_v10, %v1996_v48  ;;  %v1761_v13 = vpop.f32.mrb[4].mxu1  ;;  %v547_v14 = vpop.f32.mrb[5].mxu0  ;;  %v1160_v21 = vmax.f32 %v1128_v7, 0.0 }
 0x103   : > { %v1163_v16 = vmax.f32 %v1131_v9, 0.0  ;;  %v1063_v17 = vmul.f32 %v1761_v13, %v2001_v49  ;;  %v1022_v18 = vmul.f32 %v1996_v48, %v547_v14  ;;  %v900_v19 = vpop.f32.mrb[5].mxu1  ;;  %v1714_v20 = vpop.f32.mrb[6].mxu0 }
 0x104   : > { %v1161_v22 = vmax.f32 %v1129_v11, 0.0  ;;  %v1061_v23 = vmul.f32 %v2001_v49, %v900_v19  ;;  %v1025_v24 = vmul.f32 %v1714_v20, %v1996_v48  ;;  %v1762_v25 = vpop.f32.mrb[6].mxu1  ;;  %v550_v26 = vpop.f32.mrb[7].mxu0 }
 0x105   : > { %v1556_v27 = vpack.c.bf16 %v1163_v16, %v1162_v15  ;;  %v1095_v28 = vadd.f32 %v1063_v17, %v1024_v12  ;;  %v1064_v29 = vmul.f32 %v1762_v25, %v2001_v49  ;;  %v1023_v30 = vmul.f32 %v1996_v48, %v550_v26  ;;  %v903_v31 = vpop.f32.mrb[7].mxu1 }
 0x106   : > { %v1551_v32 = vpack.c.bf16 %v1161_v22, %v1160_v21  ;;  %v1093_v33 = vadd.f32 %v1061_v23, %v1022_v18  ;;  %v1062_v34 = vmul.f32 %v2001_v49, %v903_v31 }
 0x107   : > { %1628 = vst [vmem:[%s2027_s8 + $0x8] sm:$0xff] %v1556_v27   ;;  %v1134_v35 = vadd.f32 %v2009_v58, %v1095_v28  ;;  %v1096_v36 = vadd.f32 %v1064_v29, %v1025_v24 }
 0x108   : > { %1552 = vst [vmem:[%s2027_s8] sm:$0xff] %v1551_v32   ;;  %v1132_v37 = vadd.f32 %v2009_v58, %v1093_v33  ;;  %v1094_v38 = vadd.f32 %v1062_v34, %v1023_v30 }
 0x109   : > { %v1135_v39 = vadd.f32 %v2009_v58, %v1096_v36  ;;  %v1717_v40 = vpop.f32.mrb[8].mxu0  ;;  %v1166_v45 = vmax.f32 %v1134_v35, 0.0 }
 0x10a   : > { %v1133_v41 = vadd.f32 %v2009_v58, %v1094_v38  ;;  %v1028_v42 = vmul.f32 %v1717_v40, %v1996_v48  ;;  %v1765_v43 = vpop.f32.mrb[8].mxu1  ;;  %v563_v44 = vpop.f32.mrb[9].mxu0  ;;  %v1164_v53 = vmax.f32 %v1132_v37, 0.0 }
 0x10b   : > { %v1167_v46 = vmax.f32 %v1135_v39, 0.0  ;;  %v1067_v47 = vmul.f32 %v1765_v43, %v2001_v49  ;;  %v1026_v50 = vmul.f32 %v1996_v48, %v563_v44  ;;  %v916_v51 = vpop.f32.mrb[9].mxu1  ;;  %v1718_v52 = vpop.f32.mrb[10].mxu0 }
 0x10c   : > { %v1165_v54 = vmax.f32 %v1133_v41, 0.0  ;;  %v1065_v55 = vmul.f32 %v2001_v49, %v916_v51  ;;  %v1029_v56 = vmul.f32 %v1718_v52, %v1996_v48  ;;  %v1766_v57 = vpop.f32.mrb[10].mxu1  ;;  %v566_v59 = vpop.f32.mrb[11].mxu0 }
 0x10d   : > { %v1566_v60 = vpack.c.bf16 %v1167_v46, %v1166_v45  ;;  %v1099_v61 = vadd.f32 %v1067_v47, %v1028_v42  ;;  %v1068_v62 = vmul.f32 %v1766_v57, %v2001_v49  ;;  %v1027_v63 = vmul.f32 %v1996_v48, %v566_v59  ;;  %v919_v0 = vpop.f32.mrb[11].mxu1 }
 0x10e   : > { %v1561_v1 = vpack.c.bf16 %v1165_v54, %v1164_v53  ;;  %v1097_v2 = vadd.f32 %v1065_v55, %v1026_v50  ;;  %v1066_v3 = vmul.f32 %v2001_v49, %v919_v0 }
 0x10f   : > { %1630 = vst [vmem:[%s2027_s8 + $0x18] sm:$0xff] %v1566_v60   ;;  %v1138_v4 = vadd.f32 %v2009_v58, %v1099_v61  ;;  %v1100_v5 = vadd.f32 %v1068_v62, %v1029_v56 }
 0x110   : > { %1629 = vst [vmem:[%s2027_s8 + $0x10] sm:$0xff] %v1561_v1   ;;  %v1136_v6 = vadd.f32 %v2009_v58, %v1097_v2  ;;  %v1098_v7 = vadd.f32 %v1066_v3, %v1027_v63 }
 0x111   : > { %v1139_v8 = vadd.f32 %v2009_v58, %v1100_v5  ;;  %v1721_v9 = vpop.f32.mrb[12].mxu0  ;;  %v1170_v14 = vmax.f32 %v1138_v4, 0.0 }
 0x112   : > { %v1137_v10 = vadd.f32 %v2009_v58, %v1098_v7  ;;  %v1032_v11 = vmul.f32 %v1721_v9, %v1996_v48  ;;  %v1769_v12 = vpop.f32.mrb[12].mxu1  ;;  %v579_v13 = vpop.f32.mrb[13].mxu0  ;;  %v1168_v20 = vmax.f32 %v1136_v6, 0.0 }
 0x113   : > { %v1171_v15 = vmax.f32 %v1139_v8, 0.0  ;;  %v1071_v16 = vmul.f32 %v1769_v12, %v2001_v49  ;;  %v1030_v17 = vmul.f32 %v1996_v48, %v579_v13  ;;  %v932_v18 = vpop.f32.mrb[13].mxu1  ;;  %v1722_v19 = vpop.f32.mrb[14].mxu0 }
 0x114   : > { %v1169_v21 = vmax.f32 %v1137_v10, 0.0  ;;  %v1069_v22 = vmul.f32 %v2001_v49, %v932_v18  ;;  %v1033_v23 = vmul.f32 %v1722_v19, %v1996_v48  ;;  %v1770_v24 = vpop.f32.mrb[14].mxu1  ;;  %v582_v25 = vpop.f32.mrb[15].mxu0 }
 0x115   : > { %v1576_v26 = vpack.c.bf16 %v1171_v15, %v1170_v14  ;;  %v1103_v27 = vadd.f32 %v1071_v16, %v1032_v11  ;;  %v1072_v28 = vmul.f32 %v1770_v24, %v2001_v49  ;;  %v1031_v29 = vmul.f32 %v1996_v48, %v582_v25  ;;  %v935_v30 = vpop.f32.mrb[15].mxu1 }
 0x116   : > { %v1571_v31 = vpack.c.bf16 %v1169_v21, %v1168_v20  ;;  %v1101_v32 = vadd.f32 %v1069_v22, %v1030_v17  ;;  %v1070_v33 = vmul.f32 %v2001_v49, %v935_v30 }
 0x117   : > { %1632 = vst [vmem:[%s2027_s8 + $0x28] sm:$0xff] %v1576_v26   ;;  %v1142_v34 = vadd.f32 %v2009_v58, %v1103_v27  ;;  %v1104_v35 = vadd.f32 %v1072_v28, %v1033_v23 }
 0x118   : > { %1631 = vst [vmem:[%s2027_s8 + $0x20] sm:$0xff] %v1571_v31   ;;  %v1140_v36 = vadd.f32 %v2009_v58, %v1101_v32  ;;  %v1102_v37 = vadd.f32 %v1070_v33, %v1031_v29 }
 0x119   : > { %v1143_v38 = vadd.f32 %v2009_v58, %v1104_v35  ;;  %v1725_v39 = vpop.f32.mrb[16].mxu0  ;;  %v1174_v44 = vmax.f32 %v1142_v34, 0.0 }
 0x11a   : > { %v1141_v40 = vadd.f32 %v2009_v58, %v1102_v37  ;;  %v1036_v41 = vmul.f32 %v1725_v39, %v1996_v48  ;;  %v1773_v42 = vpop.f32.mrb[16].mxu1  ;;  %v595_v43 = vpop.f32.mrb[17].mxu0  ;;  %v1172_v52 = vmax.f32 %v1140_v36, 0.0 }
 0x11b   : > { %v1175_v45 = vmax.f32 %v1143_v38, 0.0  ;;  %v1075_v46 = vmul.f32 %v1773_v42, %v2001_v49  ;;  %v1034_v47 = vmul.f32 %v1996_v48, %v595_v43  ;;  %v948_v50 = vpop.f32.mrb[17].mxu1  ;;  %v1726_v51 = vpop.f32.mrb[18].mxu0 }
 0x11c   : > { %v1173_v53 = vmax.f32 %v1141_v40, 0.0  ;;  %v1073_v54 = vmul.f32 %v2001_v49, %v948_v50  ;;  %v1037_v55 = vmul.f32 %v1726_v51, %v1996_v48  ;;  %v1774_v56 = vpop.f32.mrb[18].mxu1  ;;  %v598_v57 = vpop.f32.mrb[19].mxu0 }
 0x11d   : > { %v1586_v59 = vpack.c.bf16 %v1175_v45, %v1174_v44  ;;  %v1107_v60 = vadd.f32 %v1075_v46, %v1036_v41  ;;  %v1076_v61 = vmul.f32 %v1774_v56, %v2001_v49  ;;  %v1035_v62 = vmul.f32 %v1996_v48, %v598_v57  ;;  %v951_v63 = vpop.f32.mrb[19].mxu1 }
 0x11e   : > { %v1581_v0 = vpack.c.bf16 %v1173_v53, %v1172_v52  ;;  %v1105_v1 = vadd.f32 %v1073_v54, %v1034_v47  ;;  %v1074_v2 = vmul.f32 %v2001_v49, %v951_v63 }
 0x11f   : > { %1634 = vst [vmem:[%s2027_s8 + $0x38] sm:$0xff] %v1586_v59   ;;  %v1146_v3 = vadd.f32 %v2009_v58, %v1107_v60  ;;  %v1108_v4 = vadd.f32 %v1076_v61, %v1037_v55 }
 0x120   : > { %1633 = vst [vmem:[%s2027_s8 + $0x30] sm:$0xff] %v1581_v0   ;;  %v1144_v5 = vadd.f32 %v2009_v58, %v1105_v1  ;;  %v1106_v6 = vadd.f32 %v1074_v2, %v1035_v62 }
 0x121   : > { %v1147_v7 = vadd.f32 %v2009_v58, %v1108_v4  ;;  %v1729_v8 = vpop.f32.mrb[20].mxu0  ;;  %v1178_v13 = vmax.f32 %v1146_v3, 0.0 }
 0x122   : > { %v1145_v9 = vadd.f32 %v2009_v58, %v1106_v6  ;;  %v1040_v10 = vmul.f32 %v1729_v8, %v1996_v48  ;;  %v1777_v11 = vpop.f32.mrb[20].mxu1  ;;  %v611_v12 = vpop.f32.mrb[21].mxu0  ;;  %v1176_v19 = vmax.f32 %v1144_v5, 0.0 }
 0x123   : > { %v1179_v14 = vmax.f32 %v1147_v7, 0.0  ;;  %v1079_v15 = vmul.f32 %v1777_v11, %v2001_v49  ;;  %v1038_v16 = vmul.f32 %v1996_v48, %v611_v12  ;;  %v964_v17 = vpop.f32.mrb[21].mxu1  ;;  %v1730_v18 = vpop.f32.mrb[22].mxu0 }
 0x124   : > { %v1177_v20 = vmax.f32 %v1145_v9, 0.0  ;;  %v1077_v21 = vmul.f32 %v2001_v49, %v964_v17  ;;  %v1041_v22 = vmul.f32 %v1730_v18, %v1996_v48  ;;  %v1778_v23 = vpop.f32.mrb[22].mxu1  ;;  %v614_v24 = vpop.f32.mrb[23].mxu0 }
 0x125   : > { %v1596_v25 = vpack.c.bf16 %v1179_v14, %v1178_v13  ;;  %v1111_v26 = vadd.f32 %v1079_v15, %v1040_v10  ;;  %v1080_v27 = vmul.f32 %v1778_v23, %v2001_v49  ;;  %v1039_v28 = vmul.f32 %v1996_v48, %v614_v24  ;;  %v967_v29 = vpop.f32.mrb[23].mxu1 }
 0x126   : > { %v1591_v30 = vpack.c.bf16 %v1177_v20, %v1176_v19  ;;  %v1109_v31 = vadd.f32 %v1077_v21, %v1038_v16  ;;  %v1078_v32 = vmul.f32 %v2001_v49, %v967_v29 }
 0x127   : > { %1636 = vst [vmem:[%s2027_s8 + $0x48] sm:$0xff] %v1596_v25   ;;  %v1150_v33 = vadd.f32 %v2009_v58, %v1111_v26  ;;  %v1112_v34 = vadd.f32 %v1080_v27, %v1041_v22 }
 0x128   : > { %1635 = vst [vmem:[%s2027_s8 + $0x40] sm:$0xff] %v1591_v30   ;;  %v1148_v35 = vadd.f32 %v2009_v58, %v1109_v31  ;;  %v1110_v36 = vadd.f32 %v1078_v32, %v1039_v28 }
 0x129   : > { %v1151_v37 = vadd.f32 %v2009_v58, %v1112_v34  ;;  %v1733_v38 = vpop.f32.mrb[24].mxu0  ;;  %v1182_v43 = vmax.f32 %v1150_v33, 0.0 }
 0x12a   : > { %v1149_v39 = vadd.f32 %v2009_v58, %v1110_v36  ;;  %v1044_v40 = vmul.f32 %v1733_v38, %v1996_v48  ;;  %v1781_v41 = vpop.f32.mrb[24].mxu1  ;;  %v627_v42 = vpop.f32.mrb[25].mxu0  ;;  %v1180_v51 = vmax.f32 %v1148_v35, 0.0 }
 0x12b   : > { %v1183_v44 = vmax.f32 %v1151_v37, 0.0  ;;  %v1083_v45 = vmul.f32 %v1781_v41, %v2001_v49  ;;  %v1042_v46 = vmul.f32 %v1996_v48, %v627_v42  ;;  %v980_v47 = vpop.f32.mrb[25].mxu1  ;;  %v1734_v50 = vpop.f32.mrb[26].mxu0 }
 0x12c   : > { %v1181_v52 = vmax.f32 %v1149_v39, 0.0  ;;  %v1081_v53 = vmul.f32 %v2001_v49, %v980_v47  ;;  %v1045_v54 = vmul.f32 %v1734_v50, %v1996_v48  ;;  %v1782_v55 = vpop.f32.mrb[26].mxu1  ;;  %v630_v56 = vpop.f32.mrb[27].mxu0 }
 0x12d   : > { %v1606_v57 = vpack.c.bf16 %v1183_v44, %v1182_v43  ;;  %v1115_v59 = vadd.f32 %v1083_v45, %v1044_v40  ;;  %v1084_v60 = vmul.f32 %v1782_v55, %v2001_v49  ;;  %v1043_v61 = vmul.f32 %v1996_v48, %v630_v56  ;;  %v983_v62 = vpop.f32.mrb[27].mxu1 }
 0x12e   : > { %v1601_v63 = vpack.c.bf16 %v1181_v52, %v1180_v51  ;;  %v1113_v0 = vadd.f32 %v1081_v53, %v1042_v46  ;;  %v1082_v1 = vmul.f32 %v2001_v49, %v983_v62 }
 0x12f   : > { %1638 = vst [vmem:[%s2027_s8 + $0x58] sm:$0xff] %v1606_v57   ;;  %v1154_v2 = vadd.f32 %v2009_v58, %v1115_v59  ;;  %v1116_v3 = vadd.f32 %v1084_v60, %v1045_v54 }
 0x130   : > { %1637 = vst [vmem:[%s2027_s8 + $0x50] sm:$0xff] %v1601_v63   ;;  %v1152_v4 = vadd.f32 %v2009_v58, %v1113_v0  ;;  %v1114_v5 = vadd.f32 %v1082_v1, %v1043_v61 }
 0x131   : > { %v1155_v6 = vadd.f32 %v2009_v58, %v1116_v3  ;;  %v1737_v7 = vpop.f32.mrb[28].mxu0  ;;  %v1186_v12 = vmax.f32 %v1154_v2, 0.0 }
 0x132   : > { %v1153_v8 = vadd.f32 %v2009_v58, %v1114_v5  ;;  %v1048_v9 = vmul.f32 %v1737_v7, %v1996_v48  ;;  %v1785_v10 = vpop.f32.mrb[28].mxu1  ;;  %v643_v11 = vpop.f32.mrb[29].mxu0  ;;  %v1184_v18 = vmax.f32 %v1152_v4, 0.0 }
 0x133   : > { %v1187_v13 = vmax.f32 %v1155_v6, 0.0  ;;  %v1087_v14 = vmul.f32 %v1785_v10, %v2001_v49  ;;  %v1046_v15 = vmul.f32 %v1996_v48, %v643_v11  ;;  %v996_v16 = vpop.f32.mrb[29].mxu1  ;;  %v1738_v17 = vpop.f32.mrb[30].mxu0 }
 0x134   : > { %v1185_v19 = vmax.f32 %v1153_v8, 0.0  ;;  %v1085_v20 = vmul.f32 %v2001_v49, %v996_v16  ;;  %v1049_v21 = vmul.f32 %v1738_v17, %v1996_v48  ;;  %v1786_v22 = vpop.f32.mrb[30].mxu1  ;;  %v646_v23 = vpop.f32.mrb[31].mxu0 }
 0x135   : > { %v1616_v24 = vpack.c.bf16 %v1187_v13, %v1186_v12  ;;  %v1119_v25 = vadd.f32 %v1087_v14, %v1048_v9  ;;  %v1088_v26 = vmul.f32 %v1786_v22, %v2001_v49  ;;  %v1047_v27 = vmul.f32 %v1996_v48, %v646_v23  ;;  %v999_v28 = vpop.f32.mrb[31].mxu1 }
 0x136   : > { %v1611_v29 = vpack.c.bf16 %v1185_v19, %v1184_v18  ;;  %v1117_v30 = vadd.f32 %v1085_v20, %v1046_v15  ;;  %v1086_v31 = vmul.f32 %v2001_v49, %v999_v28 }
 0x137   : > { %1640 = vst [vmem:[%s2027_s8 + $0x68] sm:$0xff] %v1616_v24   ;;  %v1158_v32 = vadd.f32 %v2009_v58, %v1119_v25  ;;  %v1120_v33 = vadd.f32 %v1088_v26, %v1049_v21 }
 0x138   : > { %1639 = vst [vmem:[%s2027_s8 + $0x60] sm:$0xff] %v1611_v29   ;;  %v1156_v34 = vadd.f32 %v2009_v58, %v1117_v30  ;;  %v1118_v35 = vadd.f32 %v1086_v31, %v1047_v27 }
 0x139   : > { %v1159_v36 = vadd.f32 %v2009_v58, %v1120_v33  ;;  %v1190_v48 = vmax.f32 %v1158_v32, 0.0 }
 0x13a   : > { %v1157_v37 = vadd.f32 %v2009_v58, %v1118_v35  ;;  %v1188_v39 = vmax.f32 %v1156_v34, 0.0 }
 0x13b   : > { %v1191_v38 = vmax.f32 %v1159_v36, 0.0 }
 0x13c   : > { %v1189_v40 = vmax.f32 %v1157_v37, 0.0 }
 0x13d   : > { %v1626_v41 = vpack.c.bf16 %v1191_v38, %v1190_v48 }
 0x13e   : > { %v1621_v42 = vpack.c.bf16 %v1189_v40, %v1188_v39 }
 0x13f   : > { %1642 = vst [vmem:[%s2027_s8 + $0x78] sm:$0xff] %v1626_v41  }
 0x140   : > { %1641 = vst [vmem:[%s2027_s8 + $0x70] sm:$0xff] %v1621_v42  }
 0x141 PF: > { %s17_s24 = sadd.s32 1, %s1849_s24  }
 0x142   : > { %p14_p4 = scmp.ge.s32.totalorder %s17_s24, 4  }
 0x144   :  { %16 = sbr.rel (!%p14_p4) target bundleno = 1 (0x1), region = 81 }

// kernel: bottleneck_pallas.4
= control target key start
LH: loop header
LB: loop body
LE: loop exit
PB: predicated region body
PF: predicated region fallthrough
CT: control target
= control target key end

     0   :  { %s7241_s15 = smov 0   ;;  %s9127_s0 = inlined_call_operand.vmem [shape: bf16[2,18,18,128], index: 0, kind: input, shape index: {}]   ;;  %s9128_s1 = inlined_call_operand.vmem [shape: bf16[9,128,128], index: 1, kind: input, shape index: {}]   ;;  %s9129_s2 = inlined_call_operand.vmem [shape: f32[1,128], index: 2, kind: input, shape index: {}]   ;;  %s9130_s3 = inlined_call_operand.vmem [shape: f32[1,128], index: 3, kind: input, shape index: {}]   ;;  %s9131_s4 = inlined_call_operand.vmem [shape: bf16[2,16,16,128], index: 4, kind: output, shape index: {}]  }
   0x1 LB: > { %s5333_s16 = sadd.s32 4294967295, %s7214_s15   ;;  %p5337_p0 = scmp.ge.s32.totalorder %s7214_s15, 1  ;;  %s7214_s15 = sphi %s7241_s15, %s14_s15  }
   0x2   : > { %p162_p1 = scmp.lt.s32.totalorder %s7214_s15, 3 }
   0x4   : > { %p163_p2 = pnand %p5337_p0, %p162_p1 }
   0x6   : > { %166 = sbr.rel (%p163_p2) target bundleno = 591 (0x24f), region = 36 }
   0xd   : > { %v7018_v0 = vld [vmem:[%s9128_s1 + $0x40] sm:$0xff]   ;;  %p188_p3 = scmp.lt.s32.totalorder %s5333_s16, 1  ;;  %v7020_v2 = vld [vmem:[%s9128_s1 + $0x48] sm:$0xff]   ;;  %v7022_v4 = vld [vmem:[%s9128_s1 + $0x50] sm:$0xff]   ;;  %vm263_vm0 = vsmask.f32 3328 }
   0xe   : > { %v7019_v1 = vld [vmem:[%s9128_s1 + $0x100] sm:$0xff]   ;;  %6305 = vmatprep.subr.bf16.mxu1 %v7018_v0  ;;  %v7021_v3 = vld [vmem:[%s9128_s1 + $0x108] sm:$0xff]   ;;  %v7023_v5 = vld [vmem:[%s9128_s1 + $0x110] sm:$0xff]   ;;  %vm264_vm1 = vsmask.f32 7440  ;;  %vm1293_vm3 = vcmask 1042432  }
   0xf   : > { %6497 = vmatprep.subr.bf16.mxu0 %v7019_v1  ;;  %6306 = vmatpush3.bf16.msra.mxu1 %v7018_v0  ;;  %s9199_s16 = smov (!%p188_p3, %s5333_s16), 1  ;;  %v7024_v6 = vld [vmem:[%s9128_s1 + $0x58] sm:$0xff]   ;;  %v7026_v8 = vld [vmem:[%s9128_s1 + $0x60] sm:$0xff]   ;;  %v7028_v10 = vld [vmem:[%s9128_s1 + $0x68] sm:$0xff]   ;;  %vm1294_vm4 = vcmask 1046532  }
  0x10   : > { %6498 = vmatpush3.bf16.msra.mxu0 %v7019_v1  ;;  %6307 = vmatprep.subr.bf16.mxu1 %v7020_v2  ;;  %v7025_v7 = vld [vmem:[%s9128_s1 + $0x118] sm:$0xff]   ;;  %s7009_s7 = smul.u32 216, %s9199_s16  ;;  %v7027_v9 = vld [vmem:[%s9128_s1 + $0x120] sm:$0xff]   ;;  %v7029_v11 = vld [vmem:[%s9128_s1 + $0x128] sm:$0xff]   ;;  %s5961_s22 = sshll.u32 %s9199_s16, 7 }
  0x11   : > { %6499 = vmatprep.subr.bf16.mxu0 %v7021_v3  ;;  %v7030_v25 = vld [vmem:[%s9128_s1 + $0x70] sm:$0xff]   ;;  %v7032_v36 = vld [vmem:[%s9128_s1 + $0x78] sm:$0xff]   ;;  %vm7317_vm2 = vmor %vm263_vm0, %vm264_vm1  ;;  %s9045_s25 = scalar_lea.vmem %s9131_s4, %s5961_s22 }
  0x12   : > { %s7285_s14 = scalar_lea.vmem %s9127_s0, %s7009_s7  ;;  %v7031_v30 = vld [vmem:[%s9128_s1 + $0x130] sm:$0xff]   ;;  %v7033_v51 = vld [vmem:[%s9128_s1 + $0x138] sm:$0xff]   ;;  %vm7563_vm5 = vmor %vm1293_vm3, %vm1294_vm4 }
  0x13   : > { %6308 = vmatpush3.bf16.msra.mxu1 %v7020_v2  ;;  %v199_v12 = vld [vmem:[%s7285_s14] sm:$0xf]  ;;  %v200_v13 = vld [vmem:[%s7285_s14 + $0x4] sm:$0xf]  ;;  %v247_v14 = vld [vmem:[%s7285_s14 + $0x8] sm:$0x1] }
  0x14   : > { %6500 = vmatpush3.bf16.msra.mxu0 %v7021_v3  ;;  %6309 = vmatprep.subr.bf16.mxu1 %v7022_v4  ;;  %v267_v15 = vshrl.u32 %v199_v12, 16  ;;  %v270_v16 = vshll.u32 %v199_v12, 16  ;;  %v276_v17 = vshll.u32 %v200_v13, 16  ;;  %v280_v18 = vshrl.u32 %v200_v13, 16  ;;  %v5533_v20 = vld [vmem:[%s7285_s14 + $0xc] sm:$0xf] }
  0x15   : > { %6501 = vmatprep.subr.bf16.mxu0 %v7023_v5  ;;  %v286_v19 = vshll.u32 %v247_v14, 16  ;;  %v7298_v23 = vld [vmem:[%s7285_s14 + $0x10] sm:$0xf]  ;;  %v7301_v24 = vld [vmem:[%s7285_s14 + $0x14] sm:$0x1]  ;;  %v2166_v29 = vshrl.u32 %v5533_v20, 16 }
  0x16   : > { %v269_v21 = vrot.slane %v267_v15, 4  ;;  %v272_v22 = vrot.slane %v270_v16, 5  ;;  %v278_v26 = vrot.slane %v276_v17, 5  ;;  %v282_v27 = vrot.slane %v280_v18, 4  ;;  %v201_v35 = vld [vmem:[%s7285_s14 + $0xc] sm:$0xf] }
  0x17   : > { %6310 = vmatpush3.bf16.msra.mxu1 %v7022_v4  ;;  %v288_v28 = vrot.slane %v286_v19, 5  ;;  %v2169_v32 = vshll.u32 %v5533_v20, 16  ;;  %v2175_v33 = vshll.u32 %v7298_v23, 16  ;;  %v2179_v34 = vshrl.u32 %v7298_v23, 16  ;;  %v202_v42 = vld [vmem:[%s7285_s14 + $0x10] sm:$0xf] }
  0x18   : > { %6502 = vmatpush3.bf16.msra.mxu0 %v7023_v5  ;;  %6311 = vmatprep.subr.bf16.mxu1 %v7024_v6  ;;  %v273_v31 = vor.u32 %v272_v22, %v269_v21  ;;  %v283_v38 = vor.u32 %v282_v27, %v278_v26  ;;  %v2168_v39 = vrot.slane %v2166_v29, 4  ;;  %v2185_v40 = vshll.u32 %v7301_v24, 16  ;;  %v248_v55 = vld [vmem:[%s7285_s14 + $0x14] sm:$0x1]  ;;  %v5536_v57 = vld [vmem:[%s7285_s14 + $0x18] sm:$0xf] }
  0x19   : > { %6503 = vmatprep.subr.bf16.mxu0 %v7025_v7  ;;  %v2940_v41 = vrot.slane %v7301_v24, 5  ;;  %v2171_v44 = vrot.slane %v2169_v32, 5  ;;  %v2177_v45 = vrot.slane %v2175_v33, 5  ;;  %v2181_v46 = vrot.slane %v2179_v34, 4  ;;  %v7334_v62 = vld [vmem:[%s7285_s14 + $0x1c] sm:$0xf] }
  0x1a   : > { %v274_v43 = vrot.slane %v273_v31, 4  ;;  %v284_v47 = vrot.slane %v283_v38, 4  ;;  %v2187_v48 = vrot.slane %v2185_v40, 5  ;;  %v291_v49 = vshrl.u32 %v201_v35, 16  ;;  %v7034_v3 = vld [vmem:[%s9128_s1] sm:$0xff]  }
  0x1b   : > { %6312 = vmatpush3.bf16.msra.mxu1 %v7024_v6  ;;  %v294_v50 = vshll.u32 %v201_v35, 16  ;;  %v2172_v53 = vor.u32 %v2171_v44, %v2168_v39  ;;  %v2182_v54 = vor.u32 %v2181_v46, %v2177_v45  ;;  %v300_v56 = vshll.u32 %v202_v42, 16  ;;  %v7342_v4 = vld [vmem:[%s9128_s1 + $0x140] sm:$0xff]   ;;  %v203_v21 = vld [vmem:[%s7285_s14 + $0x18] sm:$0xf]  ;;  %v7037_v46 = vld [vmem:[%s9128_s1 + $0x8] sm:$0xff]  }
  0x1c   : > { %6504 = vmatpush3.bf16.msra.mxu0 %v7025_v7  ;;  %6313 = vmatprep.subr.bf16.mxu1 %v7026_v8  ;;  %v279_v52 = vsel %vm7317_vm2, %v274_v43, %v278_v26  ;;  %v289_v58 = vsel %vm7317_vm2, %v284_v47, %v288_v28  ;;  %v293_v59 = vrot.slane %v291_v49, 4  ;;  %v304_v61 = vshrl.u32 %v202_v42, 16  ;;  %v204_v28 = vld [vmem:[%s7285_s14 + $0x1c] sm:$0xf]  ;;  %v249_v33 = vld [vmem:[%s7285_s14 + $0x20] sm:$0x1] }
  0x1d   : > { %6505 = vmatprep.subr.bf16.mxu0 %v7027_v9  ;;  %v296_v60 = vrot.slane %v294_v50, 5  ;;  %v5357_v63 = vcombine.low %v279_v52, %v289_v58  ;;  %v2173_v0 = vrot.slane %v2172_v53, 4  ;;  %v2183_v1 = vrot.slane %v2182_v54, 4  ;;  %v5539_v39 = vld [vmem:[%s7285_s14 + $0x24] sm:$0xf] }
  0x1e   : > { %v302_v2 = vrot.slane %v300_v56, 5  ;;  %v306_v6 = vrot.slane %v304_v61, 4  ;;  %v310_v7 = vshll.u32 %v248_v55, 16  ;;  %v2193_v12 = vshll.u32 %v5536_v57, 16  ;;  %v205_v52 = vld [vmem:[%s7285_s14 + $0x24] sm:$0xf] }
  0x1f   : > { %6314 = vmatpush3.bf16.msra.mxu1 %v7026_v8  ;;  %v297_v5 = vor.u32 %v296_v60, %v293_v59  ;;  %v7345_v8 = vld [vmem:[%s7285_s14 + $0x20] sm:$0x1]  ;;  %6321 = vmatprep.mubr.bf16.mxu1 %v5357_v63  ;;  %v2199_v19 = vshll.u32 %v7334_v62, 16  ;;  %v2203_v20 = vshrl.u32 %v7334_v62, 16  ;;  %v2944_v27 = vrot.slane %v7334_v62, 5  ;;  %v7036_v63 = vld [vmem:[%s9128_s1 + $0x148] sm:$0xff]  }
  0x20   : > { %6506 = vmatpush3.bf16.msra.mxu0 %v7027_v9  ;;  %6315 = vmatprep.subr.bf16.mxu1 %v7028_v10  ;;  %v2178_v9 = vsel %vm7317_vm2, %v2173_v0, %v2177_v45  ;;  %v307_v15 = vor.u32 %v306_v6, %v302_v2  ;;  %v312_v16 = vrot.slane %v310_v7, 5  ;;  %v2195_v18 = vrot.slane %v2193_v12, 5  ;;  %v7370_v45 = vld [vmem:[%s7285_s14 + $0x28] sm:$0xf] }
  0x21   : > { %6507 = vmatprep.subr.bf16.mxu0 %v7029_v11  ;;  %v298_v14 = vrot.slane %v297_v5, 4  ;;  %v2209_v26 = vshll.u32 %v7345_v8, 16  ;;  %v2205_v31 = vrot.slane %v2203_v20, 4  ;;  %v2947_v32 = vrot.slane %v7345_v8, 5  ;;  %v206_v5 = vld [vmem:[%s7285_s14 + $0x28] sm:$0xf] }
  0x22   : > { %v315_v38 = vshrl.u32 %v203_v21, 16  ;;  %v318_v44 = vshll.u32 %v203_v21, 16  ;;  %v328_v49 = vshrl.u32 %v204_v28, 16  ;;  %v334_v50 = vshll.u32 %v249_v33, 16  ;;  %v7401_v33 = vld [vmem:[%s7285_s14 + $0x34] sm:$0xf] }
  0x23   : > { %6316 = vmatpush3.bf16.msra.mxu1 %v7028_v10  ;;  %v2188_v10 = vsel %vm7317_vm2, %v2183_v1, %v2187_v48  ;;  %v303_v22 = vsel %vm7317_vm2, %v298_v14, %v302_v2  ;;  %v2211_v35 = vrot.slane %v2209_v26, 5  ;;  %v324_v48 = vshll.u32 %v204_v28, 16 }
  0x24   : > { %6508 = vmatpush3.bf16.msra.mxu0 %v7029_v11  ;;  %6317 = vmatprep.subr.bf16.mxu1 %v7030_v25  ;;  %v2190_v11 = vshrl.u32 %v5536_v57, 16  ;;  %v5597_v13 = vcombine.low %v2178_v9, %v2188_v10  ;;  %v317_v47 = vrot.slane %v315_v38, 4  ;;  %v320_v55 = vrot.slane %v318_v44, 5 }
  0x25   : > { %6509 = vmatprep.subr.bf16.mxu0 %v7031_v30  ;;  %v2214_v56 = vshrl.u32 %v5539_v39, 16  ;;  %v326_v57 = vrot.slane %v324_v48, 5  ;;  %v330_v58 = vrot.slane %v328_v49, 4  ;;  %v336_v59 = vrot.slane %v334_v50, 5  ;;  %v7039_v48 = vld [vmem:[%s9128_s1 + $0x158] sm:$0xff]  }
  0x26   : > { %v2192_v17 = vrot.slane %v2190_v11, 4  ;;  %6513 = vmatprep.mubr.bf16.mxu0 %v5597_v13  ;;  %v2217_v60 = vshll.u32 %v5539_v39, 16  ;;  %v321_v0 = vor.u32 %v320_v55, %v317_v47  ;;  %v2223_v2 = vshll.u32 %v7370_v45, 16  ;;  %v250_v11 = vld [vmem:[%s7285_s14 + $0x2c] sm:$0x1] }
  0x27   : > { %6318 = vmatpush3.bf16.msra.mxu1 %v7030_v25  ;;  %v308_v25 = vrot.slane %v307_v15, 4  ;;  %v2216_v1 = vrot.slane %v2214_v56, 4  ;;  %v331_v7 = vor.u32 %v330_v58, %v326_v57  ;;  %v2227_v10 = vshrl.u32 %v7370_v45, 16 }
  0x28   : > { %6510 = vmatpush3.bf16.msra.mxu0 %v7031_v30  ;;  %6319 = vmatprep.subr.bf16.mxu1 %v7032_v36  ;;  %v2196_v29 = vor.u32 %v2195_v18, %v2192_v17  ;;  %v2201_v30 = vrot.slane %v2199_v19, 5  ;;  %v2219_v9 = vrot.slane %v2217_v60, 5  ;;  %v322_v12 = vrot.slane %v321_v0, 4  ;;  %v7046_v60 = vld [vmem:[%s9128_s1 + $0x20] sm:$0xff]  }
  0x29   : > { %6511 = vmatprep.subr.bf16.mxu0 %v7033_v51  ;;  %v313_v34 = vsel %vm7317_vm2, %v308_v25, %v312_v16  ;;  %v2225_v13 = vrot.slane %v2223_v2, 5  ;;  %v339_v15 = vshrl.u32 %v205_v52, 16  ;;  %v5542_v16 = vld [vmem:[%s7285_s14 + $0x30] sm:$0xf]  ;;  %v332_v17 = vrot.slane %v331_v7, 4 }
  0x2a   : > { %v5358_v40 = vcombine.low %v303_v22, %v313_v34  ;;  %v2197_v42 = vrot.slane %v2196_v29, 4  ;;  %v2206_v43 = vor.u32 %v2205_v31, %v2201_v30  ;;  %v2220_v18 = vor.u32 %v2219_v9, %v2216_v1  ;;  %v7043_v34 = vld [vmem:[%s9128_s1 + $0x18] sm:$0xff]  }
  0x2b   : > { %6320 = vmatpush3.bf16.msra.mxu1 %v7032_v36  ;;  %v7366_v36 = vrot.slane %v2944_v27, 4  ;;  %v2229_v19 = vrot.slane %v2227_v10, 4  ;;  %v342_v20 = vshll.u32 %v205_v52, 16  ;;  %v327_v21 = vsel %vm7317_vm2, %v322_v12, %v326_v57  ;;  %v251_v2 = vld [vmem:[%s7285_s14 + $0x38] sm:$0x1] }
  0x2c   : > { %6512 = vmatpush3.bf16.msra.mxu0 %v7033_v51  ;;  %6353 = vmatprep.subr.bf16.mxu1 %v7034_v3  ;;  %v7376_v51 = vld [vmem:[%s7285_s14 + $0x2c] sm:$0x1]  ;;  %v2202_v53 = vsel %vm7317_vm2, %v2197_v42, %v2201_v30  ;;  %v2207_v54 = vrot.slane %v2206_v43, 4  ;;  %v341_v25 = vrot.slane %v339_v15, 4  ;;  %v348_v26 = vshll.u32 %v206_v5, 16 }
  0x2d   : > { %6545 = vmatprep.subr.bf16.mxu0 %v7342_v4  ;;  %v2233_v14 = vshll.u32 %v7376_v51, 16  ;;  %v337_v28 = vsel %vm7317_vm2, %v332_v17, %v336_v59  ;;  %v2221_v29 = vrot.slane %v2220_v18, 4  ;;  %v2230_v30 = vor.u32 %v2229_v19, %v2225_v13  ;;  %v208_v59 = vld [vmem:[%s7285_s14 + $0x34] sm:$0xf]  ;;  %v5545_v9 = vld [vmem:[%s7285_s14 + $0x3c] sm:$0xf] }
  0x2e   : > { %6322 = vmatmul.mubr.bf16.vlgmr.msra.gmra.mrb[0].mxu1 %v5358_v40  ;;  %v2212_v61 = vsel %vm7317_vm2, %v2207_v54, %v2211_v35  ;;  %v344_v31 = vrot.slane %v342_v20, 5  ;;  %v5359_v35 = vcombine.low %v327_v21, %v337_v28  ;;  %v350_v38 = vrot.slane %v348_v26, 5  ;;  %v207_v54 = vld [vmem:[%s7285_s14 + $0x30] sm:$0xf]  ;;  %v7435_v19 = vld [vmem:[%s7285_s14 + $0x40] sm:$0xf] }
  0x2f   : > { %6354 = vmatpush3.bf16.msra.mxu1 %v7034_v3  ;;  %v7040_v3 = vld [vmem:[%s9128_s1 + $0x10] sm:$0xff]   ;;  %v5598_v6 = vcombine.low %v2202_v53, %v2212_v61  ;;  %v2235_v22 = vrot.slane %v2233_v14, 5  ;;  %v352_v39 = vshrl.u32 %v206_v5, 16  ;;  %v358_v40 = vshll.u32 %v250_v11, 16  ;;  %v7048_v14 = vld [vmem:[%s9128_s1 + $0x28] sm:$0xff]   ;;  %v7041_v20 = vld [vmem:[%s9128_s1 + $0x160] sm:$0xff]  }
  0x30   : > { %6355 = vmatprep.subr.bf16.mxu1 %v7037_v46  ;;  %v2226_v42 = vsel %vm7317_vm2, %v2221_v29, %v2225_v13  ;;  %v2231_v43 = vrot.slane %v2230_v30, 4  ;;  %v345_v44 = vor.u32 %v344_v31, %v341_v25  ;;  %v2238_v47 = vshrl.u32 %v5542_v16, 16  ;;  %6325 = vmatprep.mubr.bf16.mxu1 %v5359_v35  ;;  %v7443_v28 = vld [vmem:[%s7285_s14 + $0x44] sm:$0x1]  ;;  %v7050_v35 = vld [vmem:[%s9128_s1 + $0x30] sm:$0xff]  }
  0x31   : > { %6514 = vmatmul.mubr.bf16.vlgmr.msra.gmra.mrb[0].mxu0 %v5598_v6  ;;  %v354_v49 = vrot.slane %v352_v39, 4  ;;  %v360_v50 = vrot.slane %v358_v40, 5  ;;  %v2241_v52 = vshll.u32 %v5542_v16, 16  ;;  %v2247_v53 = vshll.u32 %v7401_v33, 16 }
  0x32   : > { %6546 = vmatpush3.bf16.msra.mxu0 %v7342_v4  ;;  %v7038_v4 = vld [vmem:[%s9128_s1 + $0x150] sm:$0xff]   ;;  %v2236_v55 = vsel %vm7317_vm2, %v2231_v43, %v2235_v22  ;;  %v346_v56 = vrot.slane %v345_v44, 4  ;;  %v2240_v57 = vrot.slane %v2238_v47, 4  ;;  %v2251_v58 = vshrl.u32 %v7401_v33, 16 }
  0x33   : > { %6356 = vmatpush3.bf16.msra.mxu1 %v7037_v46  ;;  %6547 = vmatprep.subr.bf16.mxu0 %v7036_v63  ;;  %v7412_v46 = vld [vmem:[%s7285_s14 + $0x38] sm:$0x1]  ;;  %v5599_v61 = vcombine.low %v2226_v42, %v2236_v55  ;;  %v2243_v0 = vrot.slane %v2241_v52, 5  ;;  %v2249_v1 = vrot.slane %v2247_v53, 5  ;;  %v363_v7 = vshrl.u32 %v207_v54, 16 }
  0x34   : > { %6357 = vmatprep.subr.bf16.mxu1 %v7040_v3  ;;  %v351_v5 = vsel %vm7317_vm2, %v346_v56, %v350_v38  ;;  %v2257_v6 = vshll.u32 %v7412_v46, 16  ;;  %v366_v12 = vshll.u32 %v207_v54, 16  ;;  %v372_v13 = vshll.u32 %v208_v59, 16  ;;  %v210_v55 = vld [vmem:[%s7285_s14 + $0x40] sm:$0xf] }
  0x35   : > { %6517 = vmatprep.mubr.bf16.mxu0 %v5599_v61  ;;  %v2244_v11 = vor.u32 %v2243_v0, %v2240_v57  ;;  %v365_v17 = vrot.slane %v363_v7, 4  ;;  %v376_v18 = vshrl.u32 %v208_v59, 16  ;;  %v2262_v40 = vshrl.u32 %v5545_v9, 16 }
  0x36   : > { %6548 = vmatpush3.bf16.msra.mxu0 %v7036_v63  ;;  %v355_v63 = vor.u32 %v354_v49, %v350_v38  ;;  %v2259_v16 = vrot.slane %v2257_v6, 5  ;;  %v368_v25 = vrot.slane %v366_v12, 5  ;;  %v374_v26 = vrot.slane %v372_v13, 5 }
  0x37   : > { %6358 = vmatpush3.bf16.msra.mxu1 %v7040_v3  ;;  %6549 = vmatprep.subr.bf16.mxu0 %v7038_v4  ;;  %v2253_v3 = vrot.slane %v2251_v58, 4  ;;  %v2245_v22 = vrot.slane %v2244_v11, 4  ;;  %v378_v31 = vrot.slane %v376_v18, 4  ;;  %v2265_v42 = vshll.u32 %v5545_v9, 16  ;;  %v5548_v9 = vld [vmem:[%s7285_s14 + $0x48] sm:$0xf] }
  0x38   : > { %6359 = vmatprep.subr.bf16.mxu1 %v7043_v34  ;;  %v356_v10 = vrot.slane %v355_v63, 4  ;;  %v369_v39 = vor.u32 %v368_v25, %v365_v17  ;;  %v2271_v49 = vshll.u32 %v7435_v19, 16  ;;  %v2264_v53 = vrot.slane %v2262_v40, 4  ;;  %v252_v63 = vld [vmem:[%s7285_s14 + $0x44] sm:$0x1] }
  0x39   : > { %v2254_v15 = vor.u32 %v2253_v3, %v2249_v1  ;;  %v2250_v38 = vsel %vm7317_vm2, %v2245_v22, %v2249_v1  ;;  %v379_v44 = vor.u32 %v378_v31, %v374_v26  ;;  %v2267_v54 = vrot.slane %v2265_v42, 5  ;;  %v7476_v22 = vld [vmem:[%s7285_s14 + $0x50] sm:$0x1]  ;;  %v7045_v31 = vld [vmem:[%s9128_s1 + $0x178] sm:$0xff]  }
  0x3a   : > { %6550 = vmatpush3.bf16.msra.mxu0 %v7038_v4  ;;  %v361_v21 = vsel %vm7317_vm2, %v356_v10, %v360_v50  ;;  %v382_v4 = vshll.u32 %v251_v2, 16  ;;  %v370_v52 = vrot.slane %v369_v39, 4  ;;  %v2273_v57 = vrot.slane %v2271_v49, 5  ;;  %v7052_v2 = vld [vmem:[%s9128_s1 + $0x38] sm:$0xff]  }
  0x3b   : > { %6360 = vmatpush3.bf16.msra.mxu1 %v7043_v34  ;;  %6551 = vmatprep.subr.bf16.mxu0 %v7039_v48  ;;  %v5360_v29 = vcombine.low %v351_v5, %v361_v21  ;;  %v2255_v30 = vrot.slane %v2254_v15, 4  ;;  %v209_v34 = vld [vmem:[%s7285_s14 + $0x3c] sm:$0xf]  ;;  %v380_v56 = vrot.slane %v379_v44, 4  ;;  %v2275_v58 = vshrl.u32 %v7435_v19, 16  ;;  %v7044_v15 = vld [vmem:[%s9128_s1 + $0x170] sm:$0xff]  }
  0x3c   : > { %6361 = vmatprep.subr.bf16.mxu1 %v7046_v60  ;;  %v384_v47 = vrot.slane %v382_v4, 5  ;;  %v2281_v59 = vshll.u32 %v7443_v28, 16  ;;  %v2268_v61 = vor.u32 %v2267_v54, %v2264_v53  ;;  %v387_v0 = vshrl.u32 %v209_v34, 16  ;;  %v7487_v4 = vld [vmem:[%s9128_s1 + $0x80] sm:$0xff]   ;;  %v212_v53 = vld [vmem:[%s7285_s14 + $0x4c] sm:$0xf] }
  0x3d   : > { %6326 = vmatmul.mubr.bf16.gmra.mrb[4].mxu1 %v5360_v29  ;;  %v2260_v43 = vsel %vm7317_vm2, %v2255_v30, %v2259_v16  ;;  %v390_v1 = vshll.u32 %v209_v34, 16  ;;  %v2277_v3 = vrot.slane %v2275_v58, 4  ;;  %v396_v7 = vshll.u32 %v210_v55, 16  ;;  %v211_v30 = vld [vmem:[%s7285_s14 + $0x48] sm:$0xf] }
  0x3e   : > { %6552 = vmatpush3.bf16.msra.mxu0 %v7039_v48  ;;  %v5600_v50 = vcombine.low %v2250_v38, %v2260_v43  ;;  %v7042_v48 = vld [vmem:[%s9128_s1 + $0x168] sm:$0xff]   ;;  %v385_v5 = vsel %vm7317_vm2, %v380_v56, %v384_v47  ;;  %v2283_v6 = vrot.slane %v2281_v59, 5  ;;  %v2269_v11 = vrot.slane %v2268_v61, 4  ;;  %v253_v54 = vld [vmem:[%s7285_s14 + $0x50] sm:$0x1] }
  0x3f   : > { %6362 = vmatpush3.bf16.msra.mxu1 %v7046_v60  ;;  %6553 = vmatprep.subr.bf16.mxu0 %v7041_v20  ;;  %v375_v60 = vsel %vm7317_vm2, %v370_v52, %v374_v26  ;;  %v389_v12 = vrot.slane %v387_v0, 4  ;;  %v392_v13 = vrot.slane %v390_v1, 5  ;;  %v2278_v16 = vor.u32 %v2277_v3, %v2273_v57  ;;  %v5551_v58 = vld [vmem:[%s7285_s14 + $0x54] sm:$0xf]  ;;  %v7501_v0 = vld [vmem:[%s7285_s14 + $0x58] sm:$0xf] }
  0x40   : > { %6363 = vmatprep.subr.bf16.mxu1 %v7048_v14  ;;  %6518 = vmatmul.mubr.bf16.gmra.mrb[4].mxu0 %v5600_v50  ;;  %v5361_v10 = vcombine.low %v375_v60, %v385_v5  ;;  %v398_v17 = vrot.slane %v396_v7, 5  ;;  %v400_v18 = vshrl.u32 %v210_v55, 16  ;;  %v406_v21 = vshll.u32 %v252_v63, 16 }
  0x41   : > { %v393_v25 = vor.u32 %v392_v13, %v389_v12  ;;  %v2286_v26 = vshrl.u32 %v5548_v9, 16  ;;  %v2289_v29 = vshll.u32 %v5548_v9, 16  ;;  %v2279_v34 = vrot.slane %v2278_v16, 4 }
  0x42   : > { %6554 = vmatpush3.bf16.msra.mxu0 %v7041_v20  ;;  %6329 = vmatprep.mubr.bf16.mxu1 %v5361_v10  ;;  %v2274_v20 = vsel %vm7317_vm2, %v2269_v11, %v2273_v57  ;;  %v408_v38 = vrot.slane %v406_v21, 5  ;;  %v2305_v52 = vshll.u32 %v7476_v22, 16  ;;  %v411_v61 = vshrl.u32 %v211_v30, 16 }
  0x43   : > { %6364 = vmatpush3.bf16.msra.mxu1 %v7048_v14  ;;  %v7470_v14 = vld [vmem:[%s7285_s14 + $0x4c] sm:$0xf]  ;;  %6555 = vmatprep.subr.bf16.mxu0 %v7042_v48  ;;  %v394_v40 = vrot.slane %v393_v25, 4  ;;  %v2288_v42 = vrot.slane %v2286_v26, 4  ;;  %v2291_v43 = vrot.slane %v2289_v29, 5  ;;  %v2284_v47 = vsel %vm7317_vm2, %v2279_v34, %v2283_v6  ;;  %v7506_v6 = vld [vmem:[%s9128_s1 + $0x180] sm:$0xff]  }
  0x44   : > { %6365 = vmatprep.subr.bf16.mxu1 %v7050_v35  ;;  %v2295_v39 = vshll.u32 %v7470_v14, 16  ;;  %v2299_v44 = vshrl.u32 %v7470_v14, 16  ;;  %v5601_v55 = vcombine.low %v2274_v20, %v2284_v47  ;;  %v2307_v60 = vrot.slane %v2305_v52, 5  ;;  %v7513_v20 = vld [vmem:[%s7285_s14 + $0x5c] sm:$0x1] }
  0x45   : > { %v2292_v56 = vor.u32 %v2291_v43, %v2288_v42  ;;  %v414_v63 = vshll.u32 %v211_v30, 16  ;;  %v424_v3 = vshrl.u32 %v212_v53, 16  ;;  %v413_v9 = vrot.slane %v411_v61, 4  ;;  %v214_v43 = vld [vmem:[%s7285_s14 + $0x58] sm:$0xf] }
  0x46   : > { %6556 = vmatpush3.bf16.msra.mxu0 %v7042_v48  ;;  %v2297_v50 = vrot.slane %v2295_v39, 5  ;;  %v399_v48 = vsel %vm7317_vm2, %v394_v40, %v398_v17  ;;  %v2301_v57 = vrot.slane %v2299_v44, 4  ;;  %6521 = vmatprep.mubr.bf16.mxu0 %v5601_v55  ;;  %v430_v11 = vshll.u32 %v253_v54, 16  ;;  %v5554_v52 = vld [vmem:[%s7285_s14 + $0x60] sm:$0xf] }
  0x47   : > { %6366 = vmatpush3.bf16.msra.mxu1 %v7050_v35  ;;  %v402_v35 = vrot.slane %v400_v18, 4  ;;  %6557 = vmatprep.subr.bf16.mxu0 %v7044_v15  ;;  %v2293_v1 = vrot.slane %v2292_v56, 4  ;;  %v416_v10 = vrot.slane %v414_v63, 5  ;;  %v426_v18 = vrot.slane %v424_v3, 4 }
  0x48   : > { %6367 = vmatprep.subr.bf16.mxu1 %v7052_v2  ;;  %v2302_v5 = vor.u32 %v2301_v57, %v2297_v50  ;;  %v432_v21 = vrot.slane %v430_v11, 5  ;;  %v2310_v25 = vshrl.u32 %v5551_v58, 16  ;;  %v2313_v29 = vshll.u32 %v5551_v58, 16 }
  0x49   : > { %v403_v49 = vor.u32 %v402_v35, %v398_v17  ;;  %v2298_v13 = vsel %vm7317_vm2, %v2293_v1, %v2297_v50  ;;  %v417_v17 = vor.u32 %v416_v10, %v413_v9  ;;  %v2319_v30 = vshll.u32 %v7501_v0, 16  ;;  %v213_v35 = vld [vmem:[%s7285_s14 + $0x54] sm:$0xf]  ;;  %v254_v50 = vld [vmem:[%s7285_s14 + $0x5c] sm:$0x1] }
  0x4a   : > { %6558 = vmatpush3.bf16.msra.mxu0 %v7044_v15  ;;  %v2303_v15 = vrot.slane %v2302_v5, 4  ;;  %v2323_v34 = vshrl.u32 %v7501_v0, 16  ;;  %v2312_v42 = vrot.slane %v2310_v25, 4  ;;  %v435_v55 = vshrl.u32 %v213_v35, 16  ;;  %v7541_v25 = vld [vmem:[%s7285_s14 + $0x60] sm:$0xf] }
  0x4b   : > { %6368 = vmatpush3.bf16.msra.mxu1 %v7052_v2  ;;  %v404_v59 = vrot.slane %v403_v49, 4  ;;  %v420_v2 = vshll.u32 %v212_v53, 16  ;;  %6559 = vmatprep.subr.bf16.mxu0 %v7045_v31  ;;  %v418_v39 = vrot.slane %v417_v17, 4  ;;  %v2321_v44 = vrot.slane %v2319_v30, 5  ;;  %v7537_v17 = vld [vmem:[%s7285_s14 + $0x68] sm:$0x1] }
  0x4c   : > { %6401 = vmatprep.subr.bf16.mxu1 %v7487_v4  ;;  %v2308_v26 = vsel %vm7317_vm2, %v2303_v15, %v2307_v60  ;;  %v2325_v47 = vrot.slane %v2323_v34, 4  ;;  %v2329_v49 = vshll.u32 %v7513_v20, 16  ;;  %v7528_v60 = vld [vmem:[%s7285_s14 + $0x64] sm:$0xf]  ;;  %v437_v63 = vrot.slane %v435_v55, 4 }
  0x4d   : > { %v409_v7 = vsel %vm7317_vm2, %v404_v59, %v408_v38  ;;  %v422_v16 = vrot.slane %v420_v2, 5  ;;  %v5602_v38 = vcombine.low %v2298_v13, %v2308_v26  ;;  %v444_v59 = vshll.u32 %v214_v43, 16 }
  0x4e   : > { %v5362_v12 = vcombine.low %v399_v48, %v409_v7  ;;  %6560 = vmatpush3.bf16.msra.mxu0 %v7045_v31  ;;  %v2315_v31 = vrot.slane %v2313_v29, 5  ;;  %v438_v48 = vshll.u32 %v213_v35, 16  ;;  %v2326_v57 = vor.u32 %v2325_v47, %v2321_v44  ;;  %v7544_v35 = vld [vmem:[%s7285_s14 + $0x64] sm:$0xf] }
  0x4f   : > { %6593 = vmatprep.subr.bf16.mxu0 %v7506_v6  ;;  %v427_v40 = vor.u32 %v426_v18, %v422_v16  ;;  %6522 = vmatmul.mubr.bf16.gmra.mrb[8].mxu0 %v5602_v38  ;;  %v423_v53 = vsel %vm7317_vm2, %v418_v39, %v422_v16  ;;  %v2331_v58 = vrot.slane %v2329_v49, 5  ;;  %v448_v5 = vshrl.u32 %v214_v43, 16  ;;  %v255_v43 = vld [vmem:[%s7285_s14 + $0x68] sm:$0x1] }
  0x50   : > { %6330 = vmatmul.mubr.bf16.gmra.mrb[8].mxu1 %v5362_v12  ;;  %v2316_v56 = vor.u32 %v2315_v31, %v2312_v42  ;;  %v440_v1 = vrot.slane %v438_v48, 5  ;;  %v2327_v7 = vrot.slane %v2326_v57, 4  ;;  %v446_v9 = vrot.slane %v444_v59, 5 }
  0x51   : > { %v428_v54 = vrot.slane %v427_v40, 4  ;;  %v450_v11 = vrot.slane %v448_v5, 4  ;;  %v454_v12 = vshll.u32 %v254_v50, 16  ;;  %v2334_v13 = vshrl.u32 %v5554_v52, 16  ;;  %v5621_v50 = vld [vmem:[%s7285_s14 + $0xc] sm:$0xe] }
  0x52   : > { %v2317_v3 = vrot.slane %v2316_v56, 4  ;;  %v441_v10 = vor.u32 %v440_v1, %v437_v63  ;;  %v2332_v16 = vsel %vm7317_vm2, %v2327_v7, %v2331_v58  ;;  %v2337_v18 = vshll.u32 %v5554_v52, 16  ;;  %v7559_v5 = vld [vmem:[%s7285_s14 + $0x6c] sm:$0xf] }
  0x53   : > { %v433_v61 = vsel %vm7317_vm2, %v428_v54, %v432_v21  ;;  %v2343_v21 = vshll.u32 %v7528_v60, 16  ;;  %v451_v30 = vor.u32 %v450_v11, %v446_v9  ;;  %v456_v34 = vrot.slane %v454_v12, 5 }
  0x54   : > { %v5363_v2 = vcombine.low %v423_v53, %v433_v61  ;;  %v2322_v15 = vsel %vm7317_vm2, %v2317_v3, %v2321_v44  ;;  %v442_v29 = vrot.slane %v441_v10, 4  ;;  %v2336_v38 = vrot.slane %v2334_v13, 4 }
  0x55   : > { %v5603_v26 = vcombine.low %v2322_v15, %v2332_v16  ;;  %v2339_v39 = vrot.slane %v2337_v18, 5  ;;  %v2345_v40 = vrot.slane %v2343_v21, 5  ;;  %v2347_v42 = vshrl.u32 %v7528_v60, 16  ;;  %v7571_v21 = vld [vmem:[%s7285_s14 + $0x70] sm:$0xf] }
  0x56   : > { %6333 = vmatprep.mubr.bf16.mxu1 %v5363_v2  ;;  %v447_v31 = vsel %vm7317_vm2, %v442_v29, %v446_v9  ;;  %v452_v44 = vrot.slane %v451_v30, 4  ;;  %v2353_v47 = vshll.u32 %v7537_v17, 16  ;;  %v459_v49 = vshrl.u32 %v7541_v25, 16  ;;  %v7136_v9 = vld [vmem:[%s7285_s14 + $0xb4] sm:$0xff]  }
  0x57   : > { %6525 = vmatprep.mubr.bf16.mxu0 %v5603_v26  ;;  %v2340_v52 = vor.u32 %v2339_v39, %v2336_v38  ;;  %v2349_v53 = vrot.slane %v2347_v42, 4  ;;  %v462_v54 = vshll.u32 %v7541_v25, 16  ;;  %v468_v55 = vshll.u32 %v7544_v35, 16 }
  0x58   : > { %v457_v48 = vsel %vm7317_vm2, %v452_v44, %v456_v34  ;;  %v2355_v56 = vrot.slane %v2353_v47, 5  ;;  %v461_v57 = vrot.slane %v459_v49, 4  ;;  %v472_v58 = vshrl.u32 %v7544_v35, 16  ;;  %v7582_v47 = vld [vmem:[%s7285_s14 + $0x78] sm:$0xf] }
  0x59   : > { %v5364_v59 = vcombine.low %v447_v31, %v457_v48  ;;  %v2341_v61 = vrot.slane %v2340_v52, 4  ;;  %v2350_v63 = vor.u32 %v2349_v53, %v2345_v40  ;;  %v464_v1 = vrot.slane %v462_v54, 5  ;;  %v7593_v54 = vld [vmem:[%s7285_s14 + $0x7c] sm:$0xf] }
  0x5a   : > { %v470_v2 = vrot.slane %v468_v55, 5  ;;  %v474_v3 = vrot.slane %v472_v58, 4  ;;  %v478_v7 = vshll.u32 %v255_v43, 16  ;;  %v5637_v10 = vrot.slane %v5621_v50, 9  ;;  %v257_v58 = vld [vmem:[%s7285_s14 + $0x80] sm:$0x1] }
  0x5b   : > { %6334 = vmatmul.mubr.bf16.gmra.mrb[12].mxu1 %v5364_v59  ;;  %v2346_v11 = vsel %vm7317_vm2, %v2341_v61, %v2345_v40  ;;  %v2351_v12 = vrot.slane %v2350_v63, 4  ;;  %v465_v13 = vor.u32 %v464_v1, %v461_v57  ;;  %v2937_v15 = vrot.slane %v7298_v23, 5  ;;  %v256_v40 = vld [vmem:[%s7285_s14 + $0x74] sm:$0x1]  ;;  %v5622_v23 = vld [vmem:[%s7285_s14 + $0x18] sm:$0xe] }
  0x5c   : > { %v475_v16 = vor.u32 %v474_v3, %v470_v2  ;;  %v480_v18 = vrot.slane %v478_v7, 5  ;;  %v483_v26 = vshrl.u32 %v7559_v5, 16  ;;  %v486_v29 = vshll.u32 %v7559_v5, 16 }
  0x5d   : > { %v2356_v30 = vsel %vm7317_vm2, %v2351_v12, %v2355_v56  ;;  %v466_v34 = vrot.slane %v465_v13, 4  ;;  %v2938_v38 = vsel %vm7563_vm5, %v5637_v10, %v2937_v15  ;;  %v2939_v39 = vrot.slane %v2937_v15, 4  ;;  %v5623_v13 = vld [vmem:[%s7285_s14 + $0x24] sm:$0xe] }
  0x5e   : > { %v5604_v42 = vcombine.low %v2346_v11, %v2356_v30  ;;  %v476_v43 = vrot.slane %v475_v16, 4  ;;  %v485_v31 = vrot.slane %v483_v26, 4  ;;  %v488_v44 = vrot.slane %v486_v29, 5  ;;  %v7615_v16 = vld [vmem:[%s7285_s14 + $0x84] sm:$0xf]  ;;  %v7049_v29 = vld [vmem:[%s9128_s1 + $0x188] sm:$0xff]  }
  0x5f   : > { %v471_v49 = vsel %vm7317_vm2, %v466_v34, %v470_v2  ;;  %v2941_v50 = vsel %vm7563_vm5, %v2939_v39, %v2940_v41  ;;  %v492_v52 = vshll.u32 %v7571_v21, 16  ;;  %v496_v53 = vshrl.u32 %v7571_v21, 16 }
  0x60   : > { %6526 = vmatmul.mubr.bf16.gmra.mrb[12].mxu0 %v5604_v42  ;;  %v481_v55 = vsel %vm7317_vm2, %v476_v43, %v480_v18  ;;  %v5669_v48 = vcombine.low %v2938_v38, %v2941_v50  ;;  %v489_v56 = vor.u32 %v488_v44, %v485_v31  ;;  %v502_v57 = vshll.u32 %v256_v40, 16  ;;  %v7623_v40 = vld [vmem:[%s7285_s14 + $0x88] sm:$0xf]  ;;  %v258_v31 = vld [vmem:[%s7285_s14 + $0x8c] sm:$0x1] }
  0x61   : > { %v5365_v59 = vcombine.low %v471_v49, %v481_v55  ;;  %v494_v24 = vrot.slane %v492_v52, 5  ;;  %v498_v61 = vrot.slane %v496_v53, 4  ;;  %v5638_v63 = vrot.slane %v5622_v23, 9 }
  0x62   : > { %6561 = vmatprep.mubr.bf16.mxu0 %v5669_v48  ;;  %v490_v41 = vrot.slane %v489_v56, 4  ;;  %v504_v1 = vrot.slane %v502_v57, 5  ;;  %v2948_v2 = vsel %vm7563_vm5, %v7366_v36, %v2947_v32  ;;  %v507_v3 = vshrl.u32 %v7582_v47, 16 }
  0x63   : > { %6337 = vmatprep.mubr.bf16.mxu1 %v5365_v59  ;;  %v499_v7 = vor.u32 %v498_v61, %v494_v24  ;;  %v2945_v10 = vsel %vm7563_vm5, %v5638_v63, %v2944_v27  ;;  %v510_v11 = vshll.u32 %v7582_v47, 16  ;;  %v516_v12 = vshll.u32 %v7593_v54, 16 }
  0x64   : > { %v495_v8 = vsel %vm7317_vm2, %v490_v41, %v494_v24  ;;  %v5670_v15 = vcombine.low %v2945_v10, %v2948_v2  ;;  %v509_v32 = vrot.slane %v507_v3, 4  ;;  %v520_v36 = vshrl.u32 %v7593_v54, 16  ;;  %v7644_v2 = vld [vmem:[%s7285_s14 + $0x90] sm:$0xf]  ;;  %v7647_v3 = vld [vmem:[%s7285_s14 + $0x94] sm:$0xf] }
  0x65   : > { %v500_v62 = vrot.slane %v499_v7, 4  ;;  %v512_v18 = vrot.slane %v510_v11, 5  ;;  %v518_v26 = vrot.slane %v516_v12, 5  ;;  %v526_v27 = vshll.u32 %v257_v58, 16 }
  0x66   : > { %v522_v30 = vrot.slane %v520_v36, 4  ;;  %v5639_v34 = vrot.slane %v5623_v13, 9  ;;  %v2951_v38 = vrot.slane %v7370_v45, 5  ;;  %v2954_v39 = vrot.slane %v7376_v51, 5  ;;  %v5624_v45 = vld [vmem:[%s7285_s14 + $0x30] sm:$0xe] }
  0x67   : > { %v505_v23 = vsel %vm7317_vm2, %v500_v62, %v504_v1  ;;  %v513_v42 = vor.u32 %v512_v18, %v509_v32  ;;  %v528_v43 = vrot.slane %v526_v27, 5  ;;  %v531_v44 = vshrl.u32 %v7615_v16, 16  ;;  %v259_v62 = vld [vmem:[%s7285_s14 + $0x98] sm:$0x1] }
  0x68   : > { %v5366_v49 = vcombine.low %v495_v8, %v505_v23  ;;  %6562 = vmatmul.mubr.bf16.vlgmr.msra.gmra.mrb[0].mxu0 %v5670_v15  ;;  %v523_v50 = vor.u32 %v522_v30, %v518_v26  ;;  %v2952_v52 = vsel %vm7563_vm5, %v5639_v34, %v2951_v38  ;;  %v2953_v53 = vrot.slane %v2951_v38, 4  ;;  %v7053_v30 = vld [vmem:[%s9128_s1 + $0x198] sm:$0xff]  }
  0x69   : > { %6594 = vmatpush3.bf16.msra.mxu0 %v7506_v6  ;;  %v514_v51 = vrot.slane %v513_v42, 4  ;;  %v533_v55 = vrot.slane %v531_v44, 4  ;;  %v534_v48 = vshll.u32 %v7615_v16, 16  ;;  %v540_v56 = vshll.u32 %v7623_v40, 16  ;;  %v7051_v6 = vld [vmem:[%s9128_s1 + $0x190] sm:$0xff]  }
  0x6a   : > { %6338 = vmatmul.mubr.bf16.gmra.mrb[16].mxu1 %v5366_v49  ;;  %v524_v57 = vrot.slane %v523_v50, 4  ;;  %v2955_v58 = vsel %vm7563_vm5, %v2953_v53, %v2954_v39  ;;  %v544_v59 = vshrl.u32 %v7623_v40, 16  ;;  %v550_v24 = vshll.u32 %v258_v31, 16  ;;  %6595 = vmatprep.subr.bf16.mxu0 %v7049_v29  ;;  %v5625_v38 = vld [vmem:[%s7285_s14 + $0x3c] sm:$0xe] }
  0x6b   : > { %v519_v61 = vsel %vm7317_vm2, %v514_v51, %v518_v26  ;;  %v5671_v63 = vcombine.low %v2952_v52, %v2955_v58  ;;  %v536_v41 = vrot.slane %v534_v48, 5  ;;  %v542_v1 = vrot.slane %v540_v56, 5  ;;  %v7665_v31 = vld [vmem:[%s7285_s14 + $0x9c] sm:$0xf]  ;;  %v7674_v48 = vld [vmem:[%s7285_s14 + $0xa0] sm:$0xf] }
  0x6c   : > { %v529_v7 = vsel %vm7317_vm2, %v524_v57, %v528_v43  ;;  %v546_v10 = vrot.slane %v544_v59, 4  ;;  %v552_v11 = vrot.slane %v550_v24, 5  ;;  %v5640_v12 = vrot.slane %v5624_v45, 9  ;;  %v7057_v56 = vld [vmem:[%s9128_s1 + $0x1a0] sm:$0xff]  }
  0x6d   : > { %v5367_v13 = vcombine.low %v519_v61, %v529_v7  ;;  %6565 = vmatprep.mubr.bf16.mxu0 %v5671_v63  ;;  %v537_v8 = vor.u32 %v536_v41, %v533_v55  ;;  %v2958_v15 = vrot.slane %v7401_v33, 5  ;;  %v2961_v32 = vrot.slane %v7412_v46, 5  ;;  %6596 = vmatpush3.bf16.msra.mxu0 %v7049_v29  ;;  %v260_v61 = vld [vmem:[%s7285_s14 + $0xa4] sm:$0x1] }
  0x6e   : > { %v547_v36 = vor.u32 %v546_v10, %v542_v1  ;;  %v555_v18 = vshrl.u32 %v7644_v2, 16  ;;  %v558_v26 = vshll.u32 %v7644_v2, 16  ;;  %v564_v27 = vshll.u32 %v7647_v3, 16  ;;  %6597 = vmatprep.subr.bf16.mxu0 %v7051_v6 }
  0x6f   : > { %6341 = vmatprep.mubr.bf16.mxu1 %v5367_v13  ;;  %v538_v34 = vrot.slane %v537_v8, 4  ;;  %v2959_v33 = vsel %vm7563_vm5, %v5640_v12, %v2958_v15  ;;  %v2960_v46 = vrot.slane %v2958_v15, 4  ;;  %v568_v29 = vshrl.u32 %v7647_v3, 16  ;;  %v5626_v15 = vld [vmem:[%s7285_s14 + $0x48] sm:$0xe] }
  0x70   : > { %v548_v39 = vrot.slane %v547_v36, 4  ;;  %v557_v23 = vrot.slane %v555_v18, 4  ;;  %v560_v42 = vrot.slane %v558_v26, 5  ;;  %v566_v43 = vrot.slane %v564_v27, 5  ;;  %v7699_v27 = vld [vmem:[%s7285_s14 + $0xa8] sm:$0xf] }
  0x71   : > { %v543_v44 = vsel %vm7317_vm2, %v538_v34, %v542_v1  ;;  %v2962_v49 = vsel %vm7563_vm5, %v2960_v46, %v2961_v32  ;;  %v570_v50 = vrot.slane %v568_v29, 4  ;;  %v574_v52 = vshll.u32 %v259_v62, 16  ;;  %6598 = vmatpush3.bf16.msra.mxu0 %v7051_v6  ;;  %v7061_v32 = vld [vmem:[%s9128_s1 + $0x1a8] sm:$0xff]  }
  0x72   : > { %v553_v53 = vsel %vm7317_vm2, %v548_v39, %v552_v11  ;;  %v5672_v45 = vcombine.low %v2959_v33, %v2962_v49  ;;  %v561_v51 = vor.u32 %v560_v42, %v557_v23  ;;  %v5641_v55 = vrot.slane %v5625_v38, 9  ;;  %6599 = vmatprep.subr.bf16.mxu0 %v7053_v30  ;;  %v7702_v29 = vld [vmem:[%s7285_s14 + $0xac] sm:$0xf] }
  0x73   : > { %v5368_v57 = vcombine.low %v543_v44, %v553_v53  ;;  %v571_v58 = vor.u32 %v570_v50, %v566_v43  ;;  %v576_v59 = vrot.slane %v574_v52, 5  ;;  %v2965_v24 = vrot.slane %v7435_v19, 5  ;;  %v5627_v53 = vld [vmem:[%s7285_s14 + $0x54] sm:$0xe] }
  0x74   : > { %6566 = vmatmul.mubr.bf16.gmra.mrb[4].mxu0 %v5672_v45  ;;  %v562_v6 = vrot.slane %v561_v51, 4  ;;  %v2968_v63 = vrot.slane %v7443_v28, 5  ;;  %v579_v41 = vshrl.u32 %v7665_v31, 16  ;;  %v582_v1 = vshll.u32 %v7665_v31, 16  ;;  %v7065_v45 = vld [vmem:[%s9128_s1 + $0x1b0] sm:$0xff]  }
  0x75   : > { %6342 = vmatmul.mubr.bf16.gmra.mrb[20].mxu1 %v5368_v57  ;;  %v572_v7 = vrot.slane %v571_v58, 4  ;;  %v2966_v10 = vsel %vm7563_vm5, %v5641_v55, %v2965_v24  ;;  %v2967_v11 = vrot.slane %v2965_v24, 4  ;;  %v588_v12 = vshll.u32 %v7674_v48, 16  ;;  %6600 = vmatpush3.bf16.msra.mxu0 %v7053_v30 }
  0x76   : > { %v567_v19 = vsel %vm7317_vm2, %v562_v6, %v566_v43  ;;  %v581_v13 = vrot.slane %v579_v41, 4  ;;  %v584_v28 = vrot.slane %v582_v1, 5  ;;  %v592_v8 = vshrl.u32 %v7674_v48, 16  ;;  %6601 = vmatprep.subr.bf16.mxu0 %v7057_v56  ;;  %v261_v43 = vld [vmem:[%s7285_s14 + $0xb0] sm:$0x1] }
  0x77   : > { %v577_v36 = vsel %vm7317_vm2, %v572_v7, %v576_v59  ;;  %v2969_v62 = vsel %vm7563_vm5, %v2967_v11, %v2968_v63  ;;  %v590_v18 = vrot.slane %v588_v12, 5  ;;  %v598_v26 = vshll.u32 %v260_v61, 16  ;;  %v7722_v41 = vld [vmem:[%s7285_s14 + $0xb4] sm:$0xf]  ;;  %v7727_v12 = vld [vmem:[%s7285_s14 + $0xb8] sm:$0xf] }
  0x78   : > { %v5369_v30 = vcombine.low %v567_v19, %v577_v36  ;;  %v5673_v34 = vcombine.low %v2966_v10, %v2969_v62  ;;  %v585_v33 = vor.u32 %v584_v28, %v581_v13  ;;  %v594_v46 = vrot.slane %v592_v8, 4  ;;  %v262_v19 = vld [vmem:[%s7285_s14 + $0xbc] sm:$0x1] }
  0x79   : > { %v600_v38 = vrot.slane %v598_v26, 5  ;;  %v5642_v39 = vrot.slane %v5626_v15, 9  ;;  %v2972_v23 = vrot.slane %v7470_v14, 5  ;;  %v2975_v42 = vrot.slane %v7476_v22, 5  ;;  %6602 = vmatpush3.bf16.msra.mxu0 %v7057_v56  ;;  %v7069_v13 = vld [vmem:[%s9128_s1 + $0x1b8] sm:$0xff]  }
  0x7a   : > { %6345 = vmatprep.mubr.bf16.mxu1 %v5369_v30  ;;  %6569 = vmatprep.mubr.bf16.mxu0 %v5673_v34  ;;  %v586_v44 = vrot.slane %v585_v33, 4  ;;  %v595_v49 = vor.u32 %v594_v46, %v590_v18  ;;  %v603_v50 = vshrl.u32 %v7699_v27, 16  ;;  %v606_v52 = vshll.u32 %v7699_v27, 16  ;;  %v5628_v30 = vld [vmem:[%s7285_s14 + $0x60] sm:$0xe] }
  0x7b   : > { %v2973_v14 = vsel %vm7563_vm5, %v5642_v39, %v2972_v23  ;;  %v2974_v22 = vrot.slane %v2972_v23, 4  ;;  %v612_v51 = vshll.u32 %v7702_v29, 16  ;;  %v616_v55 = vshrl.u32 %v7702_v29, 16  ;;  %6603 = vmatprep.subr.bf16.mxu0 %v7061_v32  ;;  %v5558_v39 = vld [vmem:[%s7285_s14 + $0x70] sm:$0xf] }
  0x7c   : > { %v591_v56 = vsel %vm7317_vm2, %v586_v44, %v590_v18  ;;  %v596_v57 = vrot.slane %v595_v49, 4  ;;  %v605_v58 = vrot.slane %v603_v50, 4  ;;  %v608_v59 = vrot.slane %v606_v52, 5  ;;  %v7749_v44 = vld [vmem:[%s9128_s1 + $0x1c0] sm:$0xff]  }
  0x7d   : > { %v2976_v24 = vsel %vm7563_vm5, %v2974_v22, %v2975_v42  ;;  %v614_v61 = vrot.slane %v612_v51, 5  ;;  %v618_v6 = vrot.slane %v616_v55, 4  ;;  %v622_v63 = vshll.u32 %v261_v43, 16  ;;  %6604 = vmatpush3.bf16.msra.mxu0 %v7061_v32  ;;  %v5629_v43 = vld [vmem:[%s7285_s14 + $0x6c] sm:$0xe] }
  0x7e   : > { %v601_v1 = vsel %vm7317_vm2, %v596_v57, %v600_v38  ;;  %v5674_v7 = vcombine.low %v2973_v14, %v2976_v24  ;;  %v609_v10 = vor.u32 %v608_v59, %v605_v58  ;;  %v5643_v11 = vrot.slane %v5627_v53, 9  ;;  %6605 = vmatprep.subr.bf16.mxu0 %v7065_v45  ;;  %v5559_v55 = vld [vmem:[%s7285_s14 + $0x74] sm:$0x1]  ;;  %v5630_v24 = vld [vmem:[%s7285_s14 + $0x78] sm:$0xe] }
  0x7f   : > { %v5370_v28 = vcombine.low %v591_v56, %v601_v1  ;;  %v619_v8 = vor.u32 %v618_v6, %v614_v61  ;;  %v624_v15 = vrot.slane %v622_v63, 5  ;;  %v2979_v32 = vrot.slane %v7501_v0, 5 }
  0x80   : > { %6570 = vmatmul.mubr.bf16.gmra.mrb[8].mxu0 %v5674_v7  ;;  %v610_v36 = vrot.slane %v609_v10, 4  ;;  %v2982_v62 = vrot.slane %v7513_v20, 5  ;;  %v627_v18 = vshrl.u32 %v7722_v41, 16  ;;  %v630_v26 = vshll.u32 %v7722_v41, 16 }
  0x81   : > { %6346 = vmatmul.mubr.bf16.gmra.mrb[24].mxu1 %v5370_v28  ;;  %v620_v34 = vrot.slane %v619_v8, 4  ;;  %v2980_v33 = vsel %vm7563_vm5, %v5643_v11, %v2979_v32  ;;  %v2981_v46 = vrot.slane %v2979_v32, 4  ;;  %v636_v38 = vshll.u32 %v7727_v12, 16  ;;  %6606 = vmatpush3.bf16.msra.mxu0 %v7065_v45  ;;  %v7762_v11 = vld [vmem:[%s7285_s14 + $0x7c] sm:$0xf] }
  0x82   : > { %v615_v0 = vsel %vm7317_vm2, %v610_v36, %v614_v61  ;;  %v629_v20 = vrot.slane %v627_v18, 4  ;;  %v632_v23 = vrot.slane %v630_v26, 5  ;;  %v640_v42 = vshrl.u32 %v7727_v12, 16  ;;  %6607 = vmatprep.subr.bf16.mxu0 %v7069_v13  ;;  %v7138_v36 = vld [vmem:[%s7285_s14] sm:$0xf] }
  0x83   : > { %v625_v49 = vsel %vm7317_vm2, %v620_v34, %v624_v15  ;;  %v2983_v50 = vsel %vm7563_vm5, %v2981_v46, %v2982_v62  ;;  %v638_v52 = vrot.slane %v636_v38, 5  ;;  %v646_v53 = vshll.u32 %v262_v19, 16  ;;  %v5564_v15 = vld [vmem:[%s7285_s14 + $0x88] sm:$0xf]  ;;  %v7777_v62 = vld [vmem:[%s7285_s14 + $0x4] sm:$0xf] }
  0x84   : > { %v5371_v45 = vcombine.low %v615_v0, %v625_v49  ;;  %v5675_v14 = vcombine.low %v2980_v33, %v2983_v50  ;;  %v633_v22 = vor.u32 %v632_v23, %v629_v20  ;;  %v642_v51 = vrot.slane %v640_v42, 4  ;;  %v5565_v26 = vld [vmem:[%s7285_s14 + $0x8c] sm:$0x1]  ;;  %v5568_v23 = vld [vmem:[%s7285_s14 + $0x98] sm:$0x1] }
  0x85   : > { %v648_v56 = vrot.slane %v646_v53, 5  ;;  %v5644_v57 = vrot.slane %v5628_v30, 9  ;;  %v2986_v58 = vrot.slane %v7528_v60, 5  ;;  %v2989_v59 = vrot.slane %v7537_v17, 5  ;;  %6608 = vmatpush3.bf16.msra.mxu0 %v7069_v13  ;;  %v7765_v17 = vld [vmem:[%s7285_s14 + $0x80] sm:$0x1] }
  0x86   : > { %6349 = vmatprep.mubr.bf16.mxu1 %v5371_v45  ;;  %6573 = vmatprep.mubr.bf16.mxu0 %v5675_v14  ;;  %v634_v61 = vrot.slane %v633_v22, 4  ;;  %v643_v6 = vor.u32 %v642_v51, %v638_v52  ;;  %v5645_v63 = vrot.slane %v5629_v43, 9  ;;  %v2993_v1 = vrot.slane %v5558_v39, 5  ;;  %v5631_v30 = vld [vmem:[%s7285_s14 + $0x84] sm:$0xe] }
  0x87   : > { %v2987_v7 = vsel %vm7563_vm5, %v5644_v57, %v2986_v58  ;;  %v2988_v10 = vrot.slane %v2986_v58, 4  ;;  %v2996_v60 = vrot.slane %v5559_v55, 5  ;;  %6641 = vmatprep.subr.bf16.mxu0 %v7749_v44  ;;  %v5381_v18 = vcombine.low %v7138_v36, %v7777_v62  ;;  %v5567_v39 = vld [vmem:[%s7285_s14 + $0x94] sm:$0xf]  ;;  %v5632_v42 = vld [vmem:[%s7285_s14 + $0x90] sm:$0xe] }
  0x88   : > { %v639_v19 = vsel %vm7317_vm2, %v634_v61, %v638_v52  ;;  %v644_v13 = vrot.slane %v643_v6, 4  ;;  %v2994_v28 = vsel %vm7563_vm5, %v5645_v63, %v2993_v1  ;;  %v2995_v8 = vrot.slane %v2993_v1, 4  ;;  %v5633_v50 = vld [vmem:[%s7285_s14 + $0x9c] sm:$0xe]  ;;  %v5570_v14 = vld [vmem:[%s7285_s14 + $0xa0] sm:$0xf] }
  0x89   : > { %v2990_v32 = vsel %vm7563_vm5, %v2988_v10, %v2989_v59  ;;  %v5646_v38 = vrot.slane %v5630_v24, 9  ;;  %v3000_v43 = vrot.slane %v7762_v11, 5  ;;  %v3003_v49 = vrot.slane %v7765_v17, 5  ;;  %v5571_v22 = vld [vmem:[%s7285_s14 + $0xa4] sm:$0x1] }
  0x8a   : > { %v649_v34 = vsel %vm7317_vm2, %v644_v13, %v648_v56  ;;  %v5676_v33 = vcombine.low %v2987_v7, %v2990_v32  ;;  %v2997_v46 = vsel %vm7563_vm5, %v2995_v8, %v2996_v60  ;;  %v5647_v52 = vrot.slane %v5631_v30, 9  ;;  %v5573_v59 = vld [vmem:[%s7285_s14 + $0xac] sm:$0xf]  ;;  %v7801_v61 = vld [vmem:[%s7285_s14 + $0x10] sm:$0xf] }
  0x8b   : > { %v5372_v0 = vcombine.low %v639_v19, %v649_v34  ;;  %v5677_v20 = vcombine.low %v2994_v28, %v2997_v46  ;;  %v3007_v53 = vrot.slane %v5564_v15, 5  ;;  %v3010_v45 = vrot.slane %v5565_v26, 5  ;;  %v7140_v24 = vld [vmem:[%s7285_s14 + $0xc] sm:$0xf]  ;;  %v7142_v8 = vld [vmem:[%s7285_s14 + $0x18] sm:$0xf] }
  0x8c   : > { %6574 = vmatmul.mubr.bf16.gmra.mrb[12].mxu0 %v5676_v33  ;;  %v3001_v51 = vsel %vm7563_vm5, %v5646_v38, %v3000_v43  ;;  %v3002_v55 = vrot.slane %v3000_v43, 4  ;;  %v3014_v58 = vrot.slane %v5567_v39, 5  ;;  %v5382_v6 = vcombine.low %v7140_v24, %v7801_v61  ;;  %v7060_v19 = vld [vmem:[%s9128_s1 + $0x88] sm:$0xff]   ;;  %v7813_v15 = vld [vmem:[%s7285_s14 + $0x1c] sm:$0xf] }
  0x8d   : > { %6350 = vmatmul.mubr.bf16.gmra.mrb[28].mxu1 %v5372_v0  ;;  %6577 = vmatprep.mubr.bf16.mxu0 %v5677_v20  ;;  %v3008_v56 = vsel %vm7563_vm5, %v5647_v52, %v3007_v53  ;;  %v3009_v57 = vrot.slane %v3007_v53, 4  ;;  %v5648_v1 = vrot.slane %v5632_v42, 9  ;;  %v3017_v7 = vrot.slane %v5568_v23, 5  ;;  %v5574_v30 = vld [vmem:[%s7285_s14 + $0xb0] sm:$0x1] }
  0x8e   : > { %6369 = vmatprep.mubr.bf16.mxu1 %v5381_v18  ;;  %v3004_v63 = vsel %vm7563_vm5, %v3002_v55, %v3003_v49  ;;  %v3016_v13 = vrot.slane %v3014_v58, 4  ;;  %v5649_v28 = vrot.slane %v5633_v50, 9  ;;  %v5383_v32 = vcombine.low %v7142_v8, %v7813_v15  ;;  %v5634_v34 = vld [vmem:[%s7285_s14 + $0xa8] sm:$0xe]  ;;  %v5576_v33 = vld [vmem:[%s7285_s14 + $0xb8] sm:$0xf] }
  0x8f   : > { %v5678_v10 = vcombine.low %v3001_v51, %v3004_v63  ;;  %v3011_v60 = vsel %vm7563_vm5, %v3009_v57, %v3010_v45  ;;  %v3021_v18 = vrot.slane %v5570_v14, 5  ;;  %v3024_v26 = vrot.slane %v5571_v22, 5  ;;  %v5577_v20 = vld [vmem:[%s7285_s14 + $0xbc] sm:$0x1]  ;;  %v5635_v23 = vld [vmem:[%s7285_s14 + $0xb4] sm:$0xe] }
  0x90   : > { %v5679_v36 = vcombine.low %v3008_v56, %v3011_v60  ;;  %v3028_v38 = vrot.slane %v5573_v59, 5  ;;  %v3015_v39 = vsel %vm7563_vm5, %v5648_v1, %v3014_v58  ;;  %v3018_v0 = vsel %vm7563_vm5, %v3016_v13, %v3017_v7  ;;  %v7064_v50 = vld [vmem:[%s9128_s1 + $0x90] sm:$0xff]   ;;  %v5579_v53 = vld [vmem:[%s7285_s14 + $0xc4] sm:$0xf]  ;;  %v7836_v51 = vld [vmem:[%s7285_s14 + $0x28] sm:$0xf] }
  0x91   : > { %v3023_v46 = vrot.slane %v3021_v18, 4  ;;  %v3022_v42 = vsel %vm7563_vm5, %v5649_v28, %v3021_v18  ;;  %v3035_v49 = vrot.slane %v5576_v33, 5  ;;  %v5650_v52 = vrot.slane %v5634_v34, 9  ;;  %v7144_v22 = vld [vmem:[%s7285_s14 + $0x24] sm:$0xf]  ;;  %v7068_v1 = vld [vmem:[%s9128_s1 + $0x98] sm:$0xff]  }
  0x92   : > { %v5680_v45 = vcombine.low %v3015_v39, %v3018_v0  ;;  %v3030_v14 = vrot.slane %v3028_v38, 4  ;;  %v5384_v55 = vcombine.low %v7144_v22, %v7836_v51  ;;  %v7146_v57 = vld [vmem:[%s7285_s14 + $0x30] sm:$0xf]  ;;  %v7841_v58 = vld [vmem:[%s7285_s14 + $0x34] sm:$0xf]  ;;  %v5651_v24 = vrot.slane %v5635_v23, 9 }
  0x93   : > { %v3025_v43 = vsel %vm7563_vm5, %v3023_v46, %v3024_v26  ;;  %v5385_v59 = vcombine.low %v7146_v57, %v7841_v58  ;;  %v3038_v63 = vrot.slane %v5577_v20, 5  ;;  %v5636_v7 = vld [vmem:[%s7285_s14 + $0xc0] sm:$0xe]  ;;  %v3029_v60 = vsel %vm7563_vm5, %v5650_v52, %v3028_v38  ;;  %v5580_v8 = vld [vmem:[%s7285_s14 + $0xc8] sm:$0x1]  ;;  %v7071_v22 = vld [vmem:[%s7285_s14 + $0x18] sm:$0xff]  }
  0x94   : > { %6578 = vmatmul.mubr.bf16.gmra.mrb[16].mxu0 %v5678_v10  ;;  %v5681_v56 = vcombine.low %v3022_v42, %v3025_v43  ;;  %v3042_v10 = vrot.slane %v5579_v53, 5  ;;  %v3036_v13 = vsel %vm7563_vm5, %v5651_v24, %v3035_v49  ;;  %v5652_v18 = vrot.slane %v5636_v7, 9  ;;  %v7148_v26 = vld [vmem:[%s7285_s14 + $0x3c] sm:$0xf]  ;;  %v7150_v39 = vld [vmem:[%s7285_s14 + $0x48] sm:$0xf] }
  0x95   : > { %6370 = vmatmul.mubr.bf16.vlgmr.msra.gmra.mrb[0].mxu1 %v5382_v6  ;;  %6581 = vmatprep.mubr.bf16.mxu0 %v5679_v36  ;;  %v3037_v6 = vrot.slane %v3035_v49, 4  ;;  %v3045_v38 = vrot.slane %v5580_v8, 5  ;;  %v7867_v0 = vld [vmem:[%s7285_s14 + $0x4c] sm:$0xf]  ;;  %v7085_v49 = vld [vmem:[%s9128_s1 + $0xb0] sm:$0xff]   ;;  %v2395_v52 = vshrl.u32 %v7762_v11, 16 }
  0x96   : > { %6402 = vmatpush3.bf16.msra.mxu1 %v7487_v4  ;;  %6373 = vmatprep.mubr.bf16.mxu1 %v5383_v32  ;;  %v3031_v4 = vrot.slane %v5574_v30, 5  ;;  %v7073_v32 = vld [vmem:[%s9128_s1 + $0xa0] sm:$0xff]   ;;  %v3044_v46 = vrot.slane %v3042_v10, 4  ;;  %v5387_v20 = vcombine.low %v7150_v39, %v7867_v0  ;;  %v7079_v23 = vld [vmem:[%s9128_s1 + $0xa8] sm:$0xff]   ;;  %v3043_v42 = vsel %vm7563_vm5, %v5652_v18, %v3042_v10  ;;  %v7077_v18 = vld [vmem:[%s7285_s14 + $0x30] sm:$0xff]  }
  0x97   : > { %6403 = vmatprep.subr.bf16.mxu1 %v7060_v19  ;;  %v3039_v28 = vsel %vm7563_vm5, %v3037_v6, %v3038_v63  ;;  %v7862_v30 = vld [vmem:[%s7285_s14 + $0x40] sm:$0xf]  ;;  %v7895_v57 = vrot.slane %v2395_v52, 4  ;;  %v7074_v6 = vld [vmem:[%s7285_s14 + $0x24] sm:$0xff]   ;;  %v1305_v7 = vrot.slane %v7801_v61, 5  ;;  %v2401_v8 = vshll.u32 %v7765_v17, 16 }
  0x98   : > { %v5386_v34 = vcombine.low %v7148_v26, %v7862_v30  ;;  %v5683_v33 = vcombine.low %v3036_v13, %v3039_v28  ;;  %v3046_v43 = vsel %vm7563_vm5, %v3044_v46, %v3045_v38  ;;  %v1245_v63 = vld [vmem:[%s7285_s14] sm:$0xe]  ;;  %v1246_v10 = vld [vmem:[%s7285_s14 + $0xc] sm:$0xe]  ;;  %v1312_v13 = vrot.slane %v7813_v15, 5 }
  0x99   : > { %v5684_v53 = vcombine.low %v3043_v42, %v3046_v43  ;;  %v1248_v61 = vld [vmem:[%s7285_s14 + $0x24] sm:$0xe]  ;;  %v5392_v15 = vcombine.low %v7615_v16, %v7623_v40  ;;  %v5393_v26 = vcombine.low %v7644_v2, %v7647_v3  ;;  %v5405_v17 = vrot.slane %v1245_v63, 9  ;;  %v7156_v38 = vld [vmem:[%s7285_s14 + $0x20] sm:$0x1]  ;;  %v7086_v2 = vld [vmem:[%s7285_s14 + $0x54] sm:$0xff]  }
  0x9a   : > { %6404 = vmatpush3.bf16.msra.mxu1 %v7060_v19  ;;  %v3032_v19 = vsel %vm7563_vm5, %v3030_v14, %v3031_v4  ;;  %v7884_v14 = vld [vmem:[%s7285_s14 + $0x58] sm:$0xf]  ;;  %v1314_v46 = vrot.slane %v1312_v13, 4  ;;  %v1315_v39 = vrot.slane %v7156_v38, 5  ;;  %v7157_v43 = vld [vmem:[%s7285_s14 + $0x2c] sm:$0x1] }
  0x9b   : > { %6405 = vmatprep.subr.bf16.mxu1 %v7064_v50  ;;  %v5682_v36 = vcombine.low %v3029_v60, %v3032_v19  ;;  %v7910_v60 = vld [vmem:[%s9128_s1 + $0xc0] sm:$0xff]   ;;  %v1247_v19 = vld [vmem:[%s7285_s14 + $0x18] sm:$0xe]  ;;  %v7160_v38 = vld [vmem:[%s7285_s14 + $0x50] sm:$0x1]  ;;  %v1347_v16 = vrot.slane %v7884_v14, 5 }
  0x9c   : > { %6582 = vmatmul.mubr.bf16.gmra.mrb[20].mxu0 %v5680_v45  ;;  %v7152_v45 = vld [vmem:[%s7285_s14 + $0x54] sm:$0xf]  ;;  %v8033_v40 = vld [vmem:[%s7285_s14 + $0x64] sm:$0xf] }
  0x9d   : > { %6374 = vmatmul.mubr.bf16.gmra.mrb[4].mxu1 %v5384_v55  ;;  %6585 = vmatprep.mubr.bf16.mxu0 %v5681_v56  ;;  %v5388_v4 = vcombine.low %v7152_v45, %v7884_v14  ;;  %v5389_v55 = vcombine.low %v7541_v25, %v7544_v35  ;;  %v7091_v56 = vld [vmem:[%s9128_s1 + $0xb8] sm:$0xff]   ;;  %v7155_v25 = vld [vmem:[%s7285_s14 + $0x14] sm:$0x1]  ;;  %v7089_v3 = vld [vmem:[%s7285_s14 + $0x60] sm:$0xff]  }
  0x9e   : > { %6377 = vmatprep.mubr.bf16.mxu1 %v5385_v59  ;;  %6406 = vmatpush3.bf16.msra.mxu1 %v7064_v50  ;;  %v2391_v50 = vshll.u32 %v7762_v11, 16  ;;  %v7898_v59 = vld [vmem:[%s7285_s14 + $0x8] sm:$0x1]  ;;  %v1308_v35 = vrot.slane %v7155_v25, 5 }
  0x9f   : > { %6407 = vmatprep.subr.bf16.mxu1 %v7068_v1  ;;  %v1301_v24 = vrot.slane %v7898_v59, 5 }
  0xa0   : > { %v7893_v11 = vrot.slane %v2391_v50, 5 }
  0xa2   : > { %6408 = vmatpush3.bf16.msra.mxu1 %v7068_v1  ;;  %v1298_v1 = vrot.slane %v7777_v62, 5  ;;  %v5390_v62 = vcombine.low %v7559_v5, %v7571_v21  ;;  %v5406_v21 = vrot.slane %v1246_v10, 9  ;;  %v5765_v10 = vld [vmem:[%s7285_s14 + $0x18] sm:$0xf] }
  0xa3   : > { %6409 = vmatprep.subr.bf16.mxu1 %v7073_v32 }
  0xa4   : > { %6586 = vmatmul.mubr.bf16.gmra.mrb[24].mxu0 %v5682_v36  ;;  %v5391_v36 = vcombine.low %v7582_v47, %v7593_v54  ;;  %v1300_v5 = vrot.slane %v1298_v1, 4  ;;  %v7081_v47 = vld [vmem:[%s9128_s1 + $0x1c8] sm:$0xff]   ;;  %v5407_v54 = vrot.slane %v1247_v19, 9  ;;  %v7953_v59 = vsel %vm7563_vm5, %v5405_v17, %v1298_v1  ;;  %v5766_v19 = vld [vmem:[%s7285_s14 + $0x1c] sm:$0xf] }
  0xa5   : > { %6378 = vmatmul.mubr.bf16.gmra.mrb[8].mxu1 %v5386_v34  ;;  %6589 = vmatprep.mubr.bf16.mxu0 %v5683_v33  ;;  %v1326_v34 = vrot.slane %v7841_v58, 5  ;;  %v1307_v33 = vrot.slane %v1305_v7, 4  ;;  %v5408_v58 = vrot.slane %v1248_v61, 9  ;;  %v1340_v1 = vrot.slane %v7867_v0, 5  ;;  %v7083_v0 = vld [vmem:[%s7285_s14 + $0x48] sm:$0xff]  }
  0xa6   : > { %6381 = vmatprep.mubr.bf16.mxu1 %v5387_v20  ;;  %6410 = vmatpush3.bf16.msra.mxu1 %v7073_v32  ;;  %v1319_v32 = vrot.slane %v7836_v51, 5  ;;  %v1249_v51 = vld [vmem:[%s7285_s14 + $0x30] sm:$0xe]  ;;  %v5394_v20 = vcombine.low %v7665_v31, %v7674_v48  ;;  %v7961_v25 = vsel %vm7563_vm5, %v1300_v5, %v1301_v24  ;;  %v7969_v63 = vsel %vm7563_vm5, %v5407_v54, %v1312_v13  ;;  %v1251_v13 = vld [vmem:[%s7285_s14 + $0x48] sm:$0xe] }
  0xa7   : > { %6411 = vmatprep.subr.bf16.mxu1 %v7079_v23  ;;  %v5409_v50 = vrot.slane %v1249_v51, 9  ;;  %v1328_v52 = vrot.slane %v1326_v34, 4  ;;  %v3805_v5 = vshrl.u32 %v5765_v10, 16  ;;  %v3818_v51 = vshrl.u32 %v5766_v19, 16  ;;  %v7092_v48 = vld [vmem:[%s7285_s14 + $0x6c] sm:$0xff]  }
  0xa8   : > { %v1321_v42 = vrot.slane %v1319_v32, 4  ;;  %v7981_v24 = vsel %vm7563_vm5, %v5408_v58, %v1319_v32  ;;  %v7159_v32 = vld [vmem:[%s7285_s14 + $0x44] sm:$0x1]  ;;  %v5411_v54 = vrot.slane %v1251_v13, 9  ;;  %v5769_v13 = vld [vmem:[%s7285_s14 + $0x28] sm:$0xf] }
  0xa9   : > { %v7991_v61 = vsel %vm7563_vm5, %v5409_v50, %v1326_v34  ;;  %v1336_v17 = vrot.slane %v7159_v32, 5  ;;  %v5767_v50 = vld [vmem:[%s7285_s14 + $0x20] sm:$0x1]  ;;  %v1253_v32 = vld [vmem:[%s7285_s14 + $0x60] sm:$0xe] }
  0xaa   : > { %6412 = vmatpush3.bf16.msra.mxu1 %v7079_v23  ;;  %v5395_v23 = vcombine.low %v7699_v27, %v7702_v29 }
  0xab   : > { %6413 = vmatprep.subr.bf16.mxu1 %v7085_v49 }
  0xac   : > { %6590 = vmatmul.mubr.bf16.gmra.mrb[28].mxu0 %v5684_v53  ;;  %v7158_v53 = vld [vmem:[%s7285_s14 + $0x38] sm:$0x1] }
  0xad   : > { %6382 = vmatmul.mubr.bf16.gmra.mrb[12].mxu1 %v5388_v4  ;;  %6609 = vmatprep.mubr.bf16.mxu0 %v7071_v22  ;;  %v1329_v45 = vrot.slane %v7158_v53, 5  ;;  %v1250_v4 = vld [vmem:[%s7285_s14 + $0x3c] sm:$0xe]  ;;  %v1333_v22 = vrot.slane %v7862_v30, 5  ;;  %v7957_v30 = vsel %vm7563_vm5, %v5406_v21, %v1305_v7  ;;  %v3808_v21 = vshll.u32 %v5765_v10, 16  ;;  %v7097_v53 = vld [vmem:[%s9128_s1 + $0x1e0] sm:$0xff]  }
  0xae   : > { %6385 = vmatprep.mubr.bf16.mxu1 %v5389_v55  ;;  %6414 = vmatpush3.bf16.msra.mxu1 %v7085_v49  ;;  %v1322_v49 = vrot.slane %v7157_v43, 5  ;;  %v7944_v55 = vrot.slane %v2401_v8, 5  ;;  %v7080_v7 = vld [vmem:[%s7285_s14 + $0x3c] sm:$0xff]   ;;  %v7977_v8 = vsel %vm7563_vm5, %v1314_v46, %v1315_v39  ;;  %v1342_v46 = vrot.slane %v1340_v1, 4  ;;  %v5771_v43 = vld [vmem:[%s7285_s14 + $0x30] sm:$0xf] }
  0xaf   : > { %6415 = vmatprep.subr.bf16.mxu1 %v7091_v56  ;;  %v1343_v39 = vrot.slane %v7160_v38, 5  ;;  %v3807_v10 = vrot.slane %v3805_v5, 4 }
  0xb0   : > { %9150 = vst [vmem:[#allocation2_spill] sm:$0xff] %v7944_v55 }
  0xb2   : > { %6416 = vmatpush3.bf16.msra.mxu1 %v7091_v56  ;;  %v7087_v56 = vld [vmem:[%s9128_s1 + $0x1d0] sm:$0xff]  }
  0xb3   : > { %6449 = vmatprep.subr.bf16.mxu1 %v7910_v60 }
  0xb4   : > { %6610 = vmatmul.mubr.bf16.vlgmr.msra.gmra.mrb[0].mxu0 %v7074_v6  ;;  %v7965_v6 = vsel %vm7563_vm5, %v1307_v33, %v1308_v35  ;;  %v7985_v35 = vsel %vm7563_vm5, %v1321_v42, %v1322_v49  ;;  %v3814_v33 = vshll.u32 %v5766_v19, 16  ;;  %v3810_v19 = vrot.slane %v3808_v21, 5  ;;  %v1254_v21 = vld [vmem:[%s7285_s14 + $0x6c] sm:$0xe] }
  0xb5   : > { %6386 = vmatmul.mubr.bf16.gmra.mrb[16].mxu1 %v5390_v62  ;;  %6642 = vmatpush3.bf16.msra.mxu0 %v7749_v44  ;;  %v5410_v62 = vrot.slane %v1250_v4, 9  ;;  %v5414_v58 = vrot.slane %v1254_v21, 9 }
  0xb6   : > { %6389 = vmatprep.mubr.bf16.mxu1 %v5391_v36  ;;  %6613 = vmatprep.mubr.bf16.mxu0 %v7077_v18  ;;  %v7995_v36 = vsel %vm7563_vm5, %v1328_v52, %v1329_v45  ;;  %v1335_v18 = vrot.slane %v1333_v22, 4  ;;  %v5768_v52 = vld [vmem:[%s7285_s14 + $0x24] sm:$0xf]  ;;  %v3842_v45 = vshrl.u32 %v5769_v13, 16 }
  0xb7   : > { %6643 = vmatprep.subr.bf16.mxu0 %v7081_v47  ;;  %v8012_v49 = vsel %vm7563_vm5, %v5410_v62, %v1333_v22  ;;  %v8029_v22 = vld [vmem:[%s7285_s14 + $0x54] sm:$0xe]  ;;  %v3820_v62 = vrot.slane %v3818_v51, 4  ;;  %v3829_v38 = vshrl.u32 %v5768_v52, 16  ;;  %v3832_v28 = vshll.u32 %v5768_v52, 16 }
  0xb8   : > { %v8026_v4 = vsel %vm7563_vm5, %v1335_v18, %v1336_v17  ;;  %v3824_v17 = vshll.u32 %v5767_v50, 16  ;;  %v5412_v5 = vrot.slane %v8029_v22, 9  ;;  %v7101_v50 = vld [vmem:[%s9128_s1 + $0x1e8] sm:$0xff]   ;;  %v1349_v52 = vrot.slane %v1347_v16, 4 }
  0xb9   : > { %6644 = vmatpush3.bf16.msra.mxu0 %v7081_v47  ;;  %v7093_v47 = vld [vmem:[%s9128_s1 + $0x1d8] sm:$0xff]   ;;  %v3811_v22 = vor.u32 %v3810_v19, %v3807_v10  ;;  %v3831_v34 = vrot.slane %v3829_v38, 4  ;;  %v3834_v44 = vrot.slane %v3832_v28, 5  ;;  %v7165_v10 = vld [vmem:[%s7285_s14 + $0x74] sm:$0x1]  ;;  %v3844_v28 = vrot.slane %v3842_v45, 4 }
  0xba   : > { %6645 = vmatprep.subr.bf16.mxu0 %v7087_v56  ;;  %v8067_v42 = vrot.slane %v3824_v17, 5  ;;  %v1364_v19 = vrot.slane %v7165_v10, 5  ;;  %v3853_v38 = vshrl.u32 %v5771_v43, 16  ;;  %v8092_v27 = vsel %vm7563_vm5, %v5412_v5, %v1347_v16 }
  0xbb   : > { %v3812_v21 = vrot.slane %v3811_v22, 4 }
  0xbc   : > { %6614 = vmatmul.mubr.bf16.gmra.mrb[4].mxu0 %v7080_v7  ;;  %v8039_v7 = vrot.slane %v3814_v33, 5  ;;  %v7163_v33 = vld [vmem:[%s7285_s14 + $0x70] sm:$0xf] }
  0xbd   : > { %6390 = vmatmul.mubr.bf16.gmra.mrb[20].mxu1 %v5392_v15  ;;  %6617 = vmatprep.mubr.bf16.mxu0 %v7083_v0  ;;  %v1354_v15 = vrot.slane %v8033_v40, 5  ;;  %v7162_v0 = vld [vmem:[%s7285_s14 + $0x5c] sm:$0x1]  ;;  %v1361_v51 = vrot.slane %v7163_v33, 5 }
  0xbe   : > { %6393 = vmatprep.mubr.bf16.mxu1 %v5393_v26  ;;  %6646 = vmatpush3.bf16.msra.mxu0 %v7087_v56  ;;  %v1350_v18 = vrot.slane %v7162_v0, 5  ;;  %v8048_v26 = vsel %vm7563_vm5, %v5411_v54, %v1340_v1  ;;  %v8052_v56 = vsel %vm7563_vm5, %v1342_v46, %v1343_v39  ;;  %v7164_v1 = vld [vmem:[%s7285_s14 + $0x68] sm:$0x1]  ;;  %v3838_v0 = vshll.u32 %v5769_v13, 16  ;;  %v7109_v40 = vld [vmem:[%s9128_s1 + $0x1f8] sm:$0xff]  }
  0xbf   : > { %6647 = vmatprep.subr.bf16.mxu0 %v7093_v47  ;;  %v1357_v54 = vrot.slane %v7164_v1, 5  ;;  %v5413_v46 = vrot.slane %v1253_v32, 9  ;;  %v1356_v39 = vrot.slane %v1354_v15, 4  ;;  %v3821_v33 = vor.u32 %v3820_v62, %v8039_v7  ;;  %v5772_v1 = vld [vmem:[%s7285_s14 + $0x34] sm:$0xf] }
  0xc0   : > { %v1363_v32 = vrot.slane %v1361_v51, 4  ;;  %v5770_v62 = vld [vmem:[%s7285_s14 + $0x2c] sm:$0x1]  ;;  %v8079_v17 = vrot.slane %v3838_v0, 5  ;;  %v3862_v13 = vshll.u32 %v5772_v1, 16  ;;  %v3866_v31 = vshrl.u32 %v5772_v1, 16 }
  0xc1   : > { %v3822_v10 = vrot.slane %v3821_v33, 4  ;;  %v8096_v29 = vsel %vm7563_vm5, %v1349_v52, %v1350_v18  ;;  %v8103_v45 = vsel %vm7563_vm5, %v5413_v46, %v1354_v15  ;;  %v8107_v14 = vsel %vm7563_vm5, %v1356_v39, %v1357_v54  ;;  %v1255_v18 = vld [vmem:[%s7285_s14 + $0x78] sm:$0xe] }
  0xc2   : > { %6648 = vmatpush3.bf16.msra.mxu0 %v7093_v47  ;;  %v8111_v16 = vsel %vm7563_vm5, %v5414_v58, %v1361_v51  ;;  %v8121_v15 = vsel %vm7563_vm5, %v1363_v32, %v1364_v19  ;;  %v3845_v5 = vor.u32 %v3844_v28, %v8079_v17  ;;  %v3855_v52 = vrot.slane %v3853_v38, 4  ;;  %v5774_v58 = vld [vmem:[%s7285_s14 + $0x3c] sm:$0xf]  ;;  %v5775_v51 = vld [vmem:[%s7285_s14 + $0x40] sm:$0xf] }
  0xc3   : > { %6649 = vmatprep.subr.bf16.mxu0 %v7097_v53  ;;  %v3817_v0 = vsel %vm7317_vm2, %v3812_v21, %v8039_v7  ;;  %v3827_v46 = vsel %vm7317_vm2, %v3822_v10, %v8067_v42  ;;  %v8132_v39 = vrot.slane %v3862_v13, 5  ;;  %v3868_v22 = vrot.slane %v3866_v31, 4  ;;  %v7167_v19 = vld [vmem:[%s7285_s14 + $0x80] sm:$0x1]  ;;  %v8291_v47 = vld [vmem:[%s7285_s14 + $0x68] sm:$0x1] }
  0xc4   : > { %6618 = vmatmul.mubr.bf16.gmra.mrb[8].mxu0 %v7086_v2  ;;  %v3856_v2 = vshll.u32 %v5771_v43, 16  ;;  %v3848_v43 = vshll.u32 %v5770_v62, 16  ;;  %v5415_v32 = vrot.slane %v1255_v18, 9  ;;  %v1256_v62 = vld [vmem:[%s7285_s14 + $0x84] sm:$0xe]  ;;  %v3877_v28 = vshrl.u32 %v5774_v58, 16 }
  0xc5   : > { %6394 = vmatmul.mubr.bf16.gmra.mrb[24].mxu1 %v5394_v20  ;;  %6621 = vmatprep.mubr.bf16.mxu0 %v7089_v3  ;;  %v7105_v20 = vld [vmem:[%s9128_s1 + $0x1f0] sm:$0xff]   ;;  %v7166_v3 = vld [vmem:[%s7285_s14 + $0x7c] sm:$0xf]  ;;  %v3880_v7 = vshll.u32 %v5774_v58, 16  ;;  %v3886_v38 = vshll.u32 %v5775_v51, 16  ;;  %v9151_v42 = vcombine.low %v7722_v41, %v7727_v12  ;;  %v8143_v13 = vrot.slane %v3845_v5, 4 }
  0xc6   : > { %6397 = vmatprep.mubr.bf16.mxu1 %v5395_v23  ;;  %6650 = vmatpush3.bf16.msra.mxu0 %v7097_v53  ;;  %v3835_v23 = vor.u32 %v3834_v44, %v3831_v34  ;;  %v7094_v53 = vld [vmem:[%s7285_s14 + $0x78] sm:$0xff]   ;;  %v1368_v44 = vrot.slane %v7166_v3, 5  ;;  %v3858_v54 = vrot.slane %v3856_v2, 5  ;;  %v8136_v1 = vrot.slane %v3848_v43, 5  ;;  %v8148_v21 = vld [vmem:[%s9128_s1 + $0x200] sm:$0xff]   ;;  %9159 = vst [vmem:[#allocation5_spill] sm:$0xff] %v8291_v47 }
  0xc7   : > { %6651 = vmatprep.subr.bf16.mxu0 %v7101_v50  ;;  %v5773_v34 = vld [vmem:[%s7285_s14 + $0x38] sm:$0x1]  ;;  %v3890_v2 = vshrl.u32 %v5775_v51, 16  ;;  %v7096_v43 = vld [vmem:[%s7285_s14 + $0x84] sm:$0xff]   ;;  %v3869_v12 = vor.u32 %v3868_v22, %v8132_v39  ;;  %v3882_v58 = vrot.slane %v3880_v7, 5  ;;  %v8170_v51 = vrot.slane %v3886_v38, 5 }
  0xc8   : > { %v8134_v33 = vrot.slane %v3835_v23, 4  ;;  %v1370_v10 = vrot.slane %v1368_v44, 4  ;;  %v3859_v31 = vor.u32 %v3858_v54, %v3855_v52  ;;  %v9152_v23 = vcombine.low %v7953_v59, %v7961_v25  ;;  %v7168_v18 = vld [vmem:[%s7285_s14 + $0x88] sm:$0xf]  ;;  %v5776_v5 = vld [vmem:[%s7285_s14 + $0x44] sm:$0x1] }
  0xc9   : > { %v1375_v3 = vrot.slane %v7168_v18, 5  ;;  %v8161_v59 = vcombine.low %v3817_v0, %v3827_v46  ;;  %v5777_v52 = vld [vmem:[%s7285_s14 + $0x48] sm:$0xf]  ;;  %v3879_v54 = vrot.slane %v3877_v28, 4  ;;  %v3892_v22 = vrot.slane %v3890_v2, 4 }
  0xca   : > { %6652 = vmatpush3.bf16.msra.mxu0 %v7101_v50  ;;  %v1371_v50 = vrot.slane %v7167_v19, 5  ;;  %v7098_v19 = vld [vmem:[%s7285_s14 + $0x90] sm:$0xff]   ;;  %v3841_v0 = vsel %vm7317_vm2, %v8134_v33, %v8079_v17  ;;  %v3860_v46 = vrot.slane %v3859_v31, 4  ;;  %v3851_v28 = vsel %vm7317_vm2, %v8143_v13, %v8136_v1  ;;  %v8192_v33 = vld [vmem:[%s7285_s14 + $0x58] sm:$0xf]  ;;  %v7099_v31 = vld [vmem:[%s9128_s1 + $0xc8] sm:$0xff]  }
  0xcb   : > { %6653 = vmatprep.subr.bf16.mxu0 %v7105_v20  ;;  %v3870_v38 = vrot.slane %v3869_v12, 4  ;;  %v1377_v2 = vrot.slane %v1375_v3, 4  ;;  %v5780_v17 = vld [vmem:[%s7285_s14 + $0x54] sm:$0xf]  ;;  %v3896_v1 = vshll.u32 %v5776_v5, 16  ;;  %v3901_v13 = vshrl.u32 %v5777_v52, 16 }
  0xcc   : > { %6622 = vmatmul.mubr.bf16.gmra.mrb[12].mxu0 %v7092_v48  ;;  %v3872_v48 = vshll.u32 %v5773_v34, 16  ;;  %v8188_v7 = vsel %vm7563_vm5, %v1370_v10, %v1371_v50  ;;  %v3904_v50 = vshll.u32 %v5777_v52, 16  ;;  %v3883_v10 = vor.u32 %v3882_v58, %v3879_v54  ;;  %v7100_v54 = vld [vmem:[%s7285_s14 + $0x9c] sm:$0xff]   ;;  %v7174_v41 = vld [vmem:[%s7285_s14 + $0xac] sm:$0xf] }
  0xcd   : > { %6398 = vmatmul.mubr.bf16.gmra.mrb[28].mxu1 %v9151_v42  ;;  %6625 = vmatprep.mubr.bf16.mxu0 %v7094_v53  ;;  %v5416_v53 = vrot.slane %v1256_v62, 9  ;;  %v7169_v42 = vld [vmem:[%s7285_s14 + $0x8c] sm:$0x1]  ;;  %v3934_v5 = vshll.u32 %v8192_v33, 16  ;;  %v9154_v52 = vcombine.low %v7969_v63, %v7977_v8  ;;  %v8228_v63 = vld [vmem:[%s7285_s14 + $0x50] sm:$0x1] }
  0xce   : > { %6417 = vmatprep.mubr.bf16.mxu1 %v9152_v23  ;;  %6654 = vmatpush3.bf16.msra.mxu0 %v7105_v20  ;;  %v8167_v20 = vsel %vm7563_vm5, %v5415_v32, %v1368_v44  ;;  %v3874_v62 = vrot.slane %v3872_v48, 5  ;;  %v1378_v23 = vrot.slane %v7169_v42, 5  ;;  %v1257_v44 = vld [vmem:[%s7285_s14 + $0x90] sm:$0xe]  ;;  %v8180_v32 = vld [vmem:[%s7285_s14 + $0x4c] sm:$0xf]  ;;  %v3893_v48 = vor.u32 %v3892_v22, %v8170_v51 }
  0xcf   : > { %6655 = vmatprep.subr.bf16.mxu0 %v7109_v40  ;;  %v3910_v12 = vshll.u32 %v8180_v32, 16  ;;  %v3914_v18 = vshrl.u32 %v8180_v32, 16  ;;  %v9153_v42 = vcombine.low %v7957_v30, %v7965_v6  ;;  %v7103_v30 = vld [vmem:[%s9128_s1 + $0xd0] sm:$0xff]   ;;  %v3865_v6 = vsel %vm7317_vm2, %v3860_v46, %v8132_v39  ;;  %v7102_v8 = vld [vmem:[%s7285_s14 + $0xa8] sm:$0xff]   ;;  %v8235_v39 = vld [vmem:[%s7285_s14 + $0x5c] sm:$0x1] }
  0xd0   : > { %v3875_v58 = vsel %vm7317_vm2, %v3870_v38, %v3874_v62  ;;  %v5417_v22 = vrot.slane %v1257_v44, 9  ;;  %v3906_v25 = vrot.slane %v3904_v50, 5  ;;  %9155 = vst [vmem:[#allocation3_spill] sm:$0xff] %v8235_v39  ;;  %v3884_v46 = vrot.slane %v3883_v10, 4 }
  0xd1   : > { %v3894_v62 = vrot.slane %v3893_v48, 4  ;;  %v8237_v38 = vrot.slane %v3910_v12, 5  ;;  %v8239_v34 = vrot.slane %v3934_v5, 5  ;;  %v8244_v50 = vcombine.low %v3841_v0, %v3851_v28  ;;  %v5783_v28 = vld [vmem:[%s7285_s14 + $0x60] sm:$0xf] }
  0xd2   : > { %6656 = vmatpush3.bf16.msra.mxu0 %v7109_v40  ;;  %v8200_v40 = vsel %vm7563_vm5, %v5416_v53, %v1375_v3  ;;  %v3925_v53 = vshrl.u32 %v5780_v17, 16  ;;  %v3928_v3 = vshll.u32 %v5780_v17, 16  ;;  %v7170_v17 = vld [vmem:[%s7285_s14 + $0x94] sm:$0xf]  ;;  %v8248_v48 = vcombine.low %v3865_v6, %v3875_v58 }
  0xd3   : > { %6689 = vmatprep.subr.bf16.mxu0 %v8148_v21  ;;  %v3920_v0 = vshll.u32 %v8228_v63, 16  ;;  %v3889_v6 = vsel %vm7317_vm2, %v3884_v46, %v8170_v51  ;;  %v9158_v46 = vcombine.low %v7991_v61, %v7995_v36 }
  0xd4   : > { %6626 = vmatmul.mubr.bf16.gmra.mrb[16].mxu0 %v7096_v43  ;;  %v3938_v43 = vshrl.u32 %v8192_v33, 16  ;;  %v3927_v44 = vrot.slane %v3925_v53, 4  ;;  %v7171_v53 = vld [vmem:[%s7285_s14 + $0x98] sm:$0x1] }
  0xd5   : > { %6418 = vmatmul.mubr.bf16.vlgmr.msra.gmra.mrb[0].mxu1 %v9153_v42  ;;  %6629 = vmatprep.mubr.bf16.mxu0 %v7098_v19  ;;  %v8231_v19 = vrot.slane %v3896_v1, 5  ;;  %v1382_v42 = vrot.slane %v7170_v17, 5  ;;  %v7172_v17 = vld [vmem:[%s7285_s14 + $0xa0] sm:$0xf]  ;;  %v3922_v36 = vrot.slane %v3920_v0, 5 }
  0xd6   : > { %6450 = vmatpush3.bf16.msra.mxu1 %v7910_v60  ;;  %6421 = vmatprep.mubr.bf16.mxu1 %v9154_v52  ;;  %v8225_v60 = vsel %vm7563_vm5, %v1377_v2, %v1378_v23  ;;  %v3903_v52 = vrot.slane %v3901_v13, 4  ;;  %v3916_v23 = vrot.slane %v3914_v18, 4  ;;  %v3930_v2 = vrot.slane %v3928_v3, 5  ;;  %v7107_v13 = vld [vmem:[%s9128_s1 + $0xd8] sm:$0xff]  }
  0xd7   : > { %6451 = vmatprep.subr.bf16.mxu1 %v7099_v31  ;;  %v3940_v1 = vrot.slane %v3938_v43, 4  ;;  %v1258_v18 = vld [vmem:[%s7285_s14 + $0x9c] sm:$0xe]  ;;  %v1385_v3 = vrot.slane %v7171_v53, 5  ;;  %v8261_v43 = vld [vmem:[%s7285_s14 + $0x64] sm:$0xf] }
  0xd8   : > { %v3907_v5 = vor.u32 %v3906_v25, %v3903_v52  ;;  %9156 = vst [vmem:[#allocation4_spill] sm:$0xff] %v8261_v43  ;;  %v3917_v58 = vor.u32 %v3916_v23, %v8237_v38  ;;  %v1389_v12 = vrot.slane %v7172_v17, 5  ;;  %v9157_v25 = vcombine.low %v7981_v24, %v7985_v35  ;;  %v7104_v23 = vld [vmem:[%s7285_s14 + $0xb4] sm:$0xff]   ;;  %v7110_v24 = vld [vmem:[%s9128_s1 + $0xe0] sm:$0xff]   ;;  %v5786_v17 = vld [vmem:[%s7285_s14 + $0x6c] sm:$0xf] }
  0xd9   : > { %v1384_v52 = vrot.slane %v1382_v42, 4  ;;  %v3931_v53 = vor.u32 %v3930_v2, %v3927_v44  ;;  %v3941_v51 = vor.u32 %v3940_v1, %v8239_v34  ;;  %v3949_v35 = vshrl.u32 %v5783_v28, 16  ;;  %v7173_v2 = vld [vmem:[%s7285_s14 + $0xa4] sm:$0x1] }
  0xda   : > { %6452 = vmatpush3.bf16.msra.mxu1 %v7099_v31  ;;  %v8255_v31 = vsel %vm7563_vm5, %v5417_v22, %v1382_v42  ;;  %v3944_v22 = vshll.u32 %v8235_v39, 16  ;;  %v3962_v42 = vshrl.u32 %v8261_v43, 16  ;;  %v3908_v61 = vrot.slane %v3907_v5, 4  ;;  %v8430_v39 = vld [vmem:[%s7285_s14 + $0x98] sm:$0x1] }
  0xdb   : > { %6453 = vmatprep.subr.bf16.mxu1 %v7103_v30  ;;  %v5418_v44 = vrot.slane %v1258_v18, 9  ;;  %v1392_v1 = vrot.slane %v7173_v2, 5  ;;  %v3932_v5 = vrot.slane %v3931_v53, 4  ;;  %v3942_v18 = vrot.slane %v3941_v51, 4  ;;  %9172 = vst [vmem:[#allocation14_spill] sm:$0xff] %v8430_v39 }
  0xdc   : > { %6630 = vmatmul.mubr.bf16.gmra.mrb[20].mxu0 %v7100_v54  ;;  %v3899_v54 = vsel %vm7317_vm2, %v3894_v62, %v8231_v19  ;;  %v3958_v19 = vshll.u32 %v8261_v43, 16  ;;  %v7106_v62 = vld [vmem:[%s7285_s14 + $0xc0] sm:$0xff]   ;;  %v3946_v10 = vrot.slane %v3944_v22, 5  ;;  %v8297_v43 = vsel %vm7563_vm5, %v1384_v52, %v1385_v3 }
  0xdd   : > { %6422 = vmatmul.mubr.bf16.gmra.mrb[4].mxu1 %v9157_v25  ;;  %6633 = vmatprep.mubr.bf16.mxu0 %v7102_v8  ;;  %v3952_v8 = vshll.u32 %v5783_v28, 16  ;;  %v3918_v25 = vrot.slane %v3917_v58, 4  ;;  %v1396_v28 = vrot.slane %v7174_v41, 5  ;;  %v8293_v55 = vcombine.low %v3889_v6, %v3899_v54  ;;  %v7112_v41 = vld [vmem:[%s9128_s1 + $0xe8] sm:$0xff]  }
  0xde   : > { %6425 = vmatprep.mubr.bf16.mxu1 %v9158_v46  ;;  %6454 = vmatpush3.bf16.msra.mxu1 %v7103_v30  ;;  %v1259_v30 = vld [vmem:[%s7285_s14 + $0xa8] sm:$0xe]  ;;  %v1391_v46 = vrot.slane %v1389_v12, 4  ;;  %v3951_v0 = vrot.slane %v3949_v35, 4  ;;  %v8299_v58 = vrot.slane %v3958_v19, 5  ;;  %v3964_v22 = vrot.slane %v3962_v42, 4 }
  0xdf   : > { %6455 = vmatprep.subr.bf16.mxu1 %v7107_v13  ;;  %v3954_v2 = vrot.slane %v3952_v8, 5  ;;  %v3913_v3 = vsel %vm7317_vm2, %v3908_v61, %v8237_v38  ;;  %v8309_v6 = vsel %vm7563_vm5, %v5418_v44, %v1389_v12  ;;  %v3973_v54 = vshrl.u32 %v5786_v17, 16  ;;  %v7175_v38 = vld [vmem:[%s7285_s14 + $0xb0] sm:$0x1]  ;;  %v1260_v19 = vld [vmem:[%s7285_s14 + $0xb4] sm:$0xe] }
  0xe0   : > { %v3976_v52 = vshll.u32 %v5786_v17, 16  ;;  %v3923_v53 = vsel %vm7317_vm2, %v3918_v25, %v3922_v36  ;;  %v8318_v51 = vsel %vm7563_vm5, %v1391_v46, %v1392_v1  ;;  %v5419_v35 = vrot.slane %v1259_v30, 9  ;;  %v8340_v30 = vld [vmem:[%s7285_s14 + $0x74] sm:$0x1]  ;;  %v7176_v25 = vld [vmem:[%s7285_s14 + $0xb8] sm:$0xf] }
  0xe1   : > { %v1399_v8 = vrot.slane %v7175_v38, 5  ;;  %v9161_v12 = vcombine.low %v8012_v49, %v8026_v4  ;;  %v3937_v42 = vsel %vm7317_vm2, %v3932_v5, %v8239_v34  ;;  %v3947_v61 = vsel %vm7317_vm2, %v3942_v18, %v3946_v10  ;;  %v7108_v4 = vld [vmem:[%s7285_s14 + $0xcc] sm:$0xff]   ;;  %9163 = vst [vmem:[#allocation7_spill] sm:$0xff] %v8340_v30  ;;  %v5792_v38 = vld [vmem:[%s7285_s14 + $0x84] sm:$0xf] }
  0xe2   : > { %6456 = vmatpush3.bf16.msra.mxu1 %v7107_v13  ;;  %v8312_v13 = vld [vmem:[%s7285_s14 + $0x70] sm:$0xf]  ;;  %v1398_v36 = vrot.slane %v1396_v28, 4  ;;  %v3968_v44 = vshll.u32 %v8291_v47, 16  ;;  %v9162_v49 = vcombine.low %v8048_v26, %v8052_v56  ;;  %v3965_v1 = vor.u32 %v3964_v22, %v8299_v58  ;;  %v8357_v22 = vld [vmem:[%s7285_s14 + $0x7c] sm:$0xf] }
  0xe3   : > { %6457 = vmatprep.subr.bf16.mxu1 %v7110_v24  ;;  %9160 = vst [vmem:[#allocation6_spill] sm:$0xff] %v8312_v13  ;;  %v3982_v34 = vshll.u32 %v8312_v13, 16  ;;  %v3986_v10 = vshrl.u32 %v8312_v13, 16  ;;  %v5420_v17 = vrot.slane %v1260_v19, 9  ;;  %v1403_v46 = vrot.slane %v7176_v25, 5  ;;  %9164 = vst [vmem:[#allocation8_spill] sm:$0xff] %v8357_v22 }
  0xe4   : > { %6634 = vmatmul.mubr.bf16.gmra.mrb[24].mxu0 %v7104_v23  ;;  %v7114_v23 = vld [vmem:[%s9128_s1 + $0xf0] sm:$0xff]   ;;  %v3975_v26 = vrot.slane %v3973_v54, 4  ;;  %v3978_v56 = vrot.slane %v3976_v52, 5  ;;  %v8348_v18 = vcombine.low %v3913_v3, %v3923_v53  ;;  %v8360_v19 = vcombine.low %v3937_v42, %v3947_v61  ;;  %v7177_v3 = vld [vmem:[%s7285_s14 + $0xbc] sm:$0x1] }
  0xe5   : > { %6426 = vmatmul.mubr.bf16.gmra.mrb[8].mxu1 %v9161_v12  ;;  %6637 = vmatprep.mubr.bf16.mxu0 %v7106_v62  ;;  %v3955_v62 = vor.u32 %v3954_v2, %v3951_v0  ;;  %v8354_v2 = vsel %vm7563_vm5, %v5419_v35, %v1396_v28  ;;  %v8364_v54 = vsel %vm7563_vm5, %v1398_v36, %v1399_v8  ;;  %v8366_v52 = vrot.slane %v3968_v44, 5  ;;  %v7116_v12 = vld [vmem:[%s9128_s1 + $0xf8] sm:$0xff]   ;;  %v8373_v28 = vld [vmem:[%s7285_s14 + $0x88] sm:$0xf] }
  0xe6   : > { %6429 = vmatprep.mubr.bf16.mxu1 %v9162_v49  ;;  %6458 = vmatpush3.bf16.msra.mxu1 %v7110_v24  ;;  %v5789_v24 = vld [vmem:[%s7285_s14 + $0x78] sm:$0xf]  ;;  %v1406_v53 = vrot.slane %v7177_v3, 5  ;;  %9165 = vst [vmem:[#allocation9_spill] sm:$0xff] %v8373_v28  ;;  %v8377_v42 = vrot.slane %v3965_v1, 4  ;;  %v8379_v61 = vrot.slane %v3982_v34, 5  ;;  %v8383_v36 = vsel %vm7563_vm5, %v5420_v17, %v1403_v46 }
  0xe7   : > { %6459 = vmatprep.subr.bf16.mxu1 %v7112_v41  ;;  %v8375_v35 = vrot.slane %v3955_v62, 4  ;;  %v3988_v8 = vrot.slane %v3986_v10, 4  ;;  %v1405_v44 = vrot.slane %v1403_v46, 4  ;;  %v3979_v49 = vor.u32 %v3978_v56, %v3975_v26  ;;  %v5795_v3 = vld [vmem:[%s7285_s14 + $0x90] sm:$0xf] }
  0xe8   : > { %v3992_v25 = vshll.u32 %v8340_v30, 16  ;;  %v4000_v0 = vshll.u32 %v5789_v24, 16  ;;  %v4006_v62 = vshll.u32 %v8357_v22, 16  ;;  %v4010_v1 = vshrl.u32 %v8357_v22, 16  ;;  %v8390_v34 = vld [vmem:[%s7285_s14 + $0x94] sm:$0xf] }
  0xe9   : > { %9166 = vst [vmem:[#allocation10_spill] sm:$0xff] %v8390_v34  ;;  %v9167_v10 = vcombine.low %v8092_v27, %v8096_v29  ;;  %v4021_v17 = vshrl.u32 %v5792_v38, 16  ;;  %v4024_v46 = vshll.u32 %v5792_v38, 16  ;;  %v4034_v26 = vshrl.u32 %v8373_v28, 16  ;;  %v5798_v38 = vld [vmem:[%s7285_s14 + $0x9c] sm:$0xf] }
  0xea   : > { %6460 = vmatpush3.bf16.msra.mxu1 %v7112_v41  ;;  %v3997_v41 = vshrl.u32 %v5789_v24, 16  ;;  %v9168_v56 = vcombine.low %v8103_v45, %v8107_v14  ;;  %v3989_v29 = vor.u32 %v3988_v8, %v8379_v61  ;;  %v4048_v24 = vshll.u32 %v5795_v3, 16  ;;  %v8412_v45 = vld [vmem:[%s7285_s14 + $0x80] sm:$0x1] }
  0xeb   : > { %6461 = vmatprep.subr.bf16.mxu1 %v7114_v23  ;;  %v8409_v5 = vrot.slane %v3992_v25, 5  ;;  %9169 = vst [vmem:[#allocation11_spill] sm:$0xff] %v8412_v45  ;;  %v4054_v14 = vshll.u32 %v8390_v34, 16  ;;  %v4002_v27 = vrot.slane %v4000_v0, 5  ;;  %v4012_v8 = vrot.slane %v4010_v1, 4 }
  0xec   : > { %6638 = vmatmul.mubr.bf16.gmra.mrb[28].mxu0 %v7108_v4  ;;  %v4030_v4 = vshll.u32 %v8373_v28, 16  ;;  %v8416_v28 = vrot.slane %v4006_v62, 5  ;;  %v8422_v22 = vld [vmem:[%s7285_s14 + $0xa0] sm:$0xf]  ;;  %v4023_v25 = vrot.slane %v4021_v17, 4  ;;  %v4026_v30 = vrot.slane %v4024_v46, 5 }
  0xed   : > { %6430 = vmatmul.mubr.bf16.gmra.mrb[12].mxu1 %v9167_v10  ;;  %6657 = vmatprep.mubr.bf16.mxu0 %v8161_v59  ;;  %v4045_v59 = vshrl.u32 %v5795_v3, 16  ;;  %v8407_v10 = vrot.slane %v3979_v49, 4  ;;  %v8419_v3 = vld [vmem:[%s7285_s14 + $0x8c] sm:$0x1]  ;;  %9171 = vst [vmem:[#allocation13_spill] sm:$0xff] %v8422_v22  ;;  %v4036_v47 = vrot.slane %v4034_v26, 4  ;;  %v8439_v62 = vsel %vm7563_vm5, %v1405_v44, %v1406_v53 }
  0xee   : > { %6433 = vmatprep.mubr.bf16.mxu1 %v9168_v56  ;;  %6462 = vmatpush3.bf16.msra.mxu1 %v7114_v23  ;;  %v4058_v23 = vshrl.u32 %v8390_v34, 16  ;;  %v3999_v56 = vrot.slane %v3997_v41, 4  ;;  %9170 = vst [vmem:[#allocation12_spill] sm:$0xff] %v8419_v3  ;;  %v7113_v49 = vld [vmem:[%s9128_s1 + $0x208] sm:$0xff]   ;;  %v8427_v13 = vrot.slane %v4030_v4, 5  ;;  %v4050_v34 = vrot.slane %v4048_v24, 5 }
  0xef   : > { %6463 = vmatprep.subr.bf16.mxu1 %v7116_v12  ;;  %v5801_v41 = vld [vmem:[%s7285_s14 + $0xa8] sm:$0xf]  ;;  %v4047_v1 = vrot.slane %v4045_v59, 4  ;;  %v8444_v17 = vld [vmem:[%s9128_s1 + $0x100] sm:$0xff]   ;;  %v8447_v46 = vrot.slane %v4054_v14, 5  ;;  %v4069_v26 = vshrl.u32 %v5798_v38, 16  ;;  %v9174_v24 = vcombine.low %v8111_v16, %v8121_v15 }
  0xf0   : > { %9173 = vst [vmem:[#allocation15_spill] sm:$0xff] %v8444_v17  ;;  %v4060_v4 = vrot.slane %v4058_v23, 4  ;;  %v4072_v0 = vshll.u32 %v5798_v38, 16  ;;  %v8450_v53 = vrot.slane %v3989_v29, 4  ;;  %v4078_v44 = vshll.u32 %v8422_v22, 16  ;;  %v7115_v16 = vld [vmem:[%s9128_s1 + $0x210] sm:$0xff]  }
  0xf1   : > { %v4082_v59 = vshrl.u32 %v8422_v22, 16  ;;  %v4003_v14 = vor.u32 %v4002_v27, %v3999_v56  ;;  %v4013_v38 = vor.u32 %v4012_v8, %v8416_v28  ;;  %v4027_v23 = vor.u32 %v4026_v30, %v4023_v25  ;;  %v8462_v29 = vld [vmem:[%s7285_s14 + $0xac] sm:$0xf]  ;;  %v8475_v25 = vld [vmem:[%s7285_s14 + $0xa4] sm:$0x1] }
  0xf2   : > { %6464 = vmatpush3.bf16.msra.mxu1 %v7116_v12  ;;  %v4016_v12 = vshll.u32 %v8412_v45, 16  ;;  %9175 = vst [vmem:[#allocation16_spill] sm:$0xff] %v8462_v29  ;;  %v4037_v15 = vor.u32 %v4036_v47, %v8427_v13  ;;  %v4093_v27 = vshrl.u32 %v5801_v41, 16  ;;  %v4096_v30 = vshll.u32 %v5801_v41, 16 }
  0xf3   : > { %6737 = vmatprep.subr.bf16.mxu1 %v8444_v17  ;;  %v9176_v17 = vcombine.low %v8167_v20, %v8188_v7  ;;  %v4051_v56 = vor.u32 %v4050_v34, %v4047_v1  ;;  %v4061_v8 = vor.u32 %v4060_v4, %v8447_v46  ;;  %v4071_v20 = vrot.slane %v4069_v26, 4 }
  0xf4   : > { %6658 = vmatmul.mubr.bf16.vlgmr.msra.gmra.mrb[0].mxu0 %v8244_v50  ;;  %v4040_v50 = vshll.u32 %v8419_v3, 16  ;;  %v4074_v7 = vrot.slane %v4072_v0, 5  ;;  %v4106_v22 = vshrl.u32 %v8462_v29, 16  ;;  %v4004_v47 = vrot.slane %v4003_v14, 4  ;;  %v7117_v0 = vld [vmem:[%s9128_s1 + $0x218] sm:$0xff]  }
  0xf5   : > { %6434 = vmatmul.mubr.bf16.gmra.mrb[16].mxu1 %v9174_v24  ;;  %6690 = vmatpush3.bf16.msra.mxu0 %v8148_v21  ;;  %v4064_v21 = vshll.u32 %v8430_v39, 16  ;;  %v4102_v24 = vshll.u32 %v8462_v29, 16  ;;  %v4014_v39 = vrot.slane %v4013_v38, 4  ;;  %v4018_v3 = vrot.slane %v4016_v12, 5 }
  0xf6   : > { %6437 = vmatprep.mubr.bf16.mxu1 %v9176_v17  ;;  %6661 = vmatprep.mubr.bf16.mxu0 %v8248_v48  ;;  %v8477_v17 = vrot.slane %v4078_v44, 5  ;;  %v4084_v48 = vrot.slane %v4082_v59, 4  ;;  %v4042_v41 = vrot.slane %v4040_v50, 5  ;;  %v4028_v34 = vrot.slane %v4027_v23, 4 }
  0xf7   : > { %6691 = vmatprep.subr.bf16.mxu0 %v7113_v49  ;;  %v4038_v1 = vrot.slane %v4037_v15, 4  ;;  %v4095_v4 = vrot.slane %v4093_v27, 4  ;;  %v4098_v45 = vrot.slane %v4096_v30, 5  ;;  %v4052_v26 = vrot.slane %v4051_v56, 4  ;;  %v8543_v27 = vld [vmem:[%s7285_s14 + $0xbc] sm:$0x1] }
  0xf8   : > { %v4066_v44 = vrot.slane %v4064_v21, 5  ;;  %v4075_v59 = vor.u32 %v4074_v7, %v4071_v20  ;;  %v4088_v29 = vshll.u32 %v8475_v25, 16  ;;  %v4085_v12 = vor.u32 %v4084_v48, %v8477_v17  ;;  %v8510_v21 = vld [vmem:[%s7285_s14 + $0xb0] sm:$0x1] }
  0xf9   : > { %6692 = vmatpush3.bf16.msra.mxu0 %v7113_v49  ;;  %v4062_v49 = vrot.slane %v4061_v8, 4  ;;  %v8487_v14 = vrot.slane %v4102_v24, 5  ;;  %v4108_v38 = vrot.slane %v4106_v22, 4  ;;  %v9177_v23 = vor.u32 %v7895_v57, %v7893_v11 }
  0xfa   : > { %6693 = vmatprep.subr.bf16.mxu0 %v7115_v16  ;;  %v9178_v15 = vcombine.low %v8200_v40, %v8225_v60  ;;  %v3995_v22 = vsel %vm7317_vm2, %v8450_v53, %v8409_v5  ;;  %v4009_v57 = vsel %vm7317_vm2, %v4004_v47, %v8416_v28  ;;  %v9179_v40 = vcombine.low %v8255_v31, %v8297_v43  ;;  %v7120_v31 = vld [vmem:[%s9128_s1 + $0x220] sm:$0xff]  }
  0xfb   : > { %v8492_v50 = vrot.slane %v9177_v23, 4  ;;  %v4019_v60 = vsel %vm7317_vm2, %v4014_v39, %v4018_v3  ;;  %v4099_v5 = vor.u32 %v4098_v45, %v4095_v4  ;;  %v4043_v28 = vsel %vm7317_vm2, %v4038_v1, %v4042_v41  ;;  %v5857_v41 = vld [vmem:[%s7285_s14 + $0x48] sm:$0xe] }
  0xfc   : > { %6662 = vmatmul.mubr.bf16.gmra.mrb[4].mxu0 %v8293_v55  ;;  %v3985_v55 = vsel %vm7317_vm2, %v8407_v10, %v8379_v61  ;;  %v5804_v61 = vld [vmem:[%s7285_s14 + $0xb4] sm:$0xf]  ;;  %v8522_v10 = vld [vmem:[%s7285_s14 + $0xb8] sm:$0xf]  ;;  %v4057_v39 = vsel %vm7317_vm2, %v4052_v26, %v8447_v46  ;;  %v8532_v43 = vrot.slane %v4075_v59, 4  ;;  %v8534_v3 = vrot.slane %v4088_v29, 5 }
  0xfd   : > { %6438 = vmatmul.mubr.bf16.gmra.mrb[20].mxu1 %v9178_v15  ;;  %6665 = vmatprep.mubr.bf16.mxu0 %v8348_v18  ;;  %v4033_v18 = vsel %vm7317_vm2, %v4028_v34, %v8427_v13  ;;  %v4067_v13 = vsel %vm7317_vm2, %v4062_v49, %v4066_v44  ;;  %v8538_v45 = vrot.slane %v4085_v12, 4  ;;  %v4109_v53 = vor.u32 %v4108_v38, %v8487_v14  ;;  %v5858_v26 = vld [vmem:[%s7285_s14 + $0x54] sm:$0xe] }
  0xfe   : > { %6441 = vmatprep.mubr.bf16.mxu1 %v9179_v40  ;;  %6694 = vmatpush3.bf16.msra.mxu0 %v7115_v16  ;;  %v4112_v16 = vshll.u32 %v8510_v21, 16  ;;  %v9180_v46 = vsel %vm7317_vm2, %v8377_v42, %v8366_v52  ;;  %v9181_v29 = vsel %vm7317_vm2, %v8375_v35, %v8299_v58  ;;  %v4117_v56 = vshrl.u32 %v5804_v61, 16 }
  0xff   : > { %6695 = vmatprep.subr.bf16.mxu0 %v7117_v0  ;;  %v5835_v30 = vcombine.low %v9181_v29, %v9180_v46  ;;  %v4120_v8 = vshll.u32 %v5804_v61, 16  ;;  %v4126_v20 = vshll.u32 %v8522_v10, 16  ;;  %v5451_v7 = vcombine.low %v8354_v2, %v8364_v54  ;;  %v7123_v2 = vld [vmem:[%s9128_s1 + $0x228] sm:$0xff]   ;;  %v5807_v54 = vld [vmem:[%s7285_s14 + $0xc0] sm:$0xf]  ;;  %v9185_v29 = vld [vmem:[#allocation5_spill] sm:$0xff] }
 0x100   : > { %v5452_v48 = vcombine.low %v8383_v36, %v8439_v62  ;;  %v5836_v24 = vcombine.low %v3985_v55, %v3995_v22  ;;  %v8560_v52 = vrot.slane %v4099_v5, 4  ;;  %v5837_v42 = vcombine.low %v4009_v57, %v4019_v60 }
 0x101   : > { %v8562_v58 = vcombine.low %v4033_v18, %v4043_v28  ;;  %v8564_v35 = vcombine.low %v4057_v39, %v4067_v13  ;;  %v4081_v47 = vsel %vm7317_vm2, %v8532_v43, %v8477_v17  ;;  %v4091_v34 = vsel %vm7317_vm2, %v8538_v45, %v8534_v3  ;;  %v5860_v28 = vld [vmem:[%s7285_s14 + $0x6c] sm:$0xe] }
 0x102   : > { %6696 = vmatpush3.bf16.msra.mxu0 %v7117_v0  ;;  %v8580_v1 = vrot.slane %v4109_v53, 4  ;;  %v8582_v4 = vrot.slane %v4112_v16, 5  ;;  %v4130_v0 = vshrl.u32 %v8522_v10, 16  ;;  %v9182_v44 = vcombine.low %v8309_v6, %v8318_v51  ;;  %v7126_v6 = vld [vmem:[%s9128_s1 + $0x230] sm:$0xff]   ;;  %v8604_v51 = vld [vmem:[%s7285_s14 + $0xc4] sm:$0xf] }
 0x103   : > { %6697 = vmatprep.subr.bf16.mxu0 %v7120_v31  ;;  %v8589_v59 = vrot.slane %v4117_v56, 4  ;;  %v8593_v49 = vrot.slane %v4126_v20, 5  ;;  %v4136_v12 = vshll.u32 %v8543_v27, 16  ;;  %v4105_v38 = vsel %vm7317_vm2, %v8560_v52, %v8487_v14  ;;  %v5859_v14 = vld [vmem:[%s7285_s14 + $0x60] sm:$0xe]  ;;  %v9183_v39 = vld [vmem:[#allocation3_spill] sm:$0xff] }
 0x104   : > { %6666 = vmatmul.mubr.bf16.gmra.mrb[8].mxu0 %v8360_v19  ;;  %v8591_v19 = vrot.slane %v4120_v8, 5  ;;  %v4141_v23 = vshrl.u32 %v5807_v54, 16  ;;  %v5873_v15 = vrot.slane %v5857_v41, 9  ;;  %v4604_v55 = vrot.slane %v8180_v32, 5  ;;  %v7118_v13 = vld [vmem:[%s7285_s14 + $0xc] sm:$0xff]   ;;  %v7129_v56 = vld [vmem:[%s9128_s1 + $0x238] sm:$0xff]  }
 0x105   : > { %6442 = vmatmul.mubr.bf16.gmra.mrb[24].mxu1 %v9182_v44  ;;  %6669 = vmatprep.mubr.bf16.mxu0 %v5835_v30  ;;  %v4144_v22 = vshll.u32 %v5807_v54, 16  ;;  %v4607_v57 = vrot.slane %v8228_v63, 5  ;;  %v5874_v40 = vrot.slane %v5858_v26, 9  ;;  %v4611_v60 = vrot.slane %v8192_v33, 5  ;;  %v9184_v16 = vld [vmem:[#allocation4_spill] sm:$0xff]  ;;  %v9186_v52 = vld [vmem:[#allocation6_spill] sm:$0xff] }
 0x106   : > { %6445 = vmatprep.mubr.bf16.mxu1 %v5451_v7  ;;  %6698 = vmatpush3.bf16.msra.mxu0 %v7120_v31  ;;  %v4115_v18 = vsel %vm7317_vm2, %v8580_v1, %v8582_v4  ;;  %v8614_v5 = vrot.slane %v4130_v0, 4  ;;  %v8618_v61 = vsel %vm7563_vm5, %v5873_v15, %v4604_v55  ;;  %v4606_v32 = vrot.slane %v4604_v55, 4  ;;  %v9187_v4 = vld [vmem:[#allocation7_spill] sm:$0xff] }
 0x107   : > { %6699 = vmatprep.subr.bf16.mxu0 %v7123_v2  ;;  %v4150_v31 = vshll.u32 %v8604_v51, 16  ;;  %v8624_v63 = vsel %vm7563_vm5, %v5874_v40, %v4611_v60  ;;  %v4613_v33 = vrot.slane %v4611_v60, 4  ;;  %v4614_v3 = vrot.slane %v9183_v39, 5  ;;  %v8655_v26 = vld [vmem:[%s7285_s14 + $0xc8] sm:$0x1]  ;;  %v7119_v40 = vld [vmem:[%s7285_s14 + $0x18] sm:$0xff]  }
 0x108   : > { %v8630_v45 = vsel %vm7563_vm5, %v4606_v32, %v4607_v57  ;;  %v5875_v53 = vrot.slane %v5859_v14, 9  ;;  %v4618_v46 = vrot.slane %v9184_v16, 5  ;;  %v4621_v30 = vrot.slane %v9185_v29, 5  ;;  %v7121_v39 = vld [vmem:[%s7285_s14 + $0x24] sm:$0xff]  }
 0x109   : > { %v5905_v8 = vcombine.low %v8618_v61, %v8630_v45  ;;  %v8641_v20 = vsel %vm7563_vm5, %v4613_v33, %v4614_v3  ;;  %v5876_v7 = vrot.slane %v5860_v28, 9  ;;  %v4628_v0 = vrot.slane %v9187_v4, 5  ;;  %v9189_v28 = vld [vmem:[#allocation11_spill] sm:$0xff]  ;;  %v5566_v61 = vld [vmem:[%s7285_s14 + $0x90] sm:$0xf] }
 0x10a   : > { %6700 = vmatpush3.bf16.msra.mxu0 %v7123_v2  ;;  %v4625_v2 = vrot.slane %v9186_v52, 5  ;;  %v5906_v54 = vcombine.low %v8624_v63, %v8641_v20  ;;  %v8648_v41 = vsel %vm7563_vm5, %v5875_v53, %v4618_v46  ;;  %v4620_v1 = vrot.slane %v4618_v46, 4  ;;  %v9190_v53 = vld [vmem:[#allocation2_spill] sm:$0xff]  ;;  %v7135_v45 = vld [vmem:[%s7285_s14 + $0xa8] sm:$0xff]  }
 0x10b   : > { %6701 = vmatprep.subr.bf16.mxu0 %v7126_v6  ;;  %v8657_v44 = vrot.slane %v4141_v23, 4  ;;  %v8670_v36 = vcombine.low %v4081_v47, %v4091_v34  ;;  %v4123_v62 = vor.u32 %v8591_v19, %v8589_v59  ;;  %v5861_v23 = vld [vmem:[%s7285_s14 + $0x78] sm:$0xe]  ;;  %v8682_v57 = vrot.slane %v4136_v12, 5  ;;  %v5810_v12 = vld [vmem:[%s7285_s14 + $0xcc] sm:$0xf] }
 0x10c   : > { %6670 = vmatmul.mubr.bf16.gmra.mrb[12].mxu0 %v5836_v24  ;;  %v8659_v24 = vrot.slane %v4144_v22, 5  ;;  %v8663_v15 = vsel %vm7563_vm5, %v5876_v7, %v4625_v2  ;;  %v4627_v55 = vrot.slane %v4625_v2, 4  ;;  %v8680_v22 = vcombine.low %v4105_v38, %v4115_v18  ;;  %v5560_v47 = vld [vmem:[%s7285_s14 + $0x78] sm:$0xf]  ;;  %v9188_v18 = vld [vmem:[#allocation8_spill] sm:$0xff] }
 0x10d   : > { %6446 = vmatmul.mubr.bf16.gmra.mrb[28].mxu1 %v5452_v48  ;;  %6673 = vmatprep.mubr.bf16.mxu0 %v5837_v42  ;;  %v4154_v48 = vshrl.u32 %v8604_v51, 16  ;;  %v8677_v42 = vsel %vm7563_vm5, %v4620_v1, %v4621_v30  ;;  %v4133_v34 = vor.u32 %v8614_v5, %v8593_v49  ;;  %v8693_v59 = vrot.slane %v4150_v31, 5  ;;  %v8707_v31 = vld [vmem:[%s7285_s14 + $0xd0] sm:$0xf]  ;;  %v9191_v1 = vld [vmem:[#allocation9_spill] sm:$0xff] }
 0x10e   : > { %6465 = vmatprep.mubr.bf16.mxu1 %v7118_v13  ;;  %6702 = vmatpush3.bf16.msra.mxu0 %v7126_v6  ;;  %v5907_v17 = vcombine.low %v8648_v41, %v8677_v42  ;;  %v8688_v43 = vsel %vm7563_vm5, %v4627_v55, %v4628_v0  ;;  %v4160_v19 = vshll.u32 %v8655_v26, 16  ;;  %v5862_v6 = vld [vmem:[%s7285_s14 + $0x84] sm:$0xe]  ;;  %v4147_v60 = vor.u32 %v8659_v24, %v8657_v44  ;;  %v9192_v24 = vld [vmem:[#allocation12_spill] sm:$0xff]  ;;  %v7199_v63 = vld [vmem:[%s7285_s14 + $0x8c] sm:$0x1] }
 0x10f   : > { %6703 = vmatprep.subr.bf16.mxu0 %v7129_v56  ;;  %v5908_v38 = vcombine.low %v8663_v15, %v8688_v43  ;;  %v5877_v14 = vrot.slane %v5861_v23, 9  ;;  %v4632_v32 = vrot.slane %v9188_v18, 5  ;;  %v4635_v33 = vrot.slane %v9189_v28, 5 }
 0x110   : > { %v4156_v5 = vrot.slane %v4154_v48, 4  ;;  %v2382_v3 = vshrl.u32 %v5560_v47, 16  ;;  %v2385_v13 = vshll.u32 %v5560_v47, 16  ;;  %v2404_v16 = vsel %vm7317_vm2, %v8492_v50, %v9190_v53 }
 0x111   : > { %v4165_v46 = vshrl.u32 %v5810_v12, 16  ;;  %v8715_v29 = vsel %vm7563_vm5, %v5877_v14, %v4632_v32  ;;  %v4634_v30 = vrot.slane %v4632_v32, 4  ;;  %v5878_v7 = vrot.slane %v5862_v6, 9  ;;  %v7179_v6 = vld [vmem:[%s9128_s1 + $0x108] sm:$0xff]  }
 0x112   : > { %6704 = vmatpush3.bf16.msra.mxu0 %v7129_v56  ;;  %v4168_v52 = vshll.u32 %v5810_v12, 16  ;;  %v2384_v2 = vrot.slane %v2382_v3, 4  ;;  %v2387_v56 = vrot.slane %v2385_v13, 5  ;;  %v4639_v4 = vrot.slane %v9191_v1, 5  ;;  %v5863_v12 = vld [vmem:[%s7285_s14 + $0x90] sm:$0xe] }
 0x113   : > { %v4174_v50 = vshll.u32 %v8707_v31, 16  ;;  %v4178_v0 = vshrl.u32 %v8707_v31, 16  ;;  %v8724_v44 = vsel %vm7563_vm5, %v4634_v30, %v4635_v33  ;;  %v4642_v55 = vrot.slane %v9192_v24, 5  ;;  %v7122_v3 = vld [vmem:[%s7285_s14 + $0x30] sm:$0xff]  }
 0x114   : > { %6674 = vmatmul.mubr.bf16.gmra.mrb[16].mxu0 %v8562_v58  ;;  %v9193_v58 = vld [vmem:[#allocation15_spill] sm:$0xff]  ;;  %v4157_v48 = vor.u32 %v4156_v5, %v8693_v59  ;;  %v2388_v23 = vor.u32 %v2387_v56, %v2384_v2  ;;  %v4641_v47 = vrot.slane %v4639_v4, 4  ;;  %v4134_v14 = vrot.slane %v4133_v34, 4  ;;  %v8745_v13 = vld [vmem:[%s7285_s14 + $0xd4] sm:$0x1]  ;;  %v9194_v2 = vld [vmem:[#allocation10_spill] sm:$0xff] }
 0x115   : > { %6466 = vmatmul.mubr.bf16.vlgmr.msra.gmra.mrb[0].mxu1 %v7119_v40  ;;  %6677 = vmatprep.mubr.bf16.mxu0 %v8564_v35  ;;  %v5909_v35 = vcombine.low %v8715_v29, %v8724_v44  ;;  %v4124_v40 = vrot.slane %v4123_v62, 4  ;;  %v4162_v18 = vrot.slane %v4160_v19, 5  ;;  %v8737_v32 = vsel %vm7563_vm5, %v5878_v7, %v4639_v4  ;;  %v7124_v19 = vld [vmem:[%s7285_s14 + $0x3c] sm:$0xff]   ;;  %v7180_v1 = vld [vmem:[%s9128_s1 + $0x110] sm:$0xff]  }
 0x116   : > { %6745 = vmatpush3.bf16.msra.mxu1 %v9193_v58  ;;  %6469 = vmatprep.mubr.bf16.mxu1 %v7121_v39  ;;  %v4167_v28 = vrot.slane %v4165_v46, 4  ;;  %v4170_v33 = vrot.slane %v4168_v52, 5  ;;  %v2389_v39 = vrot.slane %v2388_v23, 4  ;;  %v8741_v5 = vsel %vm7563_vm5, %v4641_v47, %v4642_v55  ;;  %v7181_v47 = vld [vmem:[%s7285_s14 + $0x1c] sm:$0xf] }
 0x117   : > { %6738 = vmatprep.subr.bf16.mxu1 %v7179_v6  ;;  %v8747_v53 = vrot.slane %v4174_v50, 5  ;;  %v4180_v30 = vrot.slane %v4178_v0, 4  ;;  %v5910_v62 = vcombine.low %v8737_v32, %v8741_v5  ;;  %v5879_v34 = vrot.slane %v5863_v12, 9 }
 0x118   : > { %v4148_v7 = vrot.slane %v4147_v60, 4  ;;  %v4158_v46 = vrot.slane %v4157_v48, 4  ;;  %v2394_v52 = vsel %vm7317_vm2, %v2389_v39, %v7893_v11  ;;  %v4646_v56 = vrot.slane %v9194_v2, 5  ;;  %v9195_v11 = vld [vmem:[#allocation14_spill] sm:$0xff]  ;;  %v7125_v39 = vld [vmem:[%s7285_s14 + $0x48] sm:$0xff]  }
 0x119   : > { %v4129_v4 = vsel %vm7317_vm2, %v4124_v40, %v8593_v49  ;;  %v4139_v60 = vsel %vm7317_vm2, %v4134_v14, %v8682_v57  ;;  %v8765_v50 = vcombine.low %v2394_v52, %v2404_v16  ;;  %v4649_v0 = vrot.slane %v9195_v11, 5  ;;  %v5853_v57 = vld [vmem:[%s7285_s14 + $0x18] sm:$0xe]  ;;  %v5864_v16 = vld [vmem:[%s7285_s14 + $0x9c] sm:$0xe] }
 0x11a   : > { %6746 = vmatpush3.bf16.msra.mxu1 %v7179_v6  ;;  %v4171_v24 = vor.u32 %v4170_v33, %v4167_v28  ;;  %v4184_v55 = vshll.u32 %v8745_v13, 16  ;;  %v8772_v58 = vsel %vm7563_vm5, %v5879_v34, %v4646_v56  ;;  %v4648_v48 = vrot.slane %v4646_v56, 4  ;;  %v7182_v40 = vld [vmem:[%s9128_s1 + $0x118] sm:$0xff]   ;;  %v7183_v2 = vld [vmem:[%s7285_s14 + $0x20] sm:$0x1] }
 0x11b   : > { %6739 = vmatprep.subr.bf16.mxu1 %v7180_v1  ;;  %v4181_v49 = vor.u32 %v4180_v30, %v8747_v53  ;;  %v4163_v23 = vsel %vm7317_vm2, %v4158_v46, %v4162_v18  ;;  %v4576_v12 = vrot.slane %v7181_v47, 5  ;;  %v5842_v6 = vcombine.low %v4129_v4, %v4139_v60  ;;  %v9196_v34 = vld [vmem:[#allocation13_spill] sm:$0xff]  ;;  %v5865_v11 = vld [vmem:[%s7285_s14 + $0xa8] sm:$0xe] }
 0x11c   : > { %6678 = vmatmul.mubr.bf16.gmra.mrb[20].mxu0 %v8670_v36  ;;  %v4153_v36 = vsel %vm7317_vm2, %v4148_v7, %v8693_v59  ;;  %v4172_v14 = vrot.slane %v4171_v24, 4  ;;  %v4186_v28 = vrot.slane %v4184_v55, 5  ;;  %v5869_v18 = vrot.slane %v5853_v57, 9  ;;  %v7127_v46 = vld [vmem:[%s7285_s14 + $0x54] sm:$0xff]   ;;  %v5854_v55 = vld [vmem:[%s7285_s14 + $0x24] sm:$0xe] }
 0x11d   : > { %6470 = vmatmul.mubr.bf16.gmra.mrb[4].mxu1 %v7122_v3  ;;  %6681 = vmatprep.mubr.bf16.mxu0 %v8680_v22  ;;  %v8786_v22 = vsel %vm7563_vm5, %v4648_v48, %v4649_v0  ;;  %v5880_v33 = vrot.slane %v5864_v16, 9  ;;  %v5843_v3 = vcombine.low %v4153_v36, %v4163_v23  ;;  %v4182_v30 = vrot.slane %v4181_v49, 4  ;;  %v7185_v48 = vld [vmem:[%s7285_s14 + $0x28] sm:$0xf]  ;;  %v7186_v36 = vld [vmem:[%s7285_s14 + $0x34] sm:$0xf] }
 0x11e   : > { %6473 = vmatprep.mubr.bf16.mxu1 %v7124_v19  ;;  %6747 = vmatpush3.bf16.msra.mxu1 %v7180_v1  ;;  %v5911_v59 = vcombine.low %v8772_v58, %v8786_v22  ;;  %v4653_v19 = vrot.slane %v9196_v34, 5  ;;  %v4656_v7 = vrot.slane %v8475_v25, 5  ;;  %v4578_v52 = vrot.slane %v4576_v12, 4  ;;  %v7184_v1 = vld [vmem:[%s9128_s1 + $0x120] sm:$0xff]  }
 0x11f   : > { %6740 = vmatprep.subr.bf16.mxu1 %v7182_v40  ;;  %v4579_v56 = vrot.slane %v7183_v2, 5  ;;  %v4577_v25 = vsel %vm7563_vm5, %v5869_v18, %v4576_v12  ;;  %v4177_v0 = vsel %vm7317_vm2, %v4172_v14, %v8747_v53  ;;  %v4187_v24 = vsel %vm7317_vm2, %v4182_v30, %v4186_v28  ;;  %v5855_v12 = vld [vmem:[%s7285_s14 + $0x30] sm:$0xe]  ;;  %v7128_v30 = vld [vmem:[%s7285_s14 + $0x60] sm:$0xff]  }
 0x120   : > { %v8803_v4 = vsel %vm7563_vm5, %v5880_v33, %v4653_v19  ;;  %v4655_v60 = vrot.slane %v4653_v19, 4  ;;  %v4583_v49 = vrot.slane %v7185_v48, 5  ;;  %v4590_v23 = vrot.slane %v7186_v36, 5  ;;  %v7188_v33 = vld [vmem:[%s7285_s14 + $0x2c] sm:$0x1] }
 0x121   : > { %v4580_v16 = vsel %vm7563_vm5, %v4578_v52, %v4579_v56  ;;  %v5881_v47 = vrot.slane %v5865_v11, 9  ;;  %v5844_v28 = vcombine.low %v4177_v0, %v4187_v24  ;;  %v5870_v18 = vrot.slane %v5854_v55, 9  ;;  %v7130_v52 = vld [vmem:[%s7285_s14 + $0x6c] sm:$0xff]   ;;  %v5866_v11 = vld [vmem:[%s7285_s14 + $0xb4] sm:$0xe] }
 0x122   : > { %6748 = vmatpush3.bf16.msra.mxu1 %v7182_v40  ;;  %v8817_v57 = vsel %vm7563_vm5, %v4655_v60, %v4656_v7  ;;  %v9197_v40 = vld [vmem:[#allocation16_spill] sm:$0xff]  ;;  %v5901_v34 = vcombine.low %v4577_v25, %v4580_v16  ;;  %v4585_v19 = vrot.slane %v4583_v49, 4  ;;  %v5871_v2 = vrot.slane %v5855_v12, 9  ;;  %v5856_v0 = vld [vmem:[%s7285_s14 + $0x3c] sm:$0xe] }
 0x123   : > { %6741 = vmatprep.subr.bf16.mxu1 %v7184_v1  ;;  %v5912_v53 = vcombine.low %v8803_v4, %v8817_v57  ;;  %v4660_v14 = vrot.slane %v9197_v40, 5  ;;  %v4592_v56 = vrot.slane %v4590_v23, 4  ;;  %v7190_v24 = vld [vmem:[%s7285_s14 + $0x40] sm:$0xf]  ;;  %v4584_v48 = vsel %vm7563_vm5, %v5870_v18, %v4583_v49  ;;  %v7192_v18 = vld [vmem:[%s7285_s14 + $0x44] sm:$0x1] }
 0x124   : > { %6682 = vmatmul.mubr.bf16.gmra.mrb[24].mxu0 %v5842_v6  ;;  %v7187_v6 = vld [vmem:[%s9128_s1 + $0x128] sm:$0xff]   ;;  %v4597_v55 = vrot.slane %v7190_v24, 5  ;;  %v4667_v12 = vrot.slane %v8522_v10, 5  ;;  %v4591_v49 = vsel %vm7563_vm5, %v5871_v2, %v4590_v23  ;;  %v7193_v10 = vld [vmem:[%s9128_s1 + $0x138] sm:$0xff]   ;;  %v5867_v23 = vld [vmem:[%s7285_s14 + $0xc0] sm:$0xe] }
 0x125   : > { %6474 = vmatmul.mubr.bf16.gmra.mrb[8].mxu1 %v7125_v39  ;;  %6685 = vmatprep.mubr.bf16.mxu0 %v5843_v3  ;;  %v4586_v39 = vrot.slane %v7188_v33, 5  ;;  %v4663_v3 = vrot.slane %v8510_v21, 5  ;;  %v8834_v7 = vsel %vm7563_vm5, %v5881_v47, %v4660_v14  ;;  %v7191_v21 = vld [vmem:[%s9128_s1 + $0x130] sm:$0xff]   ;;  %v5882_v47 = vrot.slane %v5866_v11, 9 }
 0x126   : > { %6477 = vmatprep.mubr.bf16.mxu1 %v7127_v46  ;;  %6749 = vmatpush3.bf16.msra.mxu1 %v7184_v1  ;;  %v4662_v46 = vrot.slane %v4660_v14, 4  ;;  %v7189_v1 = vld [vmem:[%s7285_s14 + $0x38] sm:$0x1]  ;;  %v5872_v14 = vrot.slane %v5856_v0, 9  ;;  %v4600_v33 = vrot.slane %v7192_v18, 5  ;;  %v4674_v11 = vrot.slane %v8604_v51, 5 }
 0x127   : > { %6742 = vmatprep.subr.bf16.mxu1 %v7187_v6  ;;  %v4593_v60 = vrot.slane %v7189_v1, 5  ;;  %v4587_v36 = vsel %vm7563_vm5, %v4585_v19, %v4586_v39  ;;  %v4669_v39 = vrot.slane %v4667_v12, 4  ;;  %v5557_v19 = vld [vmem:[%s7285_s14 + $0x6c] sm:$0xf]  ;;  %v7133_v18 = vld [vmem:[%s7285_s14 + $0x90] sm:$0xff]   ;;  %v2425_v20 = vshll.u32 %v7199_v63, 16 }
 0x128   : > { %v8846_v25 = vsel %vm7563_vm5, %v4662_v46, %v4663_v3  ;;  %v5902_v3 = vcombine.low %v4584_v48, %v4587_v36  ;;  %v4598_v1 = vsel %vm7563_vm5, %v5872_v14, %v4597_v55  ;;  %v2358_v0 = vshrl.u32 %v5557_v19, 16  ;;  %v5868_v51 = vld [vmem:[%s7285_s14 + $0xcc] sm:$0xe] }
 0x129   : > { %v5913_v16 = vcombine.low %v8834_v7, %v8846_v25  ;;  %v4594_v40 = vsel %vm7563_vm5, %v4592_v56, %v4593_v60  ;;  %v5883_v56 = vrot.slane %v5867_v23, 9  ;;  %v2361_v24 = vshll.u32 %v5557_v19, 16 }
 0x12a   : > { %6750 = vmatpush3.bf16.msra.mxu1 %v7187_v6  ;;  %v4670_v6 = vrot.slane %v8543_v27, 5  ;;  %v8866_v27 = vsel %vm7563_vm5, %v5882_v47, %v4667_v12  ;;  %v4677_v36 = vrot.slane %v8655_v26, 5  ;;  %v4676_v12 = vrot.slane %v4674_v11, 4 }
 0x12b   : > { %6743 = vmatprep.subr.bf16.mxu1 %v7191_v21  ;;  %v2363_v26 = vrot.slane %v2361_v24, 5  ;;  %v4684_v23 = vrot.slane %v8745_v13, 5 }
 0x12c   : > { %6686 = vmatmul.mubr.bf16.gmra.mrb[28].mxu0 %v5844_v28  ;;  %v4599_v28 = vrot.slane %v4597_v55, 4  ;;  %v8873_v46 = vsel %vm7563_vm5, %v4669_v39, %v4670_v6  ;;  %v8887_v55 = vsel %vm7563_vm5, %v5883_v56, %v4674_v11  ;;  %v4681_v39 = vrot.slane %v8707_v31, 5  ;;  %v7195_v56 = vld [vmem:[%s7285_s14 + $0x74] sm:$0x1] }
 0x12d   : > { %6478 = vmatmul.mubr.bf16.gmra.mrb[12].mxu1 %v7128_v30  ;;  %6705 = vmatprep.mubr.bf16.mxu0 %v5901_v34  ;;  %v7131_v30 = vld [vmem:[%s7285_s14 + $0x78] sm:$0xff]   ;;  %v5903_v34 = vcombine.low %v4591_v49, %v4594_v40  ;;  %v5914_v2 = vcombine.low %v8866_v27, %v8873_v46  ;;  %v8892_v49 = vsel %vm7563_vm5, %v4676_v12, %v4677_v36  ;;  %v2360_v40 = vrot.slane %v2358_v0, 4  ;;  %v7196_v0 = vld [vmem:[%s7285_s14 + $0x88] sm:$0xf] }
 0x12e   : > { %6481 = vmatprep.mubr.bf16.mxu1 %v7130_v52  ;;  %6751 = vmatpush3.bf16.msra.mxu1 %v7191_v21  ;;  %v7132_v52 = vld [vmem:[%s7285_s14 + $0x84] sm:$0xff]   ;;  %v4601_v60 = vsel %vm7563_vm5, %v4599_v28, %v4600_v33  ;;  %v7194_v21 = vld [vmem:[%s7285_s14 + $0x70] sm:$0xf]  ;;  %v5915_v28 = vcombine.low %v8887_v55, %v8892_v49  ;;  %v4683_v19 = vrot.slane %v4681_v39, 4  ;;  %v2415_v24 = vshll.u32 %v7196_v0, 16 }
 0x12f   : > { %6744 = vmatprep.subr.bf16.mxu1 %v7193_v10  ;;  %v2367_v48 = vshll.u32 %v7194_v21, 16  ;;  %v2371_v47 = vshrl.u32 %v7194_v21, 16  ;;  %v5904_v6 = vcombine.low %v4598_v1, %v4601_v60  ;;  %v2377_v1 = vshll.u32 %v7195_v56, 16 }
 0x130   : > { %v8914_v11 = vsel %vm7563_vm5, %v4683_v19, %v4684_v23  ;;  %v2419_v21 = vshrl.u32 %v7196_v0, 16  ;;  %v7198_v19 = vld [vmem:[%s7285_s14 + $0xa0] sm:$0xf] }
 0x131   : > { %v8894_v14 = vrot.slane %v2367_v48, 5  ;;  %v2373_v33 = vrot.slane %v2371_v47, 4  ;;  %v2467_v56 = vshrl.u32 %v7198_v19, 16 }
 0x132   : > { %6752 = vmatpush3.bf16.msra.mxu1 %v7193_v10  ;;  %v5884_v10 = vrot.slane %v5868_v51, 9 }
 0x133   : > { %v2374_v31 = vor.u32 %v2373_v33, %v8894_v14  ;;  %v2433_v33 = vshll.u32 %v5566_v61, 16 }
 0x134   : > { %6706 = vmatmul.mubr.bf16.vlgmr.msra.gmra.mrb[0].mxu0 %v5902_v3  ;;  %v7134_v3 = vld [vmem:[%s7285_s14 + $0x9c] sm:$0xff]  }
 0x135   : > { %6482 = vmatmul.mubr.bf16.gmra.mrb[16].mxu1 %v7131_v30  ;;  %6709 = vmatprep.mubr.bf16.mxu0 %v5903_v34  ;;  %v5563_v30 = vld [vmem:[%s7285_s14 + $0x84] sm:$0xf]  ;;  %v8905_v34 = vsel %vm7563_vm5, %v5884_v10, %v4681_v39  ;;  %v2375_v47 = vrot.slane %v2374_v31, 4  ;;  %v7197_v10 = vld [vmem:[%s7285_s14 + $0x94] sm:$0xf]  ;;  %v2435_v0 = vrot.slane %v2433_v33, 5 }
 0x136   : > { %6485 = vmatprep.mubr.bf16.mxu1 %v7132_v52  ;;  %v2364_v52 = vor.u32 %v2363_v26, %v2360_v40  ;;  %v2406_v13 = vshrl.u32 %v5563_v30, 16  ;;  %v2409_v60 = vshll.u32 %v5563_v30, 16  ;;  %v5916_v48 = vcombine.low %v8905_v34, %v8914_v11 }
 0x137   : > { %v8923_v40 = vrot.slane %v2415_v24, 5  ;;  %v2421_v26 = vrot.slane %v2419_v21, 4  ;;  %v2439_v39 = vshll.u32 %v7197_v10, 16  ;;  %v2443_v23 = vshrl.u32 %v7197_v10, 16  ;;  %v7201_v10 = vld [vmem:[%s7285_s14 + $0xa4] sm:$0x1] }
 0x138   : > { %v2365_v36 = vrot.slane %v2364_v52, 4  ;;  %v2408_v12 = vrot.slane %v2406_v13, 4  ;;  %v2411_v51 = vrot.slane %v2409_v60, 5  ;;  %v2463_v52 = vshll.u32 %v7198_v19, 16  ;;  %v7202_v19 = vld [vmem:[%s7285_s14 + $0xac] sm:$0xf] }
 0x139   : > { %v2422_v13 = vor.u32 %v2421_v26, %v8923_v40  ;;  %v8940_v41 = vrot.slane %v2439_v39, 5  ;;  %v2445_v42 = vrot.slane %v2443_v23, 4  ;;  %v2469_v21 = vrot.slane %v2467_v56, 4  ;;  %v5575_v23 = vld [vmem:[%s7285_s14 + $0xb4] sm:$0xf] }
 0x13a   : > { %v2473_v39 = vshll.u32 %v7201_v10, 16  ;;  %v2491_v15 = vshrl.u32 %v7202_v19, 16  ;;  %v2505_v63 = vshll.u32 %v5575_v23, 16 }
 0x13b   : > { %v2446_v26 = vor.u32 %v2445_v42, %v8940_v41 }
 0x13c   : > { %6710 = vmatmul.mubr.bf16.gmra.mrb[4].mxu0 %v5904_v6  ;;  %v5569_v6 = vld [vmem:[%s7285_s14 + $0x9c] sm:$0xf] }
 0x13d   : > { %6486 = vmatmul.mubr.bf16.gmra.mrb[20].mxu1 %v7133_v18  ;;  %6713 = vmatprep.mubr.bf16.mxu0 %v5905_v8  ;;  %v2379_v8 = vrot.slane %v2377_v1, 5  ;;  %v2430_v18 = vshrl.u32 %v5566_v61, 16  ;;  %v2457_v30 = vshll.u32 %v5569_v6, 16  ;;  %v2370_v1 = vsel %vm7317_vm2, %v2365_v36, %v8894_v14  ;;  %v7137_v61 = vld [vmem:[%s7285_s14 + $0xc0] sm:$0xff]  }
 0x13e   : > { %6489 = vmatprep.mubr.bf16.mxu1 %v7134_v3  ;;  %v2454_v3 = vshrl.u32 %v5569_v6, 16  ;;  %v8942_v14 = vrot.slane %v2463_v52, 5  ;;  %v2487_v52 = vshll.u32 %v7202_v19, 16 }
 0x13f   : > { %v2380_v31 = vsel %vm7317_vm2, %v2375_v47, %v2379_v8  ;;  %v2432_v60 = vrot.slane %v2430_v18, 4  ;;  %v2459_v24 = vrot.slane %v2457_v30, 5  ;;  %v2427_v8 = vrot.slane %v2425_v20, 5  ;;  %v7203_v20 = vld [vmem:[%s7285_s14 + $0xb8] sm:$0xf] }
 0x140   : > { %v2423_v47 = vrot.slane %v2422_v13, 4  ;;  %v2470_v33 = vor.u32 %v2469_v21, %v8942_v14  ;;  %v2511_v29 = vshll.u32 %v7203_v20, 16  ;;  %v2515_v44 = vshrl.u32 %v7203_v20, 16 }
 0x142   : > { %v2471_v13 = vrot.slane %v2470_v33, 4 }
 0x144   : > { %6714 = vmatmul.mubr.bf16.gmra.mrb[8].mxu0 %v5906_v54  ;;  %v2412_v54 = vor.u32 %v2411_v51, %v2408_v12  ;;  %v2436_v12 = vor.u32 %v2435_v0, %v2432_v60  ;;  %v7200_v51 = vld [vmem:[%s7285_s14 + $0x98] sm:$0x1]  ;;  %v2475_v60 = vrot.slane %v2473_v39, 5 }
 0x145   : > { %6490 = vmatmul.mubr.bf16.gmra.mrb[24].mxu1 %v7135_v45  ;;  %6717 = vmatprep.mubr.bf16.mxu0 %v5907_v17  ;;  %v2456_v17 = vrot.slane %v2454_v3, 4  ;;  %v5605_v45 = vcombine.low %v2370_v1, %v2380_v31  ;;  %v2449_v6 = vshll.u32 %v7200_v51, 16  ;;  %v2502_v31 = vshrl.u32 %v5575_v23, 16 }
 0x146   : > { %6493 = vmatprep.mubr.bf16.mxu1 %v7136_v9  ;;  %v2413_v36 = vrot.slane %v2412_v54, 4  ;;  %v5572_v9 = vld [vmem:[%s7285_s14 + $0xa8] sm:$0xf]  ;;  %v2437_v56 = vrot.slane %v2436_v12, 4  ;;  %v2476_v32 = vsel %vm7317_vm2, %v2471_v13, %v2475_v60 }
 0x147   : > { %v2460_v18 = vor.u32 %v2459_v24, %v2456_v17  ;;  %v2478_v3 = vshrl.u32 %v5572_v9, 16  ;;  %v2481_v30 = vshll.u32 %v5572_v9, 16  ;;  %v2451_v1 = vrot.slane %v2449_v6, 5 }
 0x148   : > { %v2418_v43 = vsel %vm7317_vm2, %v2413_v36, %v8923_v40  ;;  %v2489_v17 = vrot.slane %v2487_v52, 5  ;;  %v2493_v24 = vrot.slane %v2491_v15, 4  ;;  %v2504_v21 = vrot.slane %v2502_v31, 4  ;;  %v5578_v36 = vld [vmem:[%s7285_s14 + $0xc0] sm:$0xf] }
 0x149   : > { %v2461_v54 = vrot.slane %v2460_v18, 4  ;;  %v2480_v0 = vrot.slane %v2478_v3, 4  ;;  %v2483_v42 = vrot.slane %v2481_v30, 5  ;;  %v2526_v9 = vshrl.u32 %v5578_v36, 16  ;;  %v7205_v18 = vld [vmem:[%s7285_s14 + $0xc4] sm:$0xf] }
 0x14a   : > { %v2535_v33 = vshll.u32 %v7205_v18, 16 }
 0x14b   : > { %v2466_v51 = vsel %vm7317_vm2, %v2461_v54, %v8942_v14  ;;  %v2484_v5 = vor.u32 %v2483_v42, %v2480_v0  ;;  %v2539_v14 = vshrl.u32 %v7205_v18, 16  ;;  %v2528_v19 = vrot.slane %v2526_v9, 4 }
 0x14c   : > { %6718 = vmatmul.mubr.bf16.gmra.mrb[12].mxu0 %v5908_v38  ;;  %v2428_v38 = vsel %vm7317_vm2, %v2423_v47, %v2427_v8  ;;  %v2517_v8 = vrot.slane %v2515_v44, 4  ;;  %v2442_v47 = vsel %vm7317_vm2, %v2437_v56, %v8940_v41  ;;  %v7204_v41 = vld [vmem:[%s7285_s14 + $0xb0] sm:$0x1]  ;;  %v5609_v58 = vcombine.low %v2466_v51, %v2476_v32  ;;  %v7207_v44 = vld [vmem:[%s7285_s14 + $0xc8] sm:$0x1] }
 0x14d   : > { %6494 = vmatmul.mubr.bf16.gmra.mrb[28].mxu1 %v7137_v61  ;;  %6721 = vmatprep.mubr.bf16.mxu0 %v5909_v35  ;;  %v2447_v35 = vrot.slane %v2446_v26, 4  ;;  %v5607_v40 = vcombine.low %v2418_v43, %v2428_v38  ;;  %v2507_v61 = vrot.slane %v2505_v63, 5  ;;  %v2497_v6 = vshll.u32 %v7204_v41, 16 }
 0x14e   : > { %6529 = vmatprep.mubr.bf16.mxu1 %v5605_v45  ;;  %v2513_v45 = vrot.slane %v2511_v29, 5  ;;  %v2529_v26 = vshll.u32 %v5578_v36, 16  ;;  %v2485_v22 = vrot.slane %v2484_v5, 4  ;;  %v2537_v15 = vrot.slane %v2535_v33, 5 }
 0x14f   : > { %v2452_v12 = vsel %vm7317_vm2, %v2447_v35, %v2451_v1  ;;  %v2508_v10 = vor.u32 %v2507_v61, %v2504_v21  ;;  %v2499_v30 = vrot.slane %v2497_v6, 5  ;;  %v2541_v43 = vrot.slane %v2539_v14, 4 }
 0x150   : > { %v2518_v39 = vor.u32 %v2517_v8, %v2513_v45  ;;  %v5608_v3 = vcombine.low %v2442_v47, %v2452_v12  ;;  %v2531_v52 = vrot.slane %v2529_v26, 5  ;;  %v2490_v31 = vsel %vm7317_vm2, %v2485_v22, %v2489_v17  ;;  %v9026_v8 = vld [vmem:[%s9129_s2] ss:$0 sm:$0xff] }
 0x151   : > { %v2509_v38 = vrot.slane %v2508_v10, 4  ;;  %v2542_v29 = vor.u32 %v2541_v43, %v2537_v15  ;;  %v2545_v35 = vshll.u32 %v7207_v44, 16  ;;  %v9031_v12 = vld [vmem:[%s9130_s3] ss:$0 sm:$0xff] }
 0x152   : > { %v2519_v56 = vrot.slane %v2518_v39, 4  ;;  %v2532_v20 = vor.u32 %v2531_v52, %v2528_v19 }
 0x153   : > { %v2514_v4 = vsel %vm7317_vm2, %v2509_v38, %v2513_v45  ;;  %v2547_v54 = vrot.slane %v2545_v35, 5 }
 0x154   : > { %6722 = vmatmul.mubr.bf16.gmra.mrb[16].mxu0 %v5910_v62  ;;  %v2494_v62 = vor.u32 %v2493_v24, %v2489_v17  ;;  %v2533_v25 = vrot.slane %v2532_v20, 4 }
 0x155   : > { %6530 = vmatmul.mubr.bf16.vlgmr.msra.gmra.mrb[16].mxu1 %v8765_v50  ;;  %6725 = vmatprep.mubr.bf16.mxu0 %v5911_v59  ;;  %v7206_v50 = vld [vmem:[%s7285_s14 + $0xbc] sm:$0x1] }
 0x156   : > { %6533 = vmatprep.mubr.bf16.mxu1 %v5607_v40  ;;  %v2521_v23 = vshll.u32 %v7206_v50, 16  ;;  %v2495_v59 = vrot.slane %v2494_v62, 4  ;;  %v2538_v13 = vsel %vm7317_vm2, %v2533_v25, %v2537_v15 }
 0x158   : > { %v2523_v1 = vrot.slane %v2521_v23, 5  ;;  %v2500_v63 = vsel %vm7317_vm2, %v2495_v59, %v2499_v30 }
 0x15a   : > { %v2524_v57 = vsel %vm7317_vm2, %v2519_v56, %v2523_v1 }
 0x15b   : > { %v5611_v7 = vcombine.low %v2514_v4, %v2524_v57 }
 0x15c   : > { %6726 = vmatmul.mubr.bf16.gmra.mrb[20].mxu0 %v5912_v53  ;;  %v5610_v53 = vcombine.low %v2490_v31, %v2500_v63 }
 0x15d   : > { %6534 = vmatmul.mubr.bf16.gmra.mrb[20].mxu1 %v5608_v3  ;;  %6729 = vmatprep.mubr.bf16.mxu0 %v5913_v16  ;;  %v2543_v16 = vrot.slane %v2542_v29, 4 }
 0x15e   : > { %6537 = vmatprep.mubr.bf16.mxu1 %v5609_v58 }
 0x15f   : > { %v2548_v60 = vsel %vm7317_vm2, %v2543_v16, %v2547_v54 }
 0x160   : > { %v5612_v0 = vcombine.low %v2538_v13, %v2548_v60 }
 0x164   : > { %6730 = vmatmul.mubr.bf16.gmra.mrb[24].mxu0 %v5914_v2 }
 0x165   : > { %6538 = vmatmul.mubr.bf16.gmra.mrb[24].mxu1 %v5610_v53  ;;  %6733 = vmatprep.mubr.bf16.mxu0 %v5915_v28 }
 0x166   : > { %6541 = vmatprep.mubr.bf16.mxu1 %v5611_v7 }
 0x16c   : > { %6734 = vmatmul.mubr.bf16.gmra.mrb[28].mxu0 %v5916_v48 }
 0x16d   : > { %6542 = vmatmul.mubr.bf16.gmra.mrb[28].mxu1 %v5612_v0 }
 0x1e8   : > { %v6467_v27 = vpop.f32.mrb[0].mxu1 }
 0x1e9   : > { %v1958_v46 = vpop.f32.mrb[1].mxu1 }
 0x1ea   : > { %v6468_v2 = vpop.f32.mrb[2].mxu1 }
 0x1eb   : > { %v1961_v42 = vpop.f32.mrb[3].mxu1 }
 0x1f0   : > { %v6471_v17 = vpop.f32.mrb[4].mxu1 }
 0x1f1   : > { %v1974_v55 = vpop.f32.mrb[5].mxu1 }
 0x1f2   : > { %v6472_v49 = vpop.f32.mrb[6].mxu1 }
 0x1f3   : > { %v1977_v28 = vpop.f32.mrb[7].mxu1 }
 0x1f8   : > { %v6475_v24 = vpop.f32.mrb[8].mxu1 }
 0x1f9   : > { %v1990_v40 = vpop.f32.mrb[9].mxu1 }
 0x1fa   : > { %v6476_v21 = vpop.f32.mrb[10].mxu1 }
 0x1fb   : > { %v9013_v61 = vpop.f32.mrb[11].mxu1 }
 0x200   : > { %v9015_v37 = vpop.f32.mrb[12].mxu1 }
 0x201   : > { %v9017_v45 = vpop.f32.mrb[13].mxu1 }
 0x202   : > { %v9019_v34 = vpop.f32.mrb[14].mxu1 }
 0x203   : > { %v9021_v11 = vpop.f32.mrb[15].mxu1 }
 0x207   : > { %v6707_v48 = vpop.f32.mrb[0].mxu0 }
 0x208   : > { %v6753_v36 = vadd.f32 %v6707_v48, %v6467_v27  ;;  %v4849_v47 = vpop.f32.mrb[1].mxu0 }
 0x209   : > { %v6754_v51 = vadd.f32 %v4849_v47, %v1958_v46  ;;  %v6708_v32 = vpop.f32.mrb[2].mxu0 }
 0x20a   : > { %v5017_v5 = vmul.f32 %v6753_v36, %v9026_v8  ;;  %v6755_v62 = vadd.f32 %v6708_v32, %v6468_v2  ;;  %v4852_v41 = vpop.f32.mrb[3].mxu0 }
 0x20b   : > { %v5015_v6 = vmul.f32 %v6754_v51, %v9026_v8  ;;  %v6756_v9 = vadd.f32 %v4852_v41, %v1961_v42 }
 0x20c   : > { %v5056_v26 = vadd.f32 %v9031_v12, %v5017_v5  ;;  %v5018_v18 = vmul.f32 %v6755_v62, %v9026_v8 }
 0x20d   : > { %v5054_v33 = vadd.f32 %v9031_v12, %v5015_v6  ;;  %v5016_v14 = vmul.f32 %v6756_v9, %v9026_v8 }
 0x20e   : > { %v5057_v10 = vadd.f32 %v9031_v12, %v5018_v18  ;;  %v5088_v23 = vmax.f32 %v5056_v26, 0.0 }
 0x20f   : > { %v5055_v39 = vadd.f32 %v9031_v12, %v5016_v14  ;;  %v6711_v50 = vpop.f32.mrb[4].mxu0  ;;  %v5086_v59 = vmax.f32 %v5054_v33, 0.0 }
 0x210   : > { %v5089_v3 = vmax.f32 %v5057_v10, 0.0  ;;  %v6757_v58 = vadd.f32 %v6711_v50, %v6471_v17  ;;  %v4865_v22 = vpop.f32.mrb[5].mxu0 }
 0x211   : > { %v5087_v30 = vmax.f32 %v5055_v39, 0.0  ;;  %v6758_v19 = vadd.f32 %v4865_v22, %v1974_v55  ;;  %v6712_v52 = vpop.f32.mrb[6].mxu0 }
 0x212   : > { %v6002_v15 = vpack.c.bf16 %v5089_v3, %v5088_v23  ;;  %v5021_v43 = vmul.f32 %v6757_v58, %v9026_v8  ;;  %v6759_v38 = vadd.f32 %v6712_v52, %v6472_v49  ;;  %v4868_v56 = vpop.f32.mrb[7].mxu0 }
 0x213   : > { %v5997_v1 = vpack.c.bf16 %v5087_v30, %v5086_v59  ;;  %v5019_v31 = vmul.f32 %v6758_v19, %v9026_v8  ;;  %v6760_v63 = vadd.f32 %v4868_v56, %v1977_v28 }
 0x214   : > { %6074 = vst [vmem:[%s9045_s25 + $0x8] sm:$0xff] %v6002_v15   ;;  %v5060_v20 = vadd.f32 %v9031_v12, %v5021_v43  ;;  %v5022_v29 = vmul.f32 %v6759_v38, %v9026_v8 }
 0x215   : > { %5998 = vst [vmem:[%s9045_s25] sm:$0xff] %v5997_v1   ;;  %v5058_v44 = vadd.f32 %v9031_v12, %v5019_v31  ;;  %v5020_v35 = vmul.f32 %v6760_v63, %v9026_v8 }
 0x216   : > { %v5061_v4 = vadd.f32 %v9031_v12, %v5022_v29  ;;  %v5092_v7 = vmax.f32 %v5060_v20, 0.0 }
 0x217   : > { %v5059_v57 = vadd.f32 %v9031_v12, %v5020_v35  ;;  %v6715_v53 = vpop.f32.mrb[8].mxu0  ;;  %v5090_v13 = vmax.f32 %v5058_v44, 0.0 }
 0x218   : > { %v5093_v25 = vmax.f32 %v5061_v4, 0.0  ;;  %v6761_v16 = vadd.f32 %v6715_v53, %v6475_v24  ;;  %v4881_v54 = vpop.f32.mrb[9].mxu0 }
 0x219   : > { %v5091_v60 = vmax.f32 %v5059_v57, 0.0  ;;  %v6762_v0 = vadd.f32 %v4881_v54, %v1990_v40  ;;  %v6716_v27 = vpop.f32.mrb[10].mxu0 }
 0x21a   : > { %v6012_v46 = vpack.c.bf16 %v5093_v25, %v5092_v7  ;;  %v5025_v2 = vmul.f32 %v6761_v16, %v9026_v8  ;;  %v6763_v42 = vadd.f32 %v6716_v27, %v6476_v21  ;;  %v4884_v17 = vpop.f32.mrb[11].mxu0 }
 0x21b   : > { %v6007_v55 = vpack.c.bf16 %v5091_v60, %v5090_v13  ;;  %v5023_v49 = vmul.f32 %v6762_v0, %v9026_v8  ;;  %v6764_v28 = vadd.f32 %v4884_v17, %v9013_v61 }
 0x21c   : > { %6076 = vst [vmem:[%s9045_s25 + $0x18] sm:$0xff] %v6012_v46   ;;  %v5064_v48 = vadd.f32 %v9031_v12, %v5025_v2  ;;  %v5026_v24 = vmul.f32 %v6763_v42, %v9026_v8 }
 0x21d   : > { %6075 = vst [vmem:[%s9045_s25 + $0x10] sm:$0xff] %v6007_v55   ;;  %v5062_v36 = vadd.f32 %v9031_v12, %v5023_v49  ;;  %v5024_v40 = vmul.f32 %v6764_v28, %v9026_v8 }
 0x21e   : > { %v5065_v47 = vadd.f32 %v9031_v12, %v5026_v24  ;;  %v5096_v32 = vmax.f32 %v5064_v48, 0.0 }
 0x21f   : > { %v5063_v21 = vadd.f32 %v9031_v12, %v5024_v40  ;;  %v6719_v51 = vpop.f32.mrb[12].mxu0  ;;  %v5094_v41 = vmax.f32 %v5062_v36, 0.0 }
 0x220   : > { %v5097_v5 = vmax.f32 %v5065_v47, 0.0  ;;  %v6765_v61 = vadd.f32 %v6719_v51, %v9015_v37  ;;  %v4897_v62 = vpop.f32.mrb[13].mxu0 }
 0x221   : > { %v5095_v6 = vmax.f32 %v5063_v21, 0.0  ;;  %v6766_v9 = vadd.f32 %v4897_v62, %v9017_v45  ;;  %v6720_v26 = vpop.f32.mrb[14].mxu0 }
 0x222   : > { %v6022_v18 = vpack.c.bf16 %v5097_v5, %v5096_v32  ;;  %v5029_v33 = vmul.f32 %v6765_v61, %v9026_v8  ;;  %v6767_v14 = vadd.f32 %v6720_v26, %v9019_v34  ;;  %v4900_v10 = vpop.f32.mrb[15].mxu0 }
 0x223   : > { %v6017_v39 = vpack.c.bf16 %v5095_v6, %v5094_v41  ;;  %v5027_v50 = vmul.f32 %v6766_v9, %v9026_v8  ;;  %v6768_v23 = vadd.f32 %v4900_v10, %v9021_v11 }
 0x224   : > { %6078 = vst [vmem:[%s9045_s25 + $0x28] sm:$0xff] %v6022_v18   ;;  %v5068_v37 = vadd.f32 %v9031_v12, %v5029_v33  ;;  %v5030_v3 = vmul.f32 %v6767_v14, %v9026_v8 }
 0x225   : > { %6077 = vst [vmem:[%s9045_s25 + $0x20] sm:$0xff] %v6017_v39   ;;  %v5066_v45 = vadd.f32 %v9031_v12, %v5027_v50  ;;  %v5028_v58 = vmul.f32 %v6768_v23, %v9026_v8 }
 0x226   : > { %v5069_v22 = vadd.f32 %v9031_v12, %v5030_v3  ;;  %v5100_v30 = vmax.f32 %v5068_v37, 0.0 }
 0x227   : > { %v5067_v34 = vadd.f32 %v9031_v12, %v5028_v58  ;;  %v6723_v59 = vpop.f32.mrb[16].mxu0  ;;  %v5098_v15 = vmax.f32 %v5066_v45, 0.0 }
 0x228   : > { %v5101_v19 = vmax.f32 %v5069_v22, 0.0  ;;  %v6531_v52 = vpop.f32.mrb[16].mxu1  ;;  %v4913_v11 = vpop.f32.mrb[17].mxu0 }
 0x229   : > { %v5099_v43 = vmax.f32 %v5067_v34, 0.0  ;;  %v6769_v38 = vadd.f32 %v6723_v59, %v6531_v52  ;;  %v2776_v56 = vpop.f32.mrb[17].mxu1  ;;  %v6724_v1 = vpop.f32.mrb[18].mxu0 }
 0x22a   : > { %v6032_v31 = vpack.c.bf16 %v5101_v19, %v5100_v30  ;;  %v6770_v63 = vadd.f32 %v4913_v11, %v2776_v56  ;;  %v6532_v20 = vpop.f32.mrb[18].mxu1  ;;  %v4916_v29 = vpop.f32.mrb[19].mxu0 }
 0x22b   : > { %v6027_v44 = vpack.c.bf16 %v5099_v43, %v5098_v15  ;;  %v5033_v35 = vmul.f32 %v6769_v38, %v9026_v8  ;;  %v6771_v4 = vadd.f32 %v6724_v1, %v6532_v20  ;;  %v2779_v57 = vpop.f32.mrb[19].mxu1 }
 0x22c   : > { %6080 = vst [vmem:[%s9045_s25 + $0x38] sm:$0xff] %v6032_v31   ;;  %v5031_v53 = vmul.f32 %v6770_v63, %v9026_v8  ;;  %v6772_v7 = vadd.f32 %v4916_v29, %v2779_v57 }
 0x22d   : > { %6079 = vst [vmem:[%s9045_s25 + $0x30] sm:$0xff] %v6027_v44   ;;  %v5072_v25 = vadd.f32 %v9031_v12, %v5033_v35  ;;  %v5034_v16 = vmul.f32 %v6771_v4, %v9026_v8 }
 0x22e   : > { %v5070_v54 = vadd.f32 %v9031_v12, %v5031_v53  ;;  %v5032_v13 = vmul.f32 %v6772_v7, %v9026_v8 }
 0x22f   : > { %v5073_v60 = vadd.f32 %v9031_v12, %v5034_v16  ;;  %v6727_v0 = vpop.f32.mrb[20].mxu0  ;;  %v5104_v42 = vmax.f32 %v5072_v25, 0.0 }
 0x230   : > { %v5071_v27 = vadd.f32 %v9031_v12, %v5032_v13  ;;  %v6535_v46 = vpop.f32.mrb[20].mxu1  ;;  %v4929_v2 = vpop.f32.mrb[21].mxu0  ;;  %v5102_v48 = vmax.f32 %v5070_v54, 0.0 }
 0x231   : > { %v5105_v17 = vmax.f32 %v5073_v60, 0.0  ;;  %v6773_v55 = vadd.f32 %v6727_v0, %v6535_v46  ;;  %v2792_v49 = vpop.f32.mrb[21].mxu1  ;;  %v6728_v28 = vpop.f32.mrb[22].mxu0 }
 0x232   : > { %v5103_v24 = vmax.f32 %v5071_v27, 0.0  ;;  %v6774_v36 = vadd.f32 %v4929_v2, %v2792_v49  ;;  %v6536_v40 = vpop.f32.mrb[22].mxu1  ;;  %v4932_v47 = vpop.f32.mrb[23].mxu0 }
 0x233   : > { %v6042_v21 = vpack.c.bf16 %v5105_v17, %v5104_v42  ;;  %v5037_v51 = vmul.f32 %v6773_v55, %v9026_v8  ;;  %v6775_v32 = vadd.f32 %v6728_v28, %v6536_v40  ;;  %v2795_v5 = vpop.f32.mrb[23].mxu1 }
 0x234   : > { %v6037_v61 = vpack.c.bf16 %v5103_v24, %v5102_v48  ;;  %v5035_v62 = vmul.f32 %v6774_v36, %v9026_v8  ;;  %v6776_v41 = vadd.f32 %v4932_v47, %v2795_v5 }
 0x235   : > { %6082 = vst [vmem:[%s9045_s25 + $0x48] sm:$0xff] %v6042_v21   ;;  %v5076_v6 = vadd.f32 %v9031_v12, %v5037_v51  ;;  %v5038_v9 = vmul.f32 %v6775_v32, %v9026_v8 }
 0x236   : > { %6081 = vst [vmem:[%s9045_s25 + $0x40] sm:$0xff] %v6037_v61   ;;  %v5074_v26 = vadd.f32 %v9031_v12, %v5035_v62  ;;  %v5036_v18 = vmul.f32 %v6776_v41, %v9026_v8 }
 0x237   : > { %v5077_v33 = vadd.f32 %v9031_v12, %v5038_v9  ;;  %v6731_v14 = vpop.f32.mrb[24].mxu0  ;;  %v5108_v23 = vmax.f32 %v5076_v6, 0.0 }
 0x238   : > { %v5075_v10 = vadd.f32 %v9031_v12, %v5036_v18  ;;  %v6539_v39 = vpop.f32.mrb[24].mxu1  ;;  %v4945_v50 = vpop.f32.mrb[25].mxu0  ;;  %v5106_v22 = vmax.f32 %v5074_v26, 0.0 }
 0x239   : > { %v5109_v37 = vmax.f32 %v5077_v33, 0.0  ;;  %v6777_v3 = vadd.f32 %v6731_v14, %v6539_v39  ;;  %v2808_v45 = vpop.f32.mrb[25].mxu1  ;;  %v6732_v58 = vpop.f32.mrb[26].mxu0 }
 0x23a   : > { %v5107_v34 = vmax.f32 %v5075_v10, 0.0  ;;  %v6778_v59 = vadd.f32 %v4945_v50, %v2808_v45  ;;  %v6540_v30 = vpop.f32.mrb[26].mxu1  ;;  %v4948_v19 = vpop.f32.mrb[27].mxu0 }
 0x23b   : > { %v6052_v52 = vpack.c.bf16 %v5109_v37, %v5108_v23  ;;  %v5041_v11 = vmul.f32 %v6777_v3, %v9026_v8  ;;  %v6779_v15 = vadd.f32 %v6732_v58, %v6540_v30  ;;  %v2811_v43 = vpop.f32.mrb[27].mxu1 }
 0x23c   : > { %v6047_v38 = vpack.c.bf16 %v5107_v34, %v5106_v22  ;;  %v5039_v56 = vmul.f32 %v6778_v59, %v9026_v8  ;;  %v6780_v1 = vadd.f32 %v4948_v19, %v2811_v43 }
 0x23d   : > { %6084 = vst [vmem:[%s9045_s25 + $0x58] sm:$0xff] %v6052_v52   ;;  %v5080_v31 = vadd.f32 %v9031_v12, %v5041_v11  ;;  %v5042_v63 = vmul.f32 %v6779_v15, %v9026_v8 }
 0x23e   : > { %6083 = vst [vmem:[%s9045_s25 + $0x50] sm:$0xff] %v6047_v38   ;;  %v5078_v20 = vadd.f32 %v9031_v12, %v5039_v56  ;;  %v5040_v29 = vmul.f32 %v6780_v1, %v9026_v8 }
 0x23f   : > { %v5081_v44 = vadd.f32 %v9031_v12, %v5042_v63  ;;  %v6735_v35 = vpop.f32.mrb[28].mxu0  ;;  %v5112_v7 = vmax.f32 %v5080_v31, 0.0 }
 0x240   : > { %v5079_v4 = vadd.f32 %v9031_v12, %v5040_v29  ;;  %v6543_v57 = vpop.f32.mrb[28].mxu1  ;;  %v4961_v53 = vpop.f32.mrb[29].mxu0  ;;  %v5110_v60 = vmax.f32 %v5078_v20, 0.0 }
 0x241   : > { %v5113_v25 = vmax.f32 %v5081_v44, 0.0  ;;  %v6781_v16 = vadd.f32 %v6735_v35, %v6543_v57  ;;  %v2824_v54 = vpop.f32.mrb[29].mxu1  ;;  %v6736_v13 = vpop.f32.mrb[30].mxu0 }
 0x242   : > { %v5111_v0 = vmax.f32 %v5079_v4, 0.0  ;;  %v6782_v27 = vadd.f32 %v4961_v53, %v2824_v54  ;;  %v6544_v46 = vpop.f32.mrb[30].mxu1  ;;  %v4964_v2 = vpop.f32.mrb[31].mxu0 }
 0x243   : > { %v6062_v42 = vpack.c.bf16 %v5113_v25, %v5112_v7  ;;  %v5045_v17 = vmul.f32 %v6781_v16, %v9026_v8  ;;  %v6783_v55 = vadd.f32 %v6736_v13, %v6544_v46  ;;  %v2827_v49 = vpop.f32.mrb[31].mxu1 }
 0x244   : > { %v6057_v28 = vpack.c.bf16 %v5111_v0, %v5110_v60  ;;  %v5043_v48 = vmul.f32 %v6782_v27, %v9026_v8  ;;  %v6784_v24 = vadd.f32 %v4964_v2, %v2827_v49 }
 0x245   : > { %6086 = vst [vmem:[%s9045_s25 + $0x68] sm:$0xff] %v6062_v42   ;;  %v5084_v36 = vadd.f32 %v9031_v12, %v5045_v17  ;;  %v5046_v40 = vmul.f32 %v6783_v55, %v9026_v8 }
 0x246   : > { %6085 = vst [vmem:[%s9045_s25 + $0x60] sm:$0xff] %v6057_v28   ;;  %v5082_v47 = vadd.f32 %v9031_v12, %v5043_v48  ;;  %v5044_v21 = vmul.f32 %v6784_v24, %v9026_v8 }
 0x247   : > { %v5085_v51 = vadd.f32 %v9031_v12, %v5046_v40  ;;  %v5116_v5 = vmax.f32 %v5084_v36, 0.0 }
 0x248   : > { %v5083_v32 = vadd.f32 %v9031_v12, %v5044_v21  ;;  %v5114_v62 = vmax.f32 %v5082_v47, 0.0 }
 0x249   : > { %v5117_v61 = vmax.f32 %v5085_v51, 0.0 }
 0x24a   : > { %v5115_v41 = vmax.f32 %v5083_v32, 0.0 }
 0x24b   : > { %v6072_v6 = vpack.c.bf16 %v5117_v61, %v5116_v5 }
 0x24c   : > { %v6067_v9 = vpack.c.bf16 %v5115_v41, %v5114_v62 }
 0x24d   : > { %6088 = vst [vmem:[%s9045_s25 + $0x78] sm:$0xff] %v6072_v6  }
 0x24e   : > { %6087 = vst [vmem:[%s9045_s25 + $0x70] sm:$0xff] %v6067_v9  }
 0x24f PF: > { %s14_s15 = sadd.s32 1, %s7214_s15  }
 0x250   : > { %p11_p4 = scmp.ge.s32.totalorder %s14_s15, 4  }
 0x252   :  { %13 = sbr.rel (!%p11_p4) target bundleno = 1 (0x1), region = 76 }

</bundles_post_ra>
